<compile_context>
chip_gen: v7x
topology: tpu7x:2x2x1
jax: 0.10.0
libtpu: 0.0.40
codegen_flags: <defaults>
</compile_context>

<pallas_src>
import numpy as np
import jax
import jax.numpy as jnp
from jax.experimental import pallas as pl
from jax.experimental.pallas import tpu as pltpu

N_SIGNALS = 4          # the undefined global `N_signals` in the PyTorch source
KERNEL_SIZE = 5
POOL = 3
N_FILTERS = 10
# Linear(9*10, 1) forces the flattened size to be 90 -> input length 97
SEQ_LEN = 97           # 97 -> conv 93 -> pool 31 -> conv 27 -> pool 9 ; 9*10 = 90
BATCH = 2

LC1 = SEQ_LEN - KERNEL_SIZE + 1     # 93
LP1 = LC1 // POOL                   # 31
LC2 = LP1 - KERNEL_SIZE + 1         # 27
LP2 = LC2 // POOL                   # 9

# Batch-fused MaxPool1d(3) is only valid when stride-3 windows never cross a
# batch boundary (review correctness concern).
assert LC1 % POOL == 0 and LC2 % POOL == 0, (
    "batch-fused MaxPool1d requires conv output lengths divisible by POOL")
assert LP2 * N_FILTERS == 90, "final Linear expects a flattened size of 90"

# Row offsets inside the packed parameter slab (all 8-row aligned).
_W1_R0 = 0                              # rows [0, 20)   : w1  (K*Cin, O)
_B1_R = 24                              # row  24        : b1  (1, O)
_W2_R0 = 32                             # rows [32, 82)  : w2  (K*O, O)
_B2_R = 88                              # row  88        : b2  (1, O)
_WL_R0 = 96                             # rows [96, 105) : w_lin (Lp2, O)
_BL_R = 112                             # row  112, col0 : b_lin scalar
_SLAB_ROWS = 120

MATMUL_DTYPE = jnp.float32


def _pool3_relu(x):
    """MaxPool1d(3) + ReLU over the row axis, entirely in registers.

    x: (rows, C) with rows % POOL == 0. Returns (rows // POOL, C).
    """
    rows, ch = x.shape
    r = x.reshape(rows // POOL, POOL, ch)
    m = jnp.maximum(jnp.maximum(r[:, 0, :], r[:, 1, :]), r[:, 2, :])
    return jnp.maximum(m, 0.0)


def _cnn_kernel(x_ref, p_ref, out_ref):
    """x_ref: (B, L0, Cin) channels-last; p_ref: (_SLAB_ROWS, O); out_ref: (B, 1)."""
    B = x_ref.shape[0]
    Cin = x_ref.shape[2]
    K = KERNEL_SIZE
    O = N_FILTERS

    x = x_ref[...].astype(MATMUL_DTYPE)                       # (B, L0, Cin)

    # ---------------- layer 1: in-kernel im2col -> ONE MXU matmul -------------
    # lhs1[b*Lc1 + t, k*Cin + i] = x[b, t+k, i]
    lhs1 = jnp.concatenate([x[:, k:k + LC1, :] for k in range(K)], axis=-1)
    lhs1 = lhs1.reshape(B * LC1, K * Cin)                     # (186, 20)
    w1 = p_ref[_W1_R0:_W1_R0 + K * Cin, :].astype(MATMUL_DTYPE)
    acc1 = jnp.dot(lhs1, w1, preferred_element_type=jnp.float32)
    acc1 = acc1 + p_ref[_B1_R:_B1_R + 1, :]                   # (B*Lc1, O)

    # ---------------- layer 1: MaxPool1d(3) + ReLU (batch-fused, in vregs) ----
    p1 = _pool3_relu(acc1)                                    # (B*Lp1, O)
    p1_3d = p1.reshape(B, LP1, O)

    # ---------------- layer 2: lane-concat shifted views -> ONE matmul --------
    # lhs2[b*Lc2 + t, k*O + i] = p1[b, t+k, i]
    lhs2 = jnp.concatenate([p1_3d[:, k:k + LC2, :] for k in range(K)], axis=-1)
    lhs2 = lhs2.reshape(B * LC2, K * O).astype(MATMUL_DTYPE)  # (54, 50)
    w2 = p_ref[_W2_R0:_W2_R0 + K * O, :].astype(MATMUL_DTYPE)
    acc2 = jnp.dot(lhs2, w2, preferred_element_type=jnp.float32)
    acc2 = acc2 + p_ref[_B2_R:_B2_R + 1, :]                   # (B*Lc2, O)

    # ---------------- layer 2: MaxPool1d(3) + ReLU ----------------------------
    p2 = _pool3_relu(acc2)                                    # (B*Lp2, O)
    p2_3d = p2.reshape(B, LP2, O)

    # ---------------- Flatten + Linear(90,1) + Sigmoid ------------------------
    # torch flatten index j = o*Lp2 + t; the slab holds w_lin as (Lp2, O).
    wl = p_ref[_WL_R0:_WL_R0 + LP2, :]                        # (Lp2, O)
    bl = p_ref[_BL_R:_BL_R + 1, 0:1]                          # (1, 1)
    t = jnp.sum(p2_3d * wl[None, :, :], axis=-1)              # (B, Lp2)
    z = jnp.sum(t, axis=-1, keepdims=True) + bl               # (B, 1)
    out_ref[...] = 1.0 / (1.0 + jnp.exp(-z))                  # single store for all B


def prepare_params(w1, b1, w2, b2, w_lin, b_lin):
    """One-time host-side packing: PyTorch layouts -> one 8-row-aligned slab."""
    O, cin, K = w1.shape
    w1f = jnp.transpose(w1, (2, 1, 0)).reshape(K * cin, O)    # (K*Cin, O)
    w2f = jnp.transpose(w2, (2, 1, 0)).reshape(K * O, O)      # (K*O,   O)
    wlf = jnp.transpose(w_lin.reshape(O, LP2), (1, 0))        # (Lp2,   O)

    slab = jnp.zeros((_SLAB_ROWS, O), jnp.float32)
    slab = slab.at[_W1_R0:_W1_R0 + K * cin, :].set(w1f)
    slab = slab.at[_B1_R, :].set(b1)
    slab = slab.at[_W2_R0:_W2_R0 + K * O, :].set(w2f)
    slab = slab.at[_B2_R, :].set(b2)
    slab = slab.at[_WL_R0:_WL_R0 + LP2, :].set(wlf)
    slab = slab.at[_BL_R, 0].set(b_lin[0])
    return slab


@jax.jit
def simple_1dcnn_forward(x, param_slab):
    """x: (B, C_in, L) in PyTorch NCL layout, float32. Returns shape (B,)."""
    B, cin, L0 = x.shape
    x_t = jnp.transpose(x, (0, 2, 1))                         # (B, L0, Cin) channels-last

    vmem = pl.BlockSpec(memory_space=pltpu.MemorySpace.VMEM)
    out = pl.pallas_call(
        _cnn_kernel,
        out_shape=jax.ShapeDtypeStruct((B, 1), jnp.float32),
        in_specs=[vmem, vmem],
        out_specs=vmem,
    )(x_t, param_slab)
    return out.reshape(-1)


def _reference_forward(x, w1, b1, w2, b2, w_lin, b_lin):
    """Plain-JAX reference matching the PyTorch forward (extract=False path)."""
    def conv1d(h, w, b):
        y = jax.lax.conv_general_dilated(
            h, w, window_strides=(1,), padding='VALID',
            dimension_numbers=('NCH', 'OIH', 'NCH'))
        return y + b[None, :, None]

    def block(h, w, b):
        c = conv1d(h, w, b)
        Bc, O, L = c.shape
        p = c[:, :, :(L // POOL) * POOL].reshape(Bc, O, L // POOL, POOL).max(-1)
        return jnp.maximum(p, 0.0)

    h = block(x, w1, b1)
    h = block(h, w2, b2)
    flat = h.reshape(h.shape[0], -1)
    y = flat @ w_lin.T + b_lin
    return jax.nn.sigmoid(y).reshape(-1)


if __name__ == "__main__":
    key = jax.random.PRNGKey(0)
    ks = jax.random.split(key, 8)

    # deterministic synthetic parameters (PyTorch layouts)
    x = jax.random.normal(ks[0], (BATCH, N_SIGNALS, SEQ_LEN), jnp.float32)
    w1 = jax.random.normal(ks[1], (N_FILTERS, N_SIGNALS, KERNEL_SIZE), jnp.float32) * 0.2
    b1 = jax.random.normal(ks[2], (N_FILTERS,), jnp.float32) * 0.1
    w2 = jax.random.normal(ks[3], (N_FILTERS, N_FILTERS, KERNEL_SIZE), jnp.float32) * 0.2
    b2 = jax.random.normal(ks[4], (N_FILTERS,), jnp.float32) * 0.1
    w_lin = jax.random.normal(ks[5], (1, 9 * N_FILTERS), jnp.float32) * 0.2
    b_lin = jax.random.normal(ks[6], (1,), jnp.float32) * 0.1

    param_slab = prepare_params(w1, b1, w2, b2, w_lin, b_lin)

    out = simple_1dcnn_forward(x, param_slab)
    out = jax.block_until_ready(out)

    ref = _reference_forward(x, w1, b1, w2, b2, w_lin, b_lin)
    if not np.allclose(np.asarray(out), np.asarray(ref), atol=1e-4, rtol=1e-4):
        raise AssertionError(f"mismatch: pallas={out} ref={ref}")
    assert out.shape == (BATCH,)
    # TODO(synk): the `extract=True` activation-list return path is not exposed
    # by the kernel (only the main forward output).
    print("KERNEL_OK")
</pallas_src>

<mosaic_0001>
module attributes {stable_mosaic.version = 11 : i64} {
  func.func @_cnn_kernel(%arg0: memref<2x97x4xf32, #tpu.memory_space<vmem>>, %arg1: memref<120x10xf32, #tpu.memory_space<vmem>>, %arg2: memref<2x1xf32, #tpu.memory_space<vmem>>) attributes {dimension_semantics = [], scalar_prefetch = 0 : i64, scratch_operands = 0 : i64, tpu.core_type = #tpu.core_type<tc>} {
    %c0 = arith.constant 0 : index
    %c0_0 = arith.constant 0 : index
    %c0_1 = arith.constant 0 : index
    %0 = vector.load %arg0[%c0, %c0_0, %c0_1] : memref<2x97x4xf32, #tpu.memory_space<vmem>>, vector<2x97x4xf32>
    %1 = vector.extract_strided_slice %0 {offsets = [0, 0, 0], sizes = [2, 93, 4], strides = [1, 1, 1]} : vector<2x97x4xf32> to vector<2x93x4xf32>
    %2 = vector.extract_strided_slice %0 {offsets = [0, 1, 0], sizes = [2, 93, 4], strides = [1, 1, 1]} : vector<2x97x4xf32> to vector<2x93x4xf32>
    %3 = vector.extract_strided_slice %0 {offsets = [0, 2, 0], sizes = [2, 93, 4], strides = [1, 1, 1]} : vector<2x97x4xf32> to vector<2x93x4xf32>
    %4 = vector.extract_strided_slice %0 {offsets = [0, 3, 0], sizes = [2, 93, 4], strides = [1, 1, 1]} : vector<2x97x4xf32> to vector<2x93x4xf32>
    %5 = vector.extract_strided_slice %0 {offsets = [0, 4, 0], sizes = [2, 93, 4], strides = [1, 1, 1]} : vector<2x97x4xf32> to vector<2x93x4xf32>
    %6 = tpu.concatenate %1, %2, %3, %4, %5 in 2 : vector<2x93x4xf32>, vector<2x93x4xf32>, vector<2x93x4xf32>, vector<2x93x4xf32>, vector<2x93x4xf32> -> vector<2x93x20xf32>
    %7 = vector.shape_cast %6 : vector<2x93x20xf32> to vector<186x20xf32>
    %c0_2 = arith.constant 0 : index
    %c0_3 = arith.constant 0 : index
    %8 = vector.load %arg1[%c0_2, %c0_3] : memref<120x10xf32, #tpu.memory_space<vmem>>, vector<20x10xf32>
    %cst = arith.constant dense<0.000000e+00> : vector<186x10xf32>
    %9 = tpu.matmul %7, %8, %cst {dimension_numbers = #tpu.dot_dimension_numbers<[1], [0], [0], [1], [0, 0, 1, 1], [], []>} : vector<186x20xf32>, vector<20x10xf32>, vector<186x10xf32> -> vector<186x10xf32>
    %c24 = arith.constant 24 : index
    %c0_4 = arith.constant 0 : index
    %10 = vector.load %arg1[%c24, %c0_4] : memref<120x10xf32, #tpu.memory_space<vmem>>, vector<1x10xf32>
    %11 = vector.broadcast %10 : vector<1x10xf32> to vector<186x10xf32>
    %12 = arith.addf %9, %11 : vector<186x10xf32>
    %13 = vector.shape_cast %12 : vector<186x10xf32> to vector<62x3x10xf32>
    %14 = vector.extract_strided_slice %13 {offsets = [0, 0, 0], sizes = [62, 1, 10], strides = [1, 1, 1]} : vector<62x3x10xf32> to vector<62x1x10xf32>
    %15 = vector.shape_cast %14 : vector<62x1x10xf32> to vector<62x10xf32>
    %16 = vector.extract_strided_slice %13 {offsets = [0, 1, 0], sizes = [62, 1, 10], strides = [1, 1, 1]} : vector<62x3x10xf32> to vector<62x1x10xf32>
    %17 = vector.shape_cast %16 : vector<62x1x10xf32> to vector<62x10xf32>
    %18 = arith.maximumf %15, %17 : vector<62x10xf32>
    %19 = vector.extract_strided_slice %13 {offsets = [0, 2, 0], sizes = [62, 1, 10], strides = [1, 1, 1]} : vector<62x3x10xf32> to vector<62x1x10xf32>
    %20 = vector.shape_cast %19 : vector<62x1x10xf32> to vector<62x10xf32>
    %21 = arith.maximumf %18, %20 : vector<62x10xf32>
    %cst_5 = arith.constant 0.000000e+00 : f32
    %22 = vector.broadcast %cst_5 : f32 to vector<62x10xf32>
    %23 = arith.maximumf %21, %22 : vector<62x10xf32>
    %24 = vector.shape_cast %23 : vector<62x10xf32> to vector<2x31x10xf32>
    %25 = vector.extract_strided_slice %24 {offsets = [0, 0, 0], sizes = [2, 27, 10], strides = [1, 1, 1]} : vector<2x31x10xf32> to vector<2x27x10xf32>
    %26 = vector.extract_strided_slice %24 {offsets = [0, 1, 0], sizes = [2, 27, 10], strides = [1, 1, 1]} : vector<2x31x10xf32> to vector<2x27x10xf32>
    %27 = vector.extract_strided_slice %24 {offsets = [0, 2, 0], sizes = [2, 27, 10], strides = [1, 1, 1]} : vector<2x31x10xf32> to vector<2x27x10xf32>
    %28 = vector.extract_strided_slice %24 {offsets = [0, 3, 0], sizes = [2, 27, 10], strides = [1, 1, 1]} : vector<2x31x10xf32> to vector<2x27x10xf32>
    %29 = vector.extract_strided_slice %24 {offsets = [0, 4, 0], sizes = [2, 27, 10], strides = [1, 1, 1]} : vector<2x31x10xf32> to vector<2x27x10xf32>
    %30 = tpu.concatenate %25, %26, %27, %28, %29 in 2 : vector<2x27x10xf32>, vector<2x27x10xf32>, vector<2x27x10xf32>, vector<2x27x10xf32>, vector<2x27x10xf32> -> vector<2x27x50xf32>
    %31 = vector.shape_cast %30 : vector<2x27x50xf32> to vector<54x50xf32>
    %c32 = arith.constant 32 : index
    %c0_6 = arith.constant 0 : index
    %32 = vector.load %arg1[%c32, %c0_6] : memref<120x10xf32, #tpu.memory_space<vmem>>, vector<50x10xf32>
    %cst_7 = arith.constant dense<0.000000e+00> : vector<54x10xf32>
    %33 = tpu.matmul %31, %32, %cst_7 {dimension_numbers = #tpu.dot_dimension_numbers<[1], [0], [0], [1], [0, 0, 1, 1], [], []>} : vector<54x50xf32>, vector<50x10xf32>, vector<54x10xf32> -> vector<54x10xf32>
    %c88 = arith.constant 88 : index
    %c0_8 = arith.constant 0 : index
    %34 = vector.load %arg1[%c88, %c0_8] : memref<120x10xf32, #tpu.memory_space<vmem>>, vector<1x10xf32>
    %35 = vector.broadcast %34 : vector<1x10xf32> to vector<54x10xf32>
    %36 = arith.addf %33, %35 : vector<54x10xf32>
    %37 = vector.shape_cast %36 : vector<54x10xf32> to vector<18x3x10xf32>
    %38 = vector.extract_strided_slice %37 {offsets = [0, 0, 0], sizes = [18, 1, 10], strides = [1, 1, 1]} : vector<18x3x10xf32> to vector<18x1x10xf32>
    %39 = vector.shape_cast %38 : vector<18x1x10xf32> to vector<18x10xf32>
    %40 = vector.extract_strided_slice %37 {offsets = [0, 1, 0], sizes = [18, 1, 10], strides = [1, 1, 1]} : vector<18x3x10xf32> to vector<18x1x10xf32>
    %41 = vector.shape_cast %40 : vector<18x1x10xf32> to vector<18x10xf32>
    %42 = arith.maximumf %39, %41 : vector<18x10xf32>
    %43 = vector.extract_strided_slice %37 {offsets = [0, 2, 0], sizes = [18, 1, 10], strides = [1, 1, 1]} : vector<18x3x10xf32> to vector<18x1x10xf32>
    %44 = vector.shape_cast %43 : vector<18x1x10xf32> to vector<18x10xf32>
    %45 = arith.maximumf %42, %44 : vector<18x10xf32>
    %cst_9 = arith.constant 0.000000e+00 : f32
    %46 = vector.broadcast %cst_9 : f32 to vector<18x10xf32>
    %47 = arith.maximumf %45, %46 : vector<18x10xf32>
    %48 = vector.shape_cast %47 : vector<18x10xf32> to vector<2x9x10xf32>
    %c96 = arith.constant 96 : index
    %c0_10 = arith.constant 0 : index
    %49 = vector.load %arg1[%c96, %c0_10] : memref<120x10xf32, #tpu.memory_space<vmem>>, vector<9x10xf32>
    %c112 = arith.constant 112 : index
    %c0_11 = arith.constant 0 : index
    %50 = vector.load %arg1[%c112, %c0_11] : memref<120x10xf32, #tpu.memory_space<vmem>>, vector<1x1xf32>
    %51 = vector.shape_cast %49 : vector<9x10xf32> to vector<1x9x10xf32>
    %52 = vector.broadcast %51 : vector<1x9x10xf32> to vector<2x9x10xf32>
    %53 = arith.mulf %48, %52 : vector<2x9x10xf32>
    %cst_12 = arith.constant dense<0.000000e+00> : vector<2x9xf32>
    %54 = vector.multi_reduction <add>, %53, %cst_12 [2] : vector<2x9x10xf32> to vector<2x9xf32>
    %cst_13 = arith.constant dense<0.000000e+00> : vector<2xf32>
    %55 = vector.multi_reduction <add>, %54, %cst_13 [1] : vector<2x9xf32> to vector<2xf32>
    %56 = vector.shape_cast %55 : vector<2xf32> to vector<2x1xf32>
    %57 = vector.broadcast %50 : vector<1x1xf32> to vector<2x1xf32>
    %58 = arith.addf %56, %57 : vector<2x1xf32>
    %cst_14 = arith.constant 0.000000e+00 : f32
    %59 = vector.broadcast %cst_14 : f32 to vector<2x1xf32>
    %60 = arith.subf %59, %58 : vector<2x1xf32>
    %61 = math.exp %60 : vector<2x1xf32>
    %cst_15 = arith.constant 1.000000e+00 : f32
    %62 = vector.broadcast %cst_15 : f32 to vector<2x1xf32>
    %63 = arith.addf %62, %61 : vector<2x1xf32>
    %cst_16 = arith.constant 1.000000e+00 : f32
    %64 = vector.broadcast %cst_16 : f32 to vector<2x1xf32>
    %65 = arith.divf %64, %63 : vector<2x1xf32>
    %c0_17 = arith.constant 0 : index
    %c0_18 = arith.constant 0 : index
    %66 = vector.load %arg2[%c0_17, %c0_18] : memref<2x1xf32, #tpu.memory_space<vmem>>, vector<2x1xf32>
    tpu.vector_store %arg2[%c0_17, %c0_18], %65 {strides = array<i32>} : memref<2x1xf32, #tpu.memory_space<vmem>>, vector<2x1xf32>,
    return
  }
}

</mosaic_0001>

<bundles_post_ra>
// kernel: simple_1dcnn_forward.1
= control target key start
LH: loop header
LB: loop body
LE: loop exit
PB: predicated region body
PF: predicated region fallthrough
CT: control target
= control target key end

     0   :  { %vm180_vm0 = vcmask 1045504   ;;  %vm61_vm1 = vcmask 1046528   ;;  %s7803_s15 = smov 8   ;;  %s7804_s16 = smov 4   ;;  %vm299_vm2 = vcmask 1044480   ;;  %vm420_vm3 = vcmask 1043456   ;;  %s9851_s0 = inlined_call_operand.vmem [shape: f32[2,97,4], index: 0, kind: input, shape index: {}]   ;;  %s9852_s1 = inlined_call_operand.vmem [shape: f32[120,10], index: 1, kind: input, shape index: {}]   ;;  %s9853_s2 = inlined_call_operand.vmem [shape: f32[2,1], index: 2, kind: output, shape index: {}]  }
   0x1   :  { %v7833_v0 = vld [vmem:[%s9851_s0] sm:$0xff]  ;;  %v7838_v1 = vld [vmem:[%s9851_s0 + $0x8] sm:$0xff]  ;;  %v7843_v2 = vld [vmem:[%s9851_s0 + $0x10] sm:$0xff]  ;;  %s7805_s21 = smov 12   ;;  %s7806_s22 = smov 16   ;;  %vm543_vm4 = vcmask 31744  }
   0x2   :  { %v181_v3 = vrot.slane %v7833_v0, 2  ;;  %v182_v4 = vrot.slane %v7838_v1, 2  ;;  %v62_v5 = vrot.slane %v7833_v0, 1  ;;  %v63_v6 = vrot.slane %v7838_v1, 1  ;;  %v7863_v16 = vld [vmem:[%s9851_s0 + $0x18] sm:$0xff]  ;;  %v7875_v22 = vld [vmem:[%s9851_s0 + $0x20] sm:$0xff] }
   0x3   :  { %v184_v7 = vrot.slane %v7843_v2, 2  ;;  %v65_v8 = vrot.slane %v7843_v2, 1  ;;  %v301_v11 = vrot.slane %v7838_v1, 3  ;;  %v303_v14 = vrot.slane %v7843_v2, 3  ;;  %v7898_v35 = vld [vmem:[%s9851_s0 + $0x28] sm:$0xff]  ;;  %v7912_v41 = vld [vmem:[%s9851_s0 + $0x30] sm:$0xff] }
   0x4   :  { %v183_v9 = vsel %vm180_vm0, %v181_v3, %v182_v4  ;;  %v64_v10 = vsel %vm61_vm1, %v62_v5, %v63_v6  ;;  %v300_v15 = vrot.slane %v7833_v0, 3  ;;  %v67_v17 = vrot.slane %v7863_v16, 1  ;;  %v23_v37 = vld [vmem:[%s9851_s0 + $0x60] sm:$0x1]  ;;  %v7917_v42 = vld [vmem:[%s9851_s0 + $0x58] sm:$0xff]  ;;  %v1824_v55 = vld [vmem:[%s9852_s1 + $0x8] sm:$0xff] }
   0x5   :  { %227 = vrot.lane.b32.xlu1 %v183_v9, %s7803_s15  ;;  %108 = vrot.lane.b32.xlu0 %v64_v10, %s7804_s16  ;;  %v185_v12 = vsel %vm180_vm0, %v182_v4, %v184_v7  ;;  %v66_v13 = vsel %vm61_vm1, %v63_v6, %v65_v8  ;;  %v304_v18 = vsel %vm299_vm2, %v301_v11, %v303_v14  ;;  %v421_v20 = vrot.slane %v7833_v0, 4  ;;  %v1823_v54 = vld [vmem:[%s9852_s1] sm:$0xff]  ;;  %v7952_v60 = vld [vmem:[%s9851_s0 + $0x38] sm:$0xff]  ;;  %s7808_s20 = smov 10  }
   0x6   :  { %v302_v19 = vsel %vm299_vm2, %v300_v15, %v301_v11  ;;  %v422_v21 = vrot.slane %v7838_v1, 4  ;;  %v68_v23 = vsel %vm61_vm1, %v65_v8, %v67_v17  ;;  %v69_v25 = vrot.slane %v7875_v22, 1  ;;  %v1825_v62 = vld [vmem:[%s9852_s1 + $0x10] sm:$0xf]  ;;  %v7966_v6 = vld [vmem:[%s9851_s0 + $0x40] sm:$0xff] }
   0x7   :  { %v424_v26 = vrot.slane %v7843_v2, 4  ;;  %v186_v29 = vrot.slane %v7863_v16, 2  ;;  %v188_v30 = vrot.slane %v7875_v22, 2  ;;  %v305_v33 = vrot.slane %v7863_v16, 3 }
   0x8   :  { %v423_v24 = vsel %vm420_vm3, %v421_v20, %v422_v21  ;;  %v70_v27 = vsel %vm61_vm1, %v67_v17, %v69_v25  ;;  %v307_v34 = vrot.slane %v7875_v22, 3  ;;  %v71_v36 = vrot.slane %v7898_v35, 1  ;;  %v7991_v20 = vld [vmem:[%s9851_s0 + $0x48] sm:$0xff] }
   0x9   :  { %229 = vrot.lane.b32.xlu1 %v185_v12, %s7803_s15  ;;  %110 = vrot.lane.b32.xlu0 %v66_v13, %s7804_s16  ;;  %v425_v28 = vsel %vm420_vm3, %v422_v21, %v424_v26  ;;  %v189_v31 = vsel %vm180_vm0, %v186_v29, %v188_v30  ;;  %v187_v32 = vsel %vm180_vm0, %v184_v7, %v186_v29  ;;  %v426_v40 = vrot.slane %v7863_v16, 4 }
   0xa   :  { %v308_v38 = vsel %vm299_vm2, %v305_v33, %v307_v34  ;;  %v306_v39 = vsel %vm299_vm2, %v303_v14, %v305_v33  ;;  %v442_v43 = vrot.slane %v7917_v42, 4  ;;  %v444_v44 = vrot.slane %v23_v37, 4  ;;  %v8017_v33 = vld [vmem:[%s9851_s0 + $0xc0] sm:$0xff] }
   0xb   :  { %v72_v45 = vsel %vm61_vm1, %v69_v25, %v71_v36  ;;  %v427_v46 = vsel %vm420_vm3, %v424_v26, %v426_v40  ;;  %v73_v47 = vrot.slane %v7912_v41, 1  ;;  %v428_v48 = vrot.slane %v7875_v22, 4  ;;  %v8002_v26 = vld [vmem:[%s9851_s0 + $0x50] sm:$0xff] }
   0xc   :  { %v7929_v49 = vsel %vm420_vm3, %v442_v43, %v444_v44  ;;  %v190_v52 = vrot.slane %v7898_v35, 2  ;;  %v192_v53 = vrot.slane %v7912_v41, 2  ;;  %v309_v58 = vrot.slane %v7898_v35, 3 }
   0xd   :  { %348 = vrot.lane.b32.xlu1 %v304_v18, %s7805_s21  ;;  %346 = vrot.lane.b32.xlu0 %v302_v19, %s7805_s21  ;;  %v74_v50 = vsel %vm61_vm1, %v71_v36, %v73_v47  ;;  %v429_v51 = vsel %vm420_vm3, %v426_v40, %v428_v48  ;;  %v311_v59 = vrot.slane %v7912_v41, 3  ;;  %v7759_v61 = vpack.c.bf16 %v1824_v55, %v1823_v54 }
   0xe   :  { %v193_v56 = vsel %vm180_vm0, %v190_v52, %v192_v53  ;;  %v191_v57 = vsel %vm180_vm0, %v188_v30, %v190_v52  ;;  %v310_v3 = vsel %vm299_vm2, %v307_v34, %v309_v58  ;;  %v75_v4 = vrot.slane %v7952_v60, 1  ;;  %v36_v34 = vld [vmem:[%s9851_s0 + $0xc8] sm:$0x1] }
   0xf   :  { %v312_v63 = vsel %vm299_vm2, %v309_v58, %v311_v59  ;;  %v430_v5 = vrot.slane %v7898_v35, 4  ;;  %7760 = vmatprep.subr.bf16.mxu0 %v7759_v61  ;;  %v77_v9 = vrot.slane %v7966_v6, 1  ;;  %v432_v10 = vrot.slane %v7912_v41, 4  ;;  %v25_v58 = vld [vmem:[%s9851_s0 + $0x70] sm:$0xff] }
  0x10   :  { %7762 = vmatpush3.bf16.msra.mxu0 %v7759_v61  ;;  %v76_v7 = vsel %vm61_vm1, %v73_v47, %v75_v4  ;;  %v194_v13 = vrot.slane %v7952_v60, 2  ;;  %v196_v14 = vrot.slane %v7966_v6, 2  ;;  %v313_v18 = vrot.slane %v7952_v60, 3 }
  0x11   :  { %112 = vrot.lane.b32.xlu1 %v68_v23, %s7804_s16  ;;  %471 = vrot.lane.b32.xlu0 %v423_v24, %s7806_s22  ;;  %v431_v8 = vsel %vm420_vm3, %v428_v48, %v430_v5  ;;  %v78_v11 = vsel %vm61_vm1, %v75_v4, %v77_v9  ;;  %v433_v12 = vsel %vm420_vm3, %v430_v5, %v432_v10  ;;  %v315_v19 = vrot.slane %v7966_v6, 3  ;;  %v8062_v4 = vld [vmem:[%s9851_s0 + $0x78] sm:$0xff] }
  0x12   :  { %7686 = vmatprep.subr.msk.mxu0 %vm420_vm3, %v1825_v62  ;;  %v197_v15 = vsel %vm180_vm0, %v194_v13, %v196_v14  ;;  %v195_v17 = vsel %vm180_vm0, %v192_v53, %v194_v13  ;;  %v314_v23 = vsel %vm299_vm2, %v311_v59, %v313_v18  ;;  %v79_v24 = vrot.slane %v7991_v20, 1 }
  0x13   :  { %v316_v21 = vsel %vm299_vm2, %v313_v18, %v315_v19  ;;  %v434_v25 = vrot.slane %v7952_v60, 4  ;;  %v81_v29 = vrot.slane %v8002_v26, 1  ;;  %v436_v30 = vrot.slane %v7966_v6, 4 }
  0x14   :  { %7687 = vmatpush3.msk.msra.mxu0 %vm420_vm3, %v1825_v62  ;;  %v319_v47 = vrot.slane %v8002_v26, 3  ;;  %v438_v52 = vrot.slane %v7991_v20, 4  ;;  %v202_v55 = vrot.slane %v7917_v42, 2  ;;  %v321_v59 = vrot.slane %v7917_v42, 3 }
  0x15   :  { %114 = vrot.lane.b32.xlu1 %v70_v27, %s7804_s16  ;;  %473 = vrot.lane.b32.xlu0 %v425_v28, %s7806_s22  ;;  %v80_v27 = vsel %vm61_vm1, %v77_v9, %v79_v24  ;;  %v435_v28 = vsel %vm420_vm3, %v432_v10, %v434_v25  ;;  %v82_v36 = vsel %vm61_vm1, %v79_v24, %v81_v29  ;;  %v324_v18 = vrot.slane %v25_v58, 3 }
  0x16   :  { %v437_v37 = vsel %vm420_vm3, %v434_v25, %v436_v30  ;;  %v439_v54 = vsel %vm420_vm3, %v436_v30, %v438_v52  ;;  %v322_v5 = vsel %vm299_vm2, %v319_v47, %v321_v59  ;;  %vm568_vm5 = vcmask 64512  }
  0x17   :  { %vm593_vm6 = vcmask 97280   ;;  %vm618_vm7 = vcmask 130048   ;;  %vm2973_vm8 = vcmask 162816   ;;  %vm7813_vm9 = vmmov 0  }
  0x18   :  { %vm6709_vm10 = vcmask 1041408   ;;  %vm5965_vm11 = vcmask 80896   ;;  %vm5982_vm12 = vcmask 244736   ;;  %vm5991_vm13 = vcmask 326656  }
  0x19   :  { %233 = vrot.lane.b32.xlu1 %v189_v31, %s7803_s15  ;;  %231 = vrot.lane.b32.xlu0 %v187_v32, %s7803_s15  ;;  %v198_v31 = vrot.slane %v7991_v20, 2  ;;  %v200_v32 = vrot.slane %v8002_v26, 2  ;;  %vm6694_vm14 = vcmask 408576   ;;  %vm7515_vm15 = vcmask 73728  }
  0x1b   :  { %v201_v44 = vsel %vm180_vm0, %v198_v31, %v200_v32  ;;  %v203_v61 = vsel %vm180_vm0, %v200_v32, %v202_v55 }
  0x1d   :  { %352 = vrot.lane.b32.xlu1 %v308_v38, %s7805_s21  ;;  %350 = vrot.lane.b32.xlu0 %v306_v39, %s7805_s21  ;;  %v467_v38 = vrot.slane %v8017_v33, 4  ;;  %v469_v39 = vrot.slane %v36_v34, 4 }
  0x1f   :  { %v8028_v40 = vsel %vm420_vm3, %v467_v38, %v469_v39 }
  0x21   :  { %116 = vrot.lane.b32.xlu1 %v72_v45, %s7804_s16  ;;  %475 = vrot.lane.b32.xlu0 %v427_v46, %s7806_s22  ;;  %v199_v45 = vsel %vm180_vm0, %v196_v14, %v198_v31  ;;  %v317_v46 = vrot.slane %v7991_v20, 3  ;;  %v207_v14 = vrot.slane %v8062_v4, 2  ;;  %v449_v31 = vrot.slane %v8062_v4, 4 }
  0x23   :  { %v320_v48 = vsel %vm299_vm2, %v317_v46, %v319_v47 }
  0x25   :  { %118 = vrot.lane.b32.xlu1 %v74_v50, %s7804_s16  ;;  %477 = vrot.lane.b32.xlu0 %v429_v51, %s7806_s22  ;;  %v318_v50 = vsel %vm299_vm2, %v315_v19, %v317_v46  ;;  %v83_v51 = vrot.slane %v7917_v42, 1 }
  0x27   :  { %v84_v53 = vsel %vm61_vm1, %v81_v29, %v83_v51 }
  0x29   :  { %237 = vrot.lane.b32.xlu1 %v193_v56, %s7803_s15  ;;  %235 = vrot.lane.b32.xlu0 %v191_v57, %s7803_s15  ;;  %v440_v56 = vrot.slane %v8002_v26, 4  ;;  %v24_v57 = vld [vmem:[%s9851_s0 + $0x68] sm:$0xff] }
  0x2a   :  { %v204_v10 = vrot.slane %v24_v57, 2  ;;  %v446_v19 = vrot.slane %v24_v57, 4 }
  0x2b   :  { %v441_v62 = vsel %vm420_vm3, %v438_v52, %v440_v56  ;;  %v671_v52 = vlaneseq }
  0x2d   :  { %356 = vrot.lane.b32.xlu1 %v312_v63, %s7805_s21  ;;  %354 = vrot.lane.b32.xlu0 %v310_v3, %s7805_s21  ;;  %v85_v63 = vrot.slane %v24_v57, 1  ;;  %v86_v3 = vrot.slane %v25_v58, 1 }
  0x31   :  { %120 = vrot.lane.b32.xlu1 %v76_v7, %s7804_s16  ;;  %479 = vrot.lane.b32.xlu0 %v431_v8, %s7806_s22  ;;  %v87_v7 = vsel %vm61_vm1, %v85_v63, %v86_v3  ;;  %v88_v8 = vrot.slane %v8062_v4, 1 }
  0x33   :  { %v89_v9 = vsel %vm61_vm1, %v86_v3, %v88_v8 }
  0x35   :  { %122 = vrot.lane.b32.xlu1 %v78_v11, %s7804_s16  ;;  %481 = vrot.lane.b32.xlu0 %v433_v12, %s7806_s22  ;;  %v205_v11 = vrot.slane %v25_v58, 2  ;;  %v443_v12 = vsel %vm420_vm3, %v440_v56, %v442_v43  ;;  %v447_v43 = vrot.slane %v25_v58, 4 }
  0x37   :  { %v206_v13 = vsel %vm180_vm0, %v204_v10, %v205_v11  ;;  %v448_v24 = vsel %vm420_vm3, %v446_v19, %v447_v43  ;;  %v8149_v10 = vld [vmem:[%s9851_s0 + $0xa0] sm:$0xff] }
  0x39   :  { %241 = vrot.lane.b32.xlu1 %v197_v15, %s7803_s15  ;;  %239 = vrot.lane.b32.xlu0 %v195_v17, %s7803_s15  ;;  %v208_v15 = vsel %vm180_vm0, %v205_v11, %v207_v14  ;;  %v323_v17 = vrot.slane %v24_v57, 3 }
  0x3b   :  { %v325_v42 = vsel %vm299_vm2, %v323_v17, %v324_v18 }
  0x3d   :  { %360 = vrot.lane.b32.xlu1 %v316_v21, %s7805_s21  ;;  %358 = vrot.lane.b32.xlu0 %v314_v23, %s7805_s21  ;;  %v326_v21 = vrot.slane %v8062_v4, 3  ;;  %v8089_v23 = vld [vmem:[%s9851_s0 + $0x80] sm:$0xff] }
  0x3e   :  { %v209_v32 = vrot.slane %v8089_v23, 2  ;;  %v451_v56 = vrot.slane %v8089_v23, 4 }
  0x3f   :  { %v327_v25 = vsel %vm299_vm2, %v324_v18, %v326_v21 }
  0x40   :  { %v210_v39 = vsel %vm180_vm0, %v207_v14, %v209_v32  ;;  %v452_v3 = vsel %vm420_vm3, %v449_v31, %v451_v56 }
  0x41   :  { %124 = vrot.lane.b32.xlu1 %v80_v27, %s7804_s16  ;;  %483 = vrot.lane.b32.xlu0 %v435_v28, %s7806_s22  ;;  %v90_v27 = vrot.slane %v8089_v23, 1  ;;  %v8099_v28 = vld [vmem:[%s9851_s0 + $0x88] sm:$0xff] }
  0x42   :  { %v92_v30 = vrot.slane %v8099_v28, 1 }
  0x43   :  { %v91_v29 = vsel %vm61_vm1, %v88_v8, %v90_v27 }
  0x44   :  { %v93_v34 = vsel %vm61_vm1, %v90_v27, %v92_v30 }
  0x45   :  { %126 = vrot.lane.b32.xlu1 %v82_v36, %s7804_s16  ;;  %485 = vrot.lane.b32.xlu0 %v437_v37, %s7806_s22  ;;  %v450_v36 = vsel %vm420_vm3, %v447_v43, %v449_v31  ;;  %v211_v37 = vrot.slane %v8099_v28, 2 }
  0x49   :  { %245 = vrot.lane.b32.xlu1 %v201_v44, %s7803_s15  ;;  %243 = vrot.lane.b32.xlu0 %v199_v45, %s7803_s15  ;;  %v212_v44 = vsel %vm180_vm0, %v209_v32, %v211_v37  ;;  %v330_v45 = vrot.slane %v8099_v28, 3 }
  0x4d   :  { %364 = vrot.lane.b32.xlu1 %v320_v48, %s7805_s21  ;;  %362 = vrot.lane.b32.xlu0 %v318_v50, %s7805_s21  ;;  %v8122_v48 = vld [vmem:[%s9851_s0 + $0x90] sm:$0xff]  ;;  %v7807_v50 = vmov 1966171168  }
  0x51   :  { %128 = vrot.lane.b32.xlu1 %v84_v53, %s7804_s16  ;;  %487 = vrot.lane.b32.xlu0 %v439_v54, %s7806_s22 }
  0x55   :  { %247 = vrot.lane.b32.xlu1 %v203_v61, %s7803_s15  ;;  %489 = vrot.lane.b32.xlu0 %v441_v62, %s7806_s22  ;;  %v8138_v62 = vshrl.u32 %v671_v52, 7 }
  0x59   :  { %366 = vrot.lane.b32.xlu1 %v322_v5, %s7805_s21  ;;  %132 = vrot.lane.b32.xlu0 %v87_v7, %s7804_s16  ;;  %v453_v5 = vrot.slane %v8099_v28, 4 }
  0x5b   :  { %v454_v17 = vsel %vm420_vm3, %v451_v56, %v453_v5 }
  0x5d   :  { %134 = vrot.lane.b32.xlu1 %v89_v9, %s7804_s16  ;;  %130 = vrot.lane.b32.xlu0 %v83_v51, %s7804_s16  ;;  %v669_v51 = vunpack.c.l.s4 %v7807_v50 }
  0x5f   :  { %v670_v61 = vunpack.c.0.s8 %v669_v51 }
  0x61   :  { %491 = vrot.lane.b32.xlu1 %v443_v12, %s7806_s22  ;;  %251 = vrot.lane.b32.xlu0 %v206_v13, %s7803_s15  ;;  %v8154_v11 = vsub.s32 %v670_v61, %v8138_v62  ;;  %v213_v12 = vrot.slane %v8122_v48, 2  ;;  %v332_v13 = vrot.slane %v8122_v48, 3 }
  0x63   :  { %v333_v32 = vsel %vm299_vm2, %v330_v45, %v332_v13 }
  0x65   :  { %253 = vrot.lane.b32.xlu1 %v208_v15, %s7803_s15  ;;  %249 = vrot.lane.b32.xlu0 %v202_v55, %s7803_s15  ;;  %v94_v55 = vrot.slane %v8122_v48, 1 }
  0x67   :  { %v95_v63 = vsel %vm61_vm1, %v92_v30, %v94_v55  ;;  %v214_v30 = vsel %vm180_vm0, %v211_v37, %v213_v12  ;;  %v455_v37 = vrot.slane %v8122_v48, 4  ;;  %v217_v48 = vrot.slane %v8149_v10, 2 }
  0x69   :  { %368 = vrot.lane.b32.xlu1 %v321_v59, %s7805_s21  ;;  %370 = vrot.lane.b32.xlu0 %v325_v42, %s7805_s21  ;;  %v8133_v59 = vld [vmem:[%s9851_s0 + $0x98] sm:$0xff] }
  0x6a   :  { %v96_v4 = vrot.slane %v8133_v59, 1  ;;  %v334_v18 = vrot.slane %v8133_v59, 3  ;;  %v457_v51 = vrot.slane %v8133_v59, 4 }
  0x6c   :  { %v97_v15 = vsel %vm61_vm1, %v94_v55, %v96_v4  ;;  %v335_v31 = vsel %vm299_vm2, %v332_v13, %v334_v18 }
  0x6d   :  { %495 = vrot.lane.b32.xlu1 %v448_v24, %s7806_s22  ;;  %372 = vrot.lane.b32.xlu0 %v327_v25, %s7805_s21 }
  0x71   :  { %493 = vrot.lane.b32.xlu1 %v7929_v49, %s7806_s22  ;;  %136 = vrot.lane.b32.xlu0 %v91_v29, %s7804_s16  ;;  %v328_v49 = vrot.slane %v8089_v23, 3  ;;  %v98_v23 = vrot.slane %v8149_v10, 1 }
  0x73   :  { %v331_v53 = vsel %vm299_vm2, %v328_v49, %v330_v45  ;;  %v329_v54 = vsel %vm299_vm2, %v326_v21, %v328_v49 }
  0x75   :  { %138 = vrot.lane.b32.xlu1 %v93_v34, %s7804_s16  ;;  %497 = vrot.lane.b32.xlu0 %v450_v36, %s7806_s22 }
  0x77   :  { %v228_v46 = vpop.permute.xlu1 %227  ;;  %v109_v47 = vpop.permute.xlu0 %108 }
  0x78   :  { %v544_v7 = vsel %vm543_vm4, %v7833_v0, %v109_v47  ;;  %v215_v0 = vrot.slane %v8133_v59, 2 }
  0x79   :  { %257 = vrot.lane.b32.xlu1 %v212_v44, %s7803_s15  ;;  %255 = vrot.lane.b32.xlu0 %v210_v39, %s7803_s15  ;;  %v569_v14 = vsel %vm568_vm5, %v544_v7, %v228_v46  ;;  %v99_v46 = vsel %vm61_vm1, %v96_v4, %v98_v23 }
  0x7a   :  { %v216_v28 = vsel %vm180_vm0, %v213_v12, %v215_v0  ;;  %v456_v12 = vsel %vm420_vm3, %v453_v5, %v455_v37 }
  0x7b   :  { %v230_v57 = vpop.permute.xlu1 %229  ;;  %v111_v58 = vpop.permute.xlu0 %110 }
  0x7c   :  { %v545_v42 = vsel %vm543_vm4, %v7838_v1, %v111_v58  ;;  %v8177_v1 = vld [vmem:[%s9851_s0 + $0xa8] sm:$0xff] }
  0x7d   :  { %376 = vrot.lane.b32.xlu1 %v331_v53, %s7805_s21  ;;  %374 = vrot.lane.b32.xlu0 %v329_v54, %s7805_s21  ;;  %v570_v29 = vsel %vm568_vm5, %v545_v42, %v230_v57  ;;  %v100_v50 = vrot.slane %v8177_v1, 1  ;;  %v219_v58 = vrot.slane %v8177_v1, 2 }
  0x7f   :  { %v349_v8 = vpop.permute.xlu1 %348  ;;  %v347_v9 = vpop.permute.xlu0 %346  ;;  %v101_v13 = vsel %vm61_vm1, %v98_v23, %v100_v50 }
  0x80   :  { %v594_v19 = vsel %vm593_vm6, %v569_v14, %v347_v9  ;;  %v595_v34 = vsel %vm593_vm6, %v570_v29, %v349_v8  ;;  %v336_v14 = vrot.slane %v8149_v10, 3 }
  0x81   :  { %140 = vrot.lane.b32.xlu1 %v95_v63, %s7804_s16  ;;  %499 = vrot.lane.b32.xlu0 %v452_v3, %s7806_s22 }
  0x83   :  { %v113_v43 = vpop.permute.xlu1 %112  ;;  %v472_v21 = vpop.permute.xlu0 %471 }
  0x84   :  { %v619_v24 = vsel %vm618_vm7, %v594_v19, %v472_v21 }
  0x85   :  { %v667_v25 = vcombine.high %v619_v24, %v619_v24  ;;  %v674_v27 = vrot.slane %v619_v24, %v8154_v11  ;;  %142 = vrot.lane.b32.xlu1 %v97_v15, %s7804_s16  ;;  %501 = vrot.lane.b32.xlu0 %v454_v17, %s7806_s22  ;;  %v546_v15 = vsel %vm543_vm4, %v7843_v2, %v113_v43 }
  0x87   :  { %v681_v36 = vrot.slane %v667_v25, %v8154_v11  ;;  %v682_v39 = vcombine.high %v674_v27, %v674_v27  ;;  %v8187_v44 = vpop.permute.xlu1 %114  ;;  %v474_v49 = vpop.permute.xlu0 %473  ;;  %v690_v45 = vrot.slane %v674_v27, %v8154_v11 }
  0x88   :  { %v620_v47 = vsel %vm618_vm7, %v595_v34, %v474_v49 }
  0x89   :  { %v683_v53 = vcombine.high %v681_v36, %v681_v36  ;;  %v704_v54 = vrot.slane %v682_v39, %v8154_v11  ;;  %v716_v55 = vcombine.high %v620_v47, %v620_v47  ;;  %261 = vrot.lane.b32.xlu1 %v216_v28, %s7803_s15  ;;  %v697_v56 = vrot.slane %v681_v36, %v8154_v11 }
  0x8a   :  { %v723_v57 = vrot.slane %v620_v47, %v8154_v11  ;;  %259 = vrot.lane.b32.xlu0 %v214_v30, %s7803_s15 }
  0x8b   :  { %v711_v61 = vrot.slane %v683_v53, %v8154_v11  ;;  %v1831_v63 = vcombine.low %v690_v45, %v704_v54  ;;  %v7576_v3 = vcombine.high %v690_v45, %v704_v54  ;;  %v730_v4 = vrot.slane %v716_v55, %v8154_v11  ;;  %v234_v7 = vpop.permute.xlu1 %233  ;;  %v232_v8 = vpop.permute.xlu0 %231 }
  0x8c   :  { %v731_v9 = vcombine.high %v723_v57, %v723_v57  ;;  %v739_v21 = vrot.slane %v723_v57, %v8154_v11  ;;  %v571_v34 = vsel %vm568_vm5, %v546_v15, %v232_v8  ;;  %v338_v55 = vrot.slane %v8177_v1, 3 }
  0x8d   :  { %v1833_v17 = vcombine.low %v697_v56, %v711_v61  ;;  %v7577_v42 = vcombine.high %v697_v56, %v711_v61  ;;  %v732_v19 = vcombine.high %v730_v4, %v730_v4  ;;  %380 = vrot.lane.b32.xlu1 %v335_v31, %s7805_s21  ;;  %v1841_v5 = vrot.slane %v1831_v63, %v8154_v11 }
  0x8e   :  { %v753_v24 = vrot.slane %v731_v9, %v8154_v11  ;;  %378 = vrot.lane.b32.xlu0 %v333_v32, %s7805_s21  ;;  %v1848_v23 = vrot.slane %v7576_v3, %v8154_v11  ;;  %v746_v25 = vrot.slane %v730_v4, %v8154_v11  ;;  %v458_v32 = vsel %vm420_vm3, %v455_v37, %v457_v51  ;;  %v8240_v3 = vld [vmem:[%s9851_s0 + $0xb0] sm:$0xff] }
  0x8f   :  { %v760_v27 = vrot.slane %v732_v19, %v8154_v11  ;;  %v353_v2 = vpop.permute.xlu1 %352  ;;  %v351_v43 = vpop.permute.xlu0 %350  ;;  %v1855_v28 = vrot.slane %v1833_v17, %v8154_v11  ;;  %v1862_v29 = vrot.slane %v7577_v42, %v8154_v11  ;;  %v547_v4 = vsel %vm543_vm4, %v7863_v16, %v8187_v44 }
  0x90   :  { %v1880_v30 = vcombine.low %v739_v21, %v753_v24  ;;  %v7578_v31 = vcombine.high %v739_v21, %v753_v24  ;;  %v1863_v49 = vcombine.low %v1841_v5, %v1848_v23  ;;  %v596_v54 = vsel %vm593_vm6, %v571_v34, %v351_v43 }
  0x91   :  { %v1882_v36 = vcombine.low %v746_v25, %v760_v27  ;;  %v7579_v39 = vcombine.high %v746_v25, %v760_v27  ;;  %144 = vrot.lane.b32.xlu1 %v99_v46, %s7804_s16  ;;  %v1864_v47 = vcombine.low %v1855_v28, %v1862_v29  ;;  %v572_v21 = vsel %vm568_vm5, %v547_v4, %v234_v7 }
  0x92   :  { %v1890_v53 = vrot.slane %v1880_v30, %v8154_v11  ;;  %v1897_v45 = vrot.slane %v7578_v31, %v8154_v11  ;;  %503 = vrot.lane.b32.xlu0 %v456_v12, %s7806_s22  ;;  %v1871_v46 = vrot.slane %v1863_v49, %v8154_v11  ;;  %v220_v12 = vsel %vm180_vm0, %v217_v48, %v219_v58 }
  0x93   :  { %v1904_v56 = vrot.slane %v1882_v36, %v8154_v11  ;;  %v1911_v37 = vrot.slane %v7579_v39, %v8154_v11  ;;  %v8233_v57 = vpop.permute.xlu1 %116  ;;  %v476_v61 = vpop.permute.xlu0 %475  ;;  %v1878_v63 = vrot.slane %v1864_v47, %v8154_v11  ;;  %v218_v16 = vsel %vm180_vm0, %v215_v0, %v217_v48  ;;  %v8271_v48 = vld [vmem:[%s9851_s0 + $0xb8] sm:$0xff] }
  0x94   :  { %v1912_v8 = vcombine.low %v1890_v53, %v1897_v45  ;;  %v621_v9 = vsel %vm618_vm7, %v596_v54, %v476_v61  ;;  %v337_v44 = vsel %vm299_vm2, %v334_v18, %v336_v14  ;;  %v102_v24 = vrot.slane %v8240_v3, 1 }
  0x95   :  { %v765_v15 = vcombine.high %v621_v9, %v621_v9  ;;  %v772_v17 = vrot.slane %v621_v9, %v8154_v11  ;;  %146 = vrot.lane.b32.xlu1 %v101_v13, %s7804_s16  ;;  %v1879_v42 = vcombine.low %v1871_v46, %v1878_v63  ;;  %v1913_v19 = vcombine.low %v1904_v56, %v1911_v37 }
  0x96   :  { %505 = vrot.lane.b32.xlu0 %v458_v32, %s7806_s22  ;;  %v597_v13 = vsel %vm593_vm6, %v572_v21, %v353_v2  ;;  %v1920_v27 = vrot.slane %v1912_v8, %v8154_v11  ;;  %v339_v2 = vsel %vm299_vm2, %v336_v14, %v338_v55  ;;  %v459_v43 = vrot.slane %v8149_v10, 4 }
  0x97   :  { %v779_v5 = vrot.slane %v765_v15, %v8154_v11  ;;  %v780_v23 = vcombine.high %v772_v17, %v772_v17  ;;  %v8264_v7 = vpop.permute.xlu1 %118  ;;  %7688 = vmatprep.mubr.msk.f32.mxu0 %vm2973_vm8, %v1879_v42  ;;  %v478_v25 = vpop.permute.xlu0 %477  ;;  %v1927_v0 = vrot.slane %v1913_v19, %v8154_v11  ;;  %v788_v29 = vrot.slane %v772_v17, %v8154_v11 }
  0x98   :  { %v622_v18 = vsel %vm618_vm7, %v597_v13, %v478_v25  ;;  %v104_v39 = vrot.slane %v8271_v48, 1  ;;  %v103_v56 = vsel %vm61_vm1, %v100_v50, %v102_v24  ;;  %v461_v37 = vrot.slane %v8177_v1, 4 }
  0x99   :  { %v781_v28 = vcombine.high %v779_v5, %v779_v5  ;;  %v802_v30 = vrot.slane %v780_v23, %v8154_v11  ;;  %v814_v31 = vcombine.high %v622_v18, %v622_v18  ;;  %265 = vrot.lane.b32.xlu1 %v220_v12, %s7803_s15  ;;  %v795_v34 = vrot.slane %v779_v5, %v8154_v11 }
  0x9a   :  { %v821_v32 = vrot.slane %v622_v18, %v8154_v11  ;;  %263 = vrot.lane.b32.xlu0 %v218_v16, %s7803_s15  ;;  %v1928_v36 = vcombine.low %v1920_v27, %v1927_v0  ;;  %v221_v61 = vrot.slane %v8240_v3, 2  ;;  %v223_v50 = vrot.slane %v8271_v48, 2 }
  0x9b   :  { %v809_v14 = vrot.slane %v781_v28, %v8154_v11  ;;  %v1929_v10 = vcombine.low %v788_v29, %v802_v30  ;;  %v7580_v49 = vcombine.high %v788_v29, %v802_v30  ;;  %v828_v47 = vrot.slane %v814_v31, %v8154_v11  ;;  %v238_v53 = vpop.permute.xlu1 %237  ;;  %v236_v45 = vpop.permute.xlu0 %235 }
  0x9c   :  { %v829_v54 = vcombine.high %v821_v32, %v821_v32  ;;  %7689 = vmatmul.mubr.msk.f32.vlgmr.msra.gmra.mrb[0].mxu0 %vm2973_vm8, %v1928_v36  ;;  %v837_v12 = vrot.slane %v821_v32, %v8154_v11  ;;  %v460_v13 = vsel %vm420_vm3, %v457_v51, %v459_v43  ;;  %v105_v18 = vsel %vm61_vm1, %v102_v24, %v104_v39 }
  0x9d   :  { %v1931_v46 = vcombine.low %v795_v34, %v809_v14  ;;  %v7581_v63 = vcombine.high %v795_v34, %v809_v14  ;;  %v1939_v4 = vrot.slane %v1929_v10, %v8154_v11  ;;  %v1946_v8 = vrot.slane %v7580_v49, %v8154_v11  ;;  %384 = vrot.lane.b32.xlu1 %v339_v2, %s7805_s21 }
  0x9e   :  { %v830_v9 = vcombine.high %v828_v47, %v828_v47  ;;  %v851_v15 = vrot.slane %v829_v54, %v8154_v11  ;;  %382 = vrot.lane.b32.xlu0 %v337_v44, %s7805_s21  ;;  %v844_v5 = vrot.slane %v828_v47, %v8154_v11  ;;  %v548_v44 = vsel %vm543_vm4, %v7875_v22, %v8233_v57 }
  0x9f   :  { %v1953_v17 = vrot.slane %v1931_v46, %v8154_v11  ;;  %v1960_v42 = vrot.slane %v7581_v63, %v8154_v11  ;;  %v1961_v19 = vcombine.low %v1939_v4, %v1946_v8  ;;  %v357_v21 = vpop.permute.xlu1 %356  ;;  %v355_v16 = vpop.permute.xlu0 %354  ;;  %v340_v59 = vrot.slane %v8240_v3, 3 }
  0xa0   :  { %v858_v23 = vrot.slane %v830_v9, %v8154_v11  ;;  %v1978_v25 = vcombine.low %v837_v12, %v851_v15  ;;  %v7582_v0 = vcombine.high %v837_v12, %v851_v15  ;;  %v573_v30 = vsel %vm568_vm5, %v548_v44, %v236_v45 }
  0xa1   :  { %148 = vrot.lane.b32.xlu1 %v103_v56, %s7804_s16  ;;  %v1962_v27 = vcombine.low %v1953_v17, %v1960_v42  ;;  %v462_v31 = vsel %vm420_vm3, %v459_v43, %v461_v37  ;;  %v1969_v24 = vrot.slane %v1961_v19, %v8154_v11  ;;  %v598_v14 = vsel %vm593_vm6, %v573_v30, %v355_v16 }
  0xa2   :  { %v1980_v51 = vcombine.low %v844_v5, %v858_v23  ;;  %v7583_v2 = vcombine.high %v844_v5, %v858_v23  ;;  %v1988_v28 = vrot.slane %v1978_v25, %v8154_v11  ;;  %v1995_v29 = vrot.slane %v7582_v0, %v8154_v11  ;;  %507 = vrot.lane.b32.xlu0 %v460_v13, %s7806_s22 }
  0xa3   :  { %v121_v22 = vpop.permute.xlu1 %120  ;;  %v480_v57 = vpop.permute.xlu0 %479  ;;  %v1976_v34 = vrot.slane %v1962_v27, %v8154_v11  ;;  %v342_v10 = vrot.slane %v8271_v48, 3  ;;  %v224_v43 = vsel %vm180_vm0, %v221_v61, %v223_v50  ;;  %v549_v54 = vsel %vm543_vm4, %v7898_v35, %v8264_v7 }
  0xa4   :  { %v2002_v32 = vrot.slane %v1980_v51, %v8154_v11  ;;  %v2009_v36 = vrot.slane %v7583_v2, %v8154_v11  ;;  %v2010_v49 = vcombine.low %v1988_v28, %v1995_v29  ;;  %v623_v47 = vsel %vm618_vm7, %v598_v14, %v480_v57 }
  0xa5   :  { %150 = vrot.lane.b32.xlu1 %v105_v18, %s7804_s16  ;;  %v1977_v45 = vcombine.low %v1969_v24, %v1976_v34  ;;  %v863_v56 = vcombine.high %v623_v47, %v623_v47  ;;  %v870_v46 = vrot.slane %v623_v47, %v8154_v11  ;;  %v574_v4 = vsel %vm568_vm5, %v549_v54, %v238_v53 }
  0xa6   :  { %509 = vrot.lane.b32.xlu0 %v462_v31, %s7806_s22  ;;  %v2011_v63 = vcombine.low %v2002_v32, %v2009_v36  ;;  %v222_v12 = vsel %vm180_vm0, %v219_v58, %v221_v61  ;;  %v463_v15 = vrot.slane %v8240_v3, 4  ;;  %v465_v35 = vrot.slane %v8271_v48, 4 }
  0xa7   :  { %v8342_v8 = vpop.permute.xlu1 %122  ;;  %7691 = vmatprep.mubr.msk.f32.mxu0 %vm2973_vm8, %v1977_v45  ;;  %v482_v9 = vpop.permute.xlu0 %481  ;;  %v599_v7 = vsel %vm593_vm6, %v574_v4, %v357_v21  ;;  %v877_v17 = vrot.slane %v863_v56, %v8154_v11  ;;  %v878_v42 = vcombine.high %v870_v46, %v870_v46  ;;  %v341_v53 = vsel %vm299_vm2, %v338_v55, %v340_v59 }
  0xa8   :  { %v624_v19 = vsel %vm618_vm7, %v599_v7, %v482_v9  ;;  %v2018_v16 = vrot.slane %v2010_v49, %v8154_v11  ;;  %v2025_v58 = vrot.slane %v2011_v63, %v8154_v11  ;;  %v343_v3 = vsel %vm299_vm2, %v340_v59, %v342_v10 }
  0xa9   :  { %269 = vrot.lane.b32.xlu1 %v224_v43, %s7803_s15  ;;  %v879_v61 = vcombine.high %v877_v17, %v877_v17  ;;  %v886_v21 = vrot.slane %v870_v46, %v8154_v11  ;;  %v900_v13 = vrot.slane %v878_v42, %v8154_v11  ;;  %v912_v5 = vcombine.high %v624_v19, %v624_v19 }
  0xaa   :  { %267 = vrot.lane.b32.xlu0 %v222_v12, %s7803_s15  ;;  %v893_v55 = vrot.slane %v877_v17, %v8154_v11  ;;  %v919_v23 = vrot.slane %v624_v19, %v8154_v11  ;;  %v2026_v0 = vcombine.low %v2018_v16, %v2025_v58  ;;  %v466_v18 = vsel %vm420_vm3, %v463_v15, %v465_v35 }
  0xab   :  { %v242_v25 = vpop.permute.xlu1 %241  ;;  %v240_v44 = vpop.permute.xlu0 %239  ;;  %v907_v27 = vrot.slane %v879_v61, %v8154_v11  ;;  %v2027_v59 = vcombine.low %v886_v21, %v900_v13  ;;  %v7584_v51 = vcombine.high %v886_v21, %v900_v13  ;;  %v926_v2 = vrot.slane %v912_v5, %v8154_v11 }
  0xac   :  { %v927_v28 = vcombine.high %v919_v23, %v919_v23  ;;  %7692 = vmatmul.mubr.msk.f32.gmra.mrb[2].mxu0 %vm2973_vm8, %v2026_v0  ;;  %v464_v29 = vsel %vm420_vm3, %v461_v37, %v463_v15  ;;  %v106_v30 = vrot.slane %v8017_v33, 1  ;;  %v225_v57 = vrot.slane %v8017_v33, 2 }
  0xad   :  { %v2029_v31 = vcombine.low %v893_v55, %v907_v27  ;;  %v7585_v24 = vcombine.high %v893_v55, %v907_v27  ;;  %v2037_v34 = vrot.slane %v2027_v59, %v8154_v11  ;;  %v2044_v32 = vrot.slane %v7584_v51, %v8154_v11  ;;  %388 = vrot.lane.b32.xlu1 %v343_v3, %s7805_s21 }
  0xae   :  { %v550_v36 = vsel %vm543_vm4, %v7912_v41, %v121_v22  ;;  %v928_v14 = vcombine.high %v926_v2, %v926_v2  ;;  %v935_v1 = vrot.slane %v919_v23, %v8154_v11  ;;  %v949_v37 = vrot.slane %v927_v28, %v8154_v11  ;;  %386 = vrot.lane.b32.xlu0 %v341_v53, %s7805_s21 }
  0xaf   :  { %v361_v49 = vpop.permute.xlu1 %360  ;;  %v359_v47 = vpop.permute.xlu0 %358  ;;  %v2051_v45 = vrot.slane %v2029_v31, %v8154_v11  ;;  %v2058_v43 = vrot.slane %v7585_v24, %v8154_v11  ;;  %v2059_v54 = vcombine.low %v2037_v34, %v2044_v32  ;;  %v575_v56 = vsel %vm568_vm5, %v550_v36, %v240_v44 }
  0xb0   :  { %v942_v46 = vrot.slane %v926_v2, %v8154_v11  ;;  %v956_v41 = vrot.slane %v928_v14, %v8154_v11  ;;  %v2076_v22 = vcombine.low %v935_v1, %v949_v37  ;;  %v7586_v63 = vcombine.high %v935_v1, %v949_v37 }
  0xb1   :  { %v600_v4 = vsel %vm593_vm6, %v575_v56, %v359_v47  ;;  %513 = vrot.lane.b32.xlu1 %v466_v18, %s7806_s22  ;;  %v107_v9 = vsel %vm61_vm1, %v104_v39, %v106_v30  ;;  %v226_v12 = vsel %vm180_vm0, %v223_v50, %v225_v57  ;;  %v2060_v15 = vcombine.low %v2051_v45, %v2058_v43 }
  0xb2   :  { %v2078_v7 = vcombine.low %v942_v46, %v956_v41  ;;  %v7587_v17 = vcombine.high %v942_v46, %v956_v41  ;;  %v2086_v42 = vrot.slane %v2076_v22, %v8154_v11  ;;  %v2093_v53 = vrot.slane %v7586_v63, %v8154_v11  ;;  %511 = vrot.lane.b32.xlu0 %v464_v29, %s7806_s22 }
  0xb3   :  { %v125_v19 = vpop.permute.xlu1 %124  ;;  %v484_v16 = vpop.permute.xlu0 %483  ;;  %v2067_v39 = vrot.slane %v2059_v54, %v8154_v11  ;;  %v2074_v3 = vrot.slane %v2060_v15, %v8154_v11  ;;  %v344_v61 = vrot.slane %v8017_v33, 3  ;;  %v551_v50 = vsel %vm543_vm4, %v7952_v60, %v8342_v8 }
  0xb4   :  { %v625_v58 = vsel %vm618_vm7, %v600_v4, %v484_v16  ;;  %v2100_v21 = vrot.slane %v2078_v7, %v8154_v11  ;;  %v2107_v13 = vrot.slane %v7587_v17, %v8154_v11  ;;  %v2108_v55 = vcombine.low %v2086_v42, %v2093_v53 }
  0xb5   :  { %v961_v5 = vcombine.high %v625_v58, %v625_v58  ;;  %v576_v23 = vsel %vm568_vm5, %v551_v50, %v242_v25  ;;  %v968_v0 = vrot.slane %v625_v58, %v8154_v11  ;;  %271 = vrot.lane.b32.xlu1 %v226_v12, %s7803_s15  ;;  %v2075_v44 = vcombine.low %v2067_v39, %v2074_v3 }
  0xb6   :  { %v601_v18 = vsel %vm593_vm6, %v576_v23, %v361_v49  ;;  %152 = vrot.lane.b32.xlu0 %v107_v9, %s7804_s16  ;;  %v468_v59 = vsel %vm420_vm3, %v465_v35, %v467_v38  ;;  %v2109_v25 = vcombine.low %v2100_v21, %v2107_v13  ;;  %v345_v28 = vsel %vm299_vm2, %v342_v10, %v344_v61 }
  0xb7   :  { %v975_v27 = vrot.slane %v961_v5, %v8154_v11  ;;  %v127_v60 = vpop.permute.xlu1 %126  ;;  %v486_v8 = vpop.permute.xlu0 %485  ;;  %v976_v51 = vcombine.high %v968_v0, %v968_v0  ;;  %7694 = vmatprep.mubr.msk.f32.mxu0 %vm2973_vm8, %v2075_v44  ;;  %v984_v34 = vrot.slane %v968_v0, %v8154_v11  ;;  %v2116_v35 = vrot.slane %v2108_v55, %v8154_v11 }
  0xb8   :  { %v626_v2 = vsel %vm618_vm7, %v601_v18, %v486_v8  ;;  %v2123_v32 = vrot.slane %v2109_v25, %v8154_v11  ;;  %v552_v42 = vsel %vm543_vm4, %v7966_v6, %v125_v19  ;;  %v553_v44 = vsel %vm543_vm4, %v7991_v20, %v127_v60 }
  0xb9   :  { %v977_v29 = vcombine.high %v975_v27, %v975_v27  ;;  %v1010_v31 = vcombine.high %v626_v2, %v626_v2  ;;  %v1017_v24 = vrot.slane %v626_v2, %v8154_v11  ;;  %v998_v38 = vrot.slane %v976_v51, %v8154_v11  ;;  %515 = vrot.lane.b32.xlu1 %v468_v59, %s7806_s22 }
  0xba   :  { %v991_v36 = vrot.slane %v975_v27, %v8154_v11  ;;  %390 = vrot.lane.b32.xlu0 %v345_v28, %s7805_s21  ;;  %v2124_v45 = vcombine.low %v2116_v35, %v2123_v32  ;;  %vm7540_vm0 = vcmask 130112   ;;  %vm7551_vm1 = vcmask 1041409  }
  0xbb   :  { %v1005_v48 = vrot.slane %v977_v29, %v8154_v11  ;;  %v1024_v10 = vrot.slane %v1010_v31, %v8154_v11  ;;  %v1025_v14 = vcombine.high %v1017_v24, %v1017_v24  ;;  %v246_v1 = vpop.permute.xlu1 %245  ;;  %v244_v37 = vpop.permute.xlu0 %243  ;;  %v2125_v49 = vcombine.low %v984_v34, %v998_v38 }
  0xbc   :  { %v7588_v47 = vcombine.high %v984_v34, %v998_v38  ;;  %v1033_v46 = vrot.slane %v1017_v24, %v8154_v11  ;;  %7695 = vmatmul.mubr.msk.f32.gmra.mrb[4].mxu0 %vm2973_vm8, %v2124_v45  ;;  %v577_v50 = vsel %vm568_vm5, %v552_v42, %v244_v37  ;;  %v578_v33 = vsel %vm568_vm5, %v553_v44, %v246_v1 }
  0xbd   :  { %v2127_v43 = vcombine.low %v991_v36, %v1005_v48  ;;  %v7589_v54 = vcombine.high %v991_v36, %v1005_v48  ;;  %v1026_v56 = vcombine.high %v1024_v10, %v1024_v10  ;;  %v2135_v41 = vrot.slane %v2125_v49, %v8154_v11  ;;  %273 = vrot.lane.b32.xlu1 %v225_v57, %s7803_s15  ;;  %s7809_s15 = smov 20  }
  0xbe   :  { %v2142_v22 = vrot.slane %v7588_v47, %v8154_v11  ;;  %v1040_v63 = vrot.slane %v1024_v10, %v8154_v11  ;;  %v1047_v4 = vrot.slane %v1025_v14, %v8154_v11  ;;  %154 = vrot.lane.b32.xlu0 %v106_v30, %s7804_s16  ;;  %s7810_s16 = smov 30   ;;  %vm7554_vm2 = vcmask 66560  }
  0xbf   :  { %v2149_v9 = vrot.slane %v2127_v43, %v8154_v11  ;;  %v2156_v12 = vrot.slane %v7589_v54, %v8154_v11  ;;  %v1054_v15 = vrot.slane %v1026_v56, %v8154_v11  ;;  %v365_v7 = vpop.permute.xlu1 %364  ;;  %v363_v17 = vpop.permute.xlu0 %362  ;;  %vm7569_vm3 = vcmask 1024  }
  0xc0   :  { %v2157_v53 = vcombine.low %v2135_v41, %v2142_v22  ;;  %v2174_v16 = vcombine.low %v1033_v46, %v1047_v4  ;;  %v7590_v58 = vcombine.high %v1033_v46, %v1047_v4  ;;  %v602_v5 = vsel %vm593_vm6, %v577_v50, %v363_v17 }
  0xc1   :  { %v2176_v39 = vcombine.low %v1040_v63, %v1054_v15  ;;  %v7591_v3 = vcombine.high %v1040_v63, %v1054_v15  ;;  %v2158_v21 = vcombine.low %v2149_v9, %v2156_v12  ;;  %517 = vrot.lane.b32.xlu1 %v8028_v40, %s7806_s22 }
  0xc2   :  { %v2184_v13 = vrot.slane %v2174_v16, %v8154_v11  ;;  %v2191_v30 = vrot.slane %v7590_v58, %v8154_v11  ;;  %v2165_v57 = vrot.slane %v2157_v53, %v8154_v11  ;;  %392 = vrot.lane.b32.xlu0 %v344_v61, %s7805_s21  ;;  %v603_v61 = vsel %vm593_vm6, %v578_v33, %v365_v7  ;;  %s7811_s21 = smov 40  }
  0xc3   :  { %v2198_v55 = vrot.slane %v2176_v39, %v8154_v11  ;;  %v2205_v6 = vrot.slane %v7591_v3, %v8154_v11  ;;  %v129_v19 = vpop.permute.xlu1 %128  ;;  %v488_v23 = vpop.permute.xlu0 %487  ;;  %v2172_v0 = vrot.slane %v2158_v21, %v8154_v11 }
  0xc4   :  { %v2206_v18 = vcombine.low %v2184_v13, %v2191_v30  ;;  %v627_v27 = vsel %vm618_vm7, %v602_v5, %v488_v23  ;;  %v554_v4 = vsel %vm543_vm4, %v8002_v26, %v129_v19 }
  0xc5   :  { %v1059_v8 = vcombine.high %v627_v27, %v627_v27  ;;  %v1066_v59 = vrot.slane %v627_v27, %v8154_v11  ;;  %v2173_v25 = vcombine.low %v2165_v57, %v2172_v0  ;;  %v2207_v51 = vcombine.low %v2198_v55, %v2205_v6 }
  0xc6   :  { %v2214_v31 = vrot.slane %v2206_v18, %v8154_v11 }
  0xc7   :  { %v1073_v40 = vrot.slane %v1059_v8, %v8154_v11  ;;  %v1074_v2 = vcombine.high %v1066_v59, %v1066_v59  ;;  %v248_v28 = vpop.permute.xlu1 %247  ;;  %7697 = vmatprep.mubr.msk.f32.mxu0 %vm2973_vm8, %v2173_v25  ;;  %v490_v29 = vpop.permute.xlu0 %489  ;;  %v2221_v20 = vrot.slane %v2207_v51, %v8154_v11  ;;  %v1082_v34 = vrot.slane %v1066_v59, %v8154_v11 }
  0xc8   :  { %v628_v60 = vsel %vm618_vm7, %v603_v61, %v490_v29  ;;  %v579_v39 = vsel %vm568_vm5, %v554_v4, %v248_v28 }
  0xc9   :  { %v1075_v24 = vcombine.high %v1073_v40, %v1073_v40  ;;  %v1096_v38 = vrot.slane %v1074_v2, %v8154_v11  ;;  %v1108_v35 = vcombine.high %v628_v60, %v628_v60  ;;  %v1089_v32 = vrot.slane %v1073_v40, %v8154_v11 }
  0xca   :  { %v1115_v36 = vrot.slane %v628_v60, %v8154_v11  ;;  %v2222_v48 = vcombine.low %v2214_v31, %v2221_v20 }
  0xcb   :  { %v1103_v10 = vrot.slane %v1075_v24, %v8154_v11  ;;  %v2223_v14 = vcombine.low %v1082_v34, %v1096_v38  ;;  %v7592_v1 = vcombine.high %v1082_v34, %v1096_v38  ;;  %v1122_v37 = vrot.slane %v1108_v35, %v8154_v11  ;;  %v367_v49 = vpop.permute.xlu1 %366  ;;  %v133_v47 = vpop.permute.xlu0 %132 }
  0xcc   :  { %v1123_v45 = vcombine.high %v1115_v36, %v1115_v36  ;;  %7698 = vmatmul.mubr.msk.f32.gmra.mrb[6].mxu0 %vm2973_vm8, %v2222_v48  ;;  %v1131_v22 = vrot.slane %v1115_v36, %v8154_v11  ;;  %v604_v30 = vsel %vm593_vm6, %v579_v39, %v367_v49  ;;  %v7789_v36 = vld [vmem:[%s9851_s0 + $0x68] sm:$0xff] }
  0xcd   :  { %v2225_v43 = vcombine.low %v1089_v32, %v1103_v10  ;;  %v7593_v54 = vcombine.high %v1089_v32, %v1103_v10  ;;  %v2233_v56 = vrot.slane %v2223_v14, %v8154_v11  ;;  %v2240_v46 = vrot.slane %v7592_v1, %v8154_v11 }
  0xce   :  { %v1124_v41 = vcombine.high %v1122_v37, %v1122_v37  ;;  %v1145_v63 = vrot.slane %v1123_v45, %v8154_v11  ;;  %v1138_v42 = vrot.slane %v1122_v37, %v8154_v11  ;;  %v556_v48 = vsel %vm543_vm4, %v7789_v36, %v133_v47  ;;  %v7790_v47 = vld [vmem:[%s9851_s0 + $0x58] sm:$0xff] }
  0xcf   :  { %v2247_v9 = vrot.slane %v2225_v43, %v8154_v11  ;;  %v2254_v12 = vrot.slane %v7593_v54, %v8154_v11  ;;  %v2255_v15 = vcombine.low %v2233_v56, %v2240_v46  ;;  %v8499_v7 = vpop.permute.xlu1 %134  ;;  %v131_v17 = vpop.permute.xlu0 %130 }
  0xd0   :  { %v1152_v53 = vrot.slane %v1124_v41, %v8154_v11  ;;  %v2272_v16 = vcombine.low %v1131_v22, %v1145_v63  ;;  %v7594_v58 = vcombine.high %v1131_v22, %v1145_v63  ;;  %v555_v41 = vsel %vm543_vm4, %v7790_v47, %v131_v17 }
  0xd1   :  { %v2256_v3 = vcombine.low %v2247_v9, %v2254_v12  ;;  %v2263_v55 = vrot.slane %v2255_v15, %v8154_v11 }
  0xd2   :  { %v2274_v50 = vcombine.low %v1138_v42, %v1152_v53  ;;  %v7595_v21 = vcombine.high %v1138_v42, %v1152_v53  ;;  %v2282_v26 = vrot.slane %v2272_v16, %v8154_v11  ;;  %v2289_v13 = vrot.slane %v7594_v58, %v8154_v11 }
  0xd3   :  { %v492_v5 = vpop.permute.xlu1 %491  ;;  %v252_v57 = vpop.permute.xlu0 %251  ;;  %v2270_v6 = vrot.slane %v2256_v3, %v8154_v11 }
  0xd4   :  { %v2296_v19 = vrot.slane %v2274_v50, %v8154_v11  ;;  %v2303_v23 = vrot.slane %v7595_v21, %v8154_v11  ;;  %v2304_v0 = vcombine.low %v2282_v26, %v2289_v13  ;;  %v629_v44 = vsel %vm618_vm7, %v604_v30, %v492_v5  ;;  %v7791_v5 = vld [vmem:[%s9851_s0 + $0x70] sm:$0xff] }
  0xd5   :  { %v1157_v18 = vcombine.high %v629_v44, %v629_v44  ;;  %v1164_v27 = vrot.slane %v629_v44, %v8154_v11  ;;  %v2271_v8 = vcombine.low %v2263_v55, %v2270_v6  ;;  %v581_v49 = vsel %vm568_vm5, %v556_v48, %v252_v57 }
  0xd6   :  { %v2305_v59 = vcombine.low %v2296_v19, %v2303_v23  ;;  %v2312_v40 = vrot.slane %v2304_v0, %v8154_v11  ;;  %v557_v57 = vsel %vm543_vm4, %v7791_v5, %v8499_v7 }
  0xd7   :  { %v1171_v25 = vrot.slane %v1157_v18, %v8154_v11  ;;  %v1172_v51 = vcombine.high %v1164_v27, %v1164_v27  ;;  %v254_v33 = vpop.permute.xlu1 %253  ;;  %7700 = vmatprep.mubr.msk.f32.mxu0 %vm2973_vm8, %v2271_v8  ;;  %v250_v61 = vpop.permute.xlu0 %249  ;;  %v1180_v29 = vrot.slane %v1164_v27, %v8154_v11 }
  0xd8   :  { %v2319_v2 = vrot.slane %v2305_v59, %v8154_v11  ;;  %v580_v4 = vsel %vm568_vm5, %v555_v41, %v250_v61  ;;  %v582_v59 = vsel %vm568_vm5, %v557_v57, %v254_v33 }
  0xd9   :  { %v1173_v28 = vcombine.high %v1171_v25, %v1171_v25  ;;  %v1194_v20 = vrot.slane %v1172_v51, %v8154_v11  ;;  %v1187_v31 = vrot.slane %v1171_v25, %v8154_v11 }
  0xda   :  { %v2320_v60 = vcombine.low %v2312_v40, %v2319_v2  ;;  %v7792_v2 = vld [vmem:[%s9851_s0 + $0x78] sm:$0xff] }
  0xdb   :  { %v1201_v24 = vrot.slane %v1173_v28, %v8154_v11  ;;  %v2321_v34 = vcombine.low %v1180_v29, %v1194_v20  ;;  %v7596_v38 = vcombine.high %v1180_v29, %v1194_v20  ;;  %v369_v35 = vpop.permute.xlu1 %368  ;;  %v371_v32 = vpop.permute.xlu0 %370 }
  0xdc   :  { %7701 = vmatmul.mubr.msk.f32.gmra.mrb[8].mxu0 %vm2973_vm8, %v2320_v60  ;;  %v606_v54 = vsel %vm593_vm6, %v581_v49, %v371_v32  ;;  %v605_v42 = vsel %vm593_vm6, %v580_v4, %v369_v35 }
  0xdd   :  { %v2323_v10 = vcombine.low %v1187_v31, %v1201_v24  ;;  %v7597_v14 = vcombine.high %v1187_v31, %v1201_v24  ;;  %v2331_v1 = vrot.slane %v2321_v34, %v8154_v11  ;;  %v2338_v37 = vrot.slane %v7596_v38, %v8154_v11  ;;  %v7793_v24 = vld [vmem:[%s9851_s0 + $0x80] sm:$0xff] }
  0xdf   :  { %v2345_v45 = vrot.slane %v2323_v10, %v8154_v11  ;;  %v2352_v43 = vrot.slane %v7597_v14, %v8154_v11  ;;  %v496_v56 = vpop.permute.xlu1 %495  ;;  %v373_v46 = vpop.permute.xlu0 %372  ;;  %v2353_v22 = vcombine.low %v2331_v1, %v2338_v37 }
  0xe0   :  { %v631_v63 = vsel %vm618_vm7, %v606_v54, %v496_v56  ;;  %v607_v7 = vsel %vm593_vm6, %v582_v59, %v373_v46 }
  0xe1   :  { %v1245_v9 = vcombine.high %v631_v63, %v631_v63  ;;  %v1252_v12 = vrot.slane %v631_v63, %v8154_v11  ;;  %v2354_v15 = vcombine.low %v2345_v45, %v2352_v43  ;;  %v2361_v21 = vrot.slane %v2353_v22, %v8154_v11 }
  0xe3   :  { %v1259_v53 = vrot.slane %v1245_v9, %v8154_v11  ;;  %v1260_v16 = vcombine.high %v1252_v12, %v1252_v12  ;;  %v1268_v58 = vrot.slane %v1252_v12, %v8154_v11  ;;  %v494_v39 = vpop.permute.xlu1 %493  ;;  %v137_v3 = vpop.permute.xlu0 %136  ;;  %v2368_v17 = vrot.slane %v2354_v15, %v8154_v11 }
  0xe4   :  { %v630_v50 = vsel %vm618_vm7, %v605_v42, %v494_v39  ;;  %v558_v28 = vsel %vm543_vm4, %v7792_v2, %v137_v3 }
  0xe5   :  { %v1261_v26 = vcombine.high %v1259_v53, %v1259_v53  ;;  %v1275_v13 = vrot.slane %v1259_v53, %v8154_v11  ;;  %v1282_v30 = vrot.slane %v1260_v16, %v8154_v11  ;;  %v1206_v55 = vcombine.high %v630_v50, %v630_v50 }
  0xe6   :  { %v1213_v6 = vrot.slane %v630_v50, %v8154_v11  ;;  %v2369_v19 = vcombine.low %v2361_v21, %v2368_v17  ;;  %v1290_v0 = vcombine.high %v1268_v58, %v1268_v58 }
  0xe7   :  { %v1289_v23 = vrot.slane %v1261_v26, %v8154_v11  ;;  %v1291_v44 = vcombine.high %v1275_v13, %v1275_v13  ;;  %v1292_v18 = vcombine.high %v1282_v30, %v1282_v30  ;;  %v139_v27 = vpop.permute.xlu1 %138  ;;  %v498_v8 = vpop.permute.xlu0 %497  ;;  %v1220_v25 = vrot.slane %v1206_v55, %v8154_v11 }
  0xe8   :  { %v1221_v51 = vcombine.high %v1213_v6, %v1213_v6  ;;  %7703 = vmatprep.mubr.msk.f32.mxu0 %vm2973_vm8, %v2369_v19  ;;  %v1228_v40 = vrot.slane %v1213_v6, %v8154_v11  ;;  %v632_v60 = vsel %vm618_vm7, %v607_v7, %v498_v8  ;;  %v2373_v31 = vcombine.low %v1282_v30, %v1290_v0 }
  0xe9   :  { %v2419_v61 = vcombine.low %v1292_v18, %v1275_v13  ;;  %v2420_v29 = vcombine.low %v1289_v23, %v1291_v44  ;;  %v1235_v20 = vrot.slane %v1220_v25, %v8154_v11  ;;  %v559_v34 = vsel %vm543_vm4, %v7793_v24, %v139_v27 }
  0xea   :  { %v1242_v33 = vrot.slane %v1221_v51, %v8154_v11  ;;  %v1294_v38 = vcombine.high %v632_v60, %v632_v60  ;;  %v1301_v35 = vrot.slane %v632_v60, %v8154_v11  ;;  %v1293_v1 = vcombine.high %v1289_v23, %v1289_v23 }
  0xeb   :  { %v258_v32 = vpop.permute.xlu1 %257  ;;  %v256_v36 = vpop.permute.xlu0 %255  ;;  %v2372_v14 = vcombine.low %v1235_v20, %v1268_v58  ;;  %v2429_v37 = vrot.slane %v2419_v61, %v8154_v11  ;;  %v2436_v54 = vrot.slane %v2420_v29, %v8154_v11  ;;  %v2401_v15 = vrot.slane %v2373_v31, %v8154_v11 }
  0xec   :  { %v2370_v48 = vcombine.low %v1228_v40, %v1242_v33  ;;  %v7598_v10 = vcombine.high %v1228_v40, %v1242_v33  ;;  %v1308_v49 = vrot.slane %v1294_v38, %v8154_v11  ;;  %v1309_v45 = vcombine.high %v1301_v35, %v1301_v35 }
  0xed   :  { %v1317_v43 = vrot.slane %v1301_v35, %v8154_v11  ;;  %v2394_v47 = vrot.slane %v2372_v14, %v8154_v11  ;;  %v583_v16 = vsel %vm568_vm5, %v558_v28, %v256_v36  ;;  %v2451_v13 = vcombine.low %v2429_v37, %v2436_v54 }
  0xee   :  { %v2380_v56 = vrot.slane %v2370_v48, %v8154_v11  ;;  %v2387_v46 = vrot.slane %v7598_v10, %v8154_v11  ;;  %v1310_v41 = vcombine.high %v1308_v49, %v1308_v49  ;;  %v1324_v22 = vrot.slane %v1308_v49, %v8154_v11 }
  0xef   :  { %v1331_v63 = vrot.slane %v1309_v45, %v8154_v11  ;;  %v1339_v4 = vcombine.high %v1317_v43, %v1317_v43  ;;  %v377_v9 = vpop.permute.xlu1 %376  ;;  %v375_v12 = vpop.permute.xlu0 %374  ;;  %v2421_v53 = vcombine.low %v1293_v1, %v1317_v43  ;;  %v2403_v21 = vcombine.low %v2394_v47, %v2401_v15 }
  0xf0   :  { %v2402_v42 = vcombine.low %v2380_v56, %v2387_v46  ;;  %v1338_v58 = vrot.slane %v1310_v41, %v8154_v11  ;;  %v1340_v39 = vcombine.high %v1324_v22, %v1324_v22  ;;  %v608_v50 = vsel %vm593_vm6, %v583_v16, %v375_v12 }
  0xf1   :  { %v1341_v3 = vcombine.high %v1331_v63, %v1331_v63  ;;  %v2422_v17 = vcombine.low %v1331_v63, %v1339_v4  ;;  %v2443_v30 = vrot.slane %v2421_v53, %v8154_v11  ;;  %v584_v23 = vsel %vm568_vm5, %v559_v34, %v258_v32 }
  0xf2   :  { %v2410_v26 = vrot.slane %v2402_v42, %v8154_v11  ;;  %v2469_v55 = vcombine.low %v1338_v58, %v1340_v39  ;;  %v2417_v44 = vrot.slane %v2403_v21, %v8154_v11  ;;  %v609_v25 = vsel %vm593_vm6, %v584_v23, %v377_v9 }
  0xf3   :  { %v2450_v5 = vrot.slane %v2422_v17, %v8154_v11  ;;  %v2468_v57 = vcombine.low %v1341_v3, %v1324_v22  ;;  %v8587_v6 = vpop.permute.xlu1 %140  ;;  %v500_v19 = vpop.permute.xlu0 %499  ;;  %v1342_v7 = vcombine.high %v1338_v58, %v1338_v58  ;;  %v2459_v29 = vrot.slane %v2451_v13, %v8154_v11 }
  0xf4   :  { %v633_v0 = vsel %vm618_vm7, %v608_v50, %v500_v19  ;;  %v2485_v8 = vrot.slane %v2469_v55, %v8154_v11  ;;  %v2418_v61 = vcombine.low %v2410_v26, %v2417_v44 }
  0xf5   :  { %v2452_v18 = vcombine.low %v2443_v30, %v2450_v5  ;;  %v2478_v27 = vrot.slane %v2468_v57, %v8154_v11  ;;  %v1343_v59 = vcombine.high %v633_v0, %v633_v0  ;;  %v1350_v51 = vrot.slane %v633_v0, %v8154_v11  ;;  %v7794_v57 = vld [vmem:[%s9851_s0 + $0x88] sm:$0xff] }
  0xf6   :  { %7704 = vmatmul.mubr.msk.f32.gmra.mrb[10].mxu0 %vm2973_vm8, %v2418_v61  ;;  %v560_v55 = vsel %vm543_vm4, %v7794_v57, %v8587_v6  ;;  %v7795_v6 = vld [vmem:[%s9851_s0 + $0x90] sm:$0xff] }
  0xf7   :  { %v1357_v40 = vrot.slane %v1343_v59, %v8154_v11  ;;  %v8597_v2 = vpop.permute.xlu1 %142  ;;  %v502_v28 = vpop.permute.xlu0 %501  ;;  %v2466_v20 = vrot.slane %v2452_v18, %v8154_v11  ;;  %v1358_v33 = vcombine.high %v1350_v51, %v1350_v51  ;;  %v1366_v60 = vrot.slane %v1350_v51, %v8154_v11 }
  0xf8   :  { %v634_v31 = vsel %vm618_vm7, %v609_v25, %v502_v28  ;;  %v2500_v24 = vcombine.low %v2478_v27, %v2485_v8  ;;  %v561_v28 = vsel %vm543_vm4, %v7795_v6, %v8597_v2 }
  0xf9   :  { %v1359_v34 = vcombine.high %v1357_v40, %v1357_v40  ;;  %v1373_v38 = vrot.slane %v1357_v40, %v8154_v11  ;;  %v1392_v35 = vcombine.high %v634_v31, %v634_v31  ;;  %v1399_v32 = vrot.slane %v634_v31, %v8154_v11 }
  0xfa   :  { %v1380_v36 = vrot.slane %v1358_v33, %v8154_v11  ;;  %v1388_v48 = vcombine.high %v1366_v60, %v1366_v60  ;;  %v2470_v10 = vcombine.low %v1342_v7, %v1366_v60  ;;  %v2467_v14 = vcombine.low %v2459_v29, %v2466_v20 }
  0xfb   :  { %v1387_v1 = vrot.slane %v1359_v34, %v8154_v11  ;;  %v1389_v37 = vcombine.high %v1373_v38, %v1373_v38  ;;  %v1406_v49 = vrot.slane %v1392_v35, %v8154_v11  ;;  %v1407_v45 = vcombine.high %v1399_v32, %v1399_v32  ;;  %v262_v43 = vpop.permute.xlu1 %261 }
  0xfc   :  { %v1390_v54 = vcombine.high %v1380_v36, %v1380_v36  ;;  %v2471_v56 = vcombine.low %v1380_v36, %v1388_v48  ;;  %v2492_v46 = vrot.slane %v2470_v10, %v8154_v11  ;;  %v1415_v47 = vrot.slane %v1399_v32, %v8154_v11  ;;  %7706 = vmatprep.mubr.msk.f32.mxu0 %vm2973_vm8, %v2467_v14  ;;  %v260_v41 = vpop.permute.xlu0 %259 }
  0xfd   :  { %v2518_v22 = vcombine.low %v1387_v1, %v1389_v37  ;;  %v1391_v63 = vcombine.high %v1387_v1, %v1387_v1  ;;  %v1408_v4 = vcombine.high %v1406_v49, %v1406_v49  ;;  %v1422_v9 = vrot.slane %v1406_v49, %v8154_v11 }
  0xfe   :  { %v2499_v12 = vrot.slane %v2471_v56, %v8154_v11  ;;  %v2517_v15 = vcombine.low %v1390_v54, %v1373_v38  ;;  %v1429_v42 = vrot.slane %v1407_v45, %v8154_v11  ;;  %v1437_v53 = vcombine.high %v1415_v47, %v1415_v47 }
  0xff   :  { %v2534_v16 = vrot.slane %v2518_v22, %v8154_v11  ;;  %v1436_v58 = vrot.slane %v1408_v4, %v8154_v11  ;;  %v1438_v39 = vcombine.high %v1422_v9, %v1422_v9  ;;  %v2519_v3 = vcombine.low %v1391_v63, %v1415_v47  ;;  %v381_v17 = vpop.permute.xlu1 %380 }
 0x100   :  { %v2501_v50 = vcombine.low %v2492_v46, %v2499_v12  ;;  %v2527_v21 = vrot.slane %v2517_v15, %v8154_v11  ;;  %v1439_v26 = vcombine.high %v1429_v42, %v1429_v42  ;;  %v2520_v13 = vcombine.low %v1429_v42, %v1437_v53  ;;  %v379_v30 = vpop.permute.xlu0 %378 }
 0x101   :  { %v2541_v5 = vrot.slane %v2519_v3, %v8154_v11  ;;  %v2567_v23 = vcombine.low %v1436_v58, %v1438_v39  ;;  %v585_v44 = vsel %vm568_vm5, %v560_v55, %v260_v41  ;;  %v2508_v27 = vrot.slane %v2500_v24, %v8154_v11 }
 0x102   :  { %v2548_v19 = vrot.slane %v2520_v13, %v8154_v11  ;;  %v2566_v0 = vcombine.low %v1439_v26, %v1422_v9  ;;  %v2515_v8 = vrot.slane %v2501_v50, %v8154_v11  ;;  %v610_v25 = vsel %vm593_vm6, %v585_v44, %v379_v30 }
 0x103   :  { %v145_v18 = vpop.permute.xlu1 %144  ;;  %v2549_v61 = vcombine.low %v2527_v21, %v2534_v16  ;;  %v2583_v31 = vrot.slane %v2567_v23, %v8154_v11  ;;  %v586_v24 = vsel %vm568_vm5, %v561_v28, %v262_v43  ;;  %v1440_v10 = vcombine.high %v1436_v58, %v1436_v58 }
 0x104   :  { %v2550_v59 = vcombine.low %v2541_v5, %v2548_v19  ;;  %v504_v51 = vpop.permute.xlu0 %503  ;;  %v2516_v40 = vcombine.low %v2508_v27, %v2515_v8  ;;  %v2576_v60 = vrot.slane %v2566_v0, %v8154_v11  ;;  %v611_v35 = vsel %vm593_vm6, %v586_v24, %v381_v17  ;;  %v7796_v5 = vld [vmem:[%s9851_s0 + $0x98] sm:$0xff] }
 0x105   :  { %v635_v7 = vsel %vm618_vm7, %v610_v25, %v504_v51  ;;  %v2557_v38 = vrot.slane %v2549_v61, %v8154_v11  ;;  %v562_v57 = vsel %vm543_vm4, %v7796_v5, %v145_v18 }
 0x106   :  { %v1441_v29 = vcombine.high %v635_v7, %v635_v7  ;;  %v1448_v20 = vrot.slane %v635_v7, %v8154_v11  ;;  %v2564_v33 = vrot.slane %v2550_v59, %v8154_v11  ;;  %7707 = vmatmul.mubr.msk.f32.gmra.mrb[12].mxu0 %vm2973_vm8, %v2516_v40  ;;  %v2598_v41 = vcombine.low %v2576_v60, %v2583_v31 }
 0x107   :  { %v147_v34 = vpop.permute.xlu1 %146 }
 0x108   :  { %v1455_v2 = vrot.slane %v1441_v29, %v8154_v11  ;;  %v1456_v32 = vcombine.high %v1448_v20, %v1448_v20  ;;  %v1464_v36 = vrot.slane %v1448_v20, %v8154_v11  ;;  %v506_v48 = vpop.permute.xlu0 %505  ;;  %v2565_v1 = vcombine.low %v2557_v38, %v2564_v33  ;;  %v7797_v20 = vld [vmem:[%s9851_s0 + $0xa0] sm:$0xff] }
 0x109   :  { %v636_v14 = vsel %vm618_vm7, %v611_v35, %v506_v48  ;;  %v2606_v0 = vrot.slane %v2598_v41, %v8154_v11  ;;  %v563_v33 = vsel %vm543_vm4, %v7797_v20, %v147_v34 }
 0x10a   :  { %v1457_v37 = vcombine.high %v1455_v2, %v1455_v2  ;;  %v1471_v49 = vrot.slane %v1455_v2, %v8154_v11  ;;  %v1478_v45 = vrot.slane %v1456_v32, %v8154_v11  ;;  %v1486_v43 = vcombine.high %v1464_v36, %v1464_v36  ;;  %7709 = vmatprep.mubr.msk.f32.mxu0 %vm2973_vm8, %v2565_v1 }
 0x10b   :  { %v2568_v54 = vcombine.low %v1440_v10, %v1464_v36  ;;  %v1490_v56 = vcombine.high %v636_v14, %v636_v14  ;;  %v1497_v46 = vrot.slane %v636_v14, %v8154_v11  ;;  %v266_v47 = vpop.permute.xlu1 %265 }
 0x10c   :  { %v1485_v22 = vrot.slane %v1457_v37, %v8154_v11  ;;  %v1487_v63 = vcombine.high %v1471_v49, %v1471_v49  ;;  %v1488_v4 = vcombine.high %v1478_v45, %v1478_v45  ;;  %v2569_v9 = vcombine.low %v1478_v45, %v1486_v43  ;;  %v264_v12 = vpop.permute.xlu0 %263 }
 0x10d   :  { %v2590_v15 = vrot.slane %v2568_v54, %v8154_v11  ;;  %v1504_v42 = vrot.slane %v1490_v56, %v8154_v11  ;;  %v1505_v53 = vcombine.high %v1497_v46, %v1497_v46  ;;  %v1513_v16 = vrot.slane %v1497_v46, %v8154_v11 }
 0x10e   :  { %v2597_v58 = vrot.slane %v2569_v9, %v8154_v11  ;;  %v2615_v39 = vcombine.low %v1488_v4, %v1471_v49  ;;  %v2616_v3 = vcombine.low %v1485_v22, %v1487_v63  ;;  %v1489_v17 = vcombine.high %v1485_v22, %v1485_v22  ;;  %v7798_v49 = vld [vmem:[%s9851_s0 + $0xa8] sm:$0xff] }
 0x10f   :  { %v1506_v50 = vcombine.high %v1504_v42, %v1504_v42  ;;  %v1520_v21 = vrot.slane %v1504_v42, %v8154_v11  ;;  %v1527_v26 = vrot.slane %v1505_v53, %v8154_v11  ;;  %v1535_v13 = vcombine.high %v1513_v16, %v1513_v16  ;;  %v385_v30 = vpop.permute.xlu1 %384 }
 0x110   :  { %v2599_v55 = vcombine.low %v2590_v15, %v2597_v58  ;;  %v2617_v19 = vcombine.low %v1489_v17, %v1513_v16  ;;  %v383_v23 = vpop.permute.xlu0 %382  ;;  %v2625_v25 = vrot.slane %v2615_v39, %v8154_v11  ;;  %v2632_v51 = vrot.slane %v2616_v3, %v8154_v11 }
 0x111   :  { %v1534_v44 = vrot.slane %v1506_v50, %v8154_v11  ;;  %v1536_v27 = vcombine.high %v1520_v21, %v1520_v21  ;;  %v1537_v8 = vcombine.high %v1527_v26, %v1527_v26  ;;  %v2618_v59 = vcombine.low %v1527_v26, %v1535_v13 }
 0x112   :  { %v2639_v61 = vrot.slane %v2617_v19, %v8154_v11  ;;  %v2613_v7 = vrot.slane %v2599_v55, %v8154_v11  ;;  %v587_v28 = vsel %vm568_vm5, %v562_v57, %v264_v12  ;;  %v588_v36 = vsel %vm568_vm5, %v563_v33, %v266_v47  ;;  %v7799_v33 = vld [vmem:[%s9851_s0 + $0xb0] sm:$0xff] }
 0x113   :  { %v2646_v18 = vrot.slane %v2618_v59, %v8154_v11  ;;  %v2664_v40 = vcombine.low %v1537_v8, %v1520_v21  ;;  %v2665_v6 = vcombine.low %v1534_v44, %v1536_v27  ;;  %v149_v29 = vpop.permute.xlu1 %148  ;;  %v612_v60 = vsel %vm593_vm6, %v587_v28, %v383_v23 }
 0x114   :  { %v508_v31 = vpop.permute.xlu0 %507  ;;  %v2614_v24 = vcombine.low %v2606_v0, %v2613_v7  ;;  %v2647_v14 = vcombine.low %v2625_v25, %v2632_v51  ;;  %v613_v34 = vsel %vm593_vm6, %v588_v36, %v385_v30  ;;  %v564_v45 = vsel %vm543_vm4, %v7798_v49, %v149_v29 }
 0x115   :  { %v2648_v38 = vcombine.low %v2639_v61, %v2646_v18  ;;  %v2674_v35 = vrot.slane %v2664_v40, %v8154_v11  ;;  %v2681_v2 = vrot.slane %v2665_v6, %v8154_v11  ;;  %v637_v32 = vsel %vm618_vm7, %v612_v60, %v508_v31 }
 0x116   :  { %v1539_v48 = vcombine.high %v637_v32, %v637_v32  ;;  %v1546_v10 = vrot.slane %v637_v32, %v8154_v11  ;;  %7710 = vmatmul.mubr.msk.f32.gmra.mrb[14].mxu0 %vm2973_vm8, %v2614_v24  ;;  %v1538_v47 = vcombine.high %v1534_v44, %v1534_v44  ;;  %v2655_v22 = vrot.slane %v2647_v14, %v8154_v11 }
 0x117   :  { %v151_v1 = vpop.permute.xlu1 %150  ;;  %v2662_v37 = vrot.slane %v2648_v38, %v8154_v11  ;;  %v2696_v63 = vcombine.low %v2674_v35, %v2681_v2 }
 0x118   :  { %v1553_v43 = vrot.slane %v1539_v48, %v8154_v11  ;;  %v1554_v54 = vcombine.high %v1546_v10, %v1546_v10  ;;  %v1562_v56 = vrot.slane %v1546_v10, %v8154_v11  ;;  %v510_v46 = vpop.permute.xlu0 %509  ;;  %v565_v60 = vsel %vm543_vm4, %v7799_v33, %v151_v1 }
 0x119   :  { %v638_v41 = vsel %vm618_vm7, %v613_v34, %v510_v46  ;;  %v2663_v58 = vcombine.low %v2655_v22, %v2662_v37  ;;  %v2704_v24 = vrot.slane %v2696_v63, %v8154_v11 }
 0x11a   :  { %v1555_v4 = vcombine.high %v1553_v43, %v1553_v43  ;;  %v1569_v9 = vrot.slane %v1553_v43, %v8154_v11  ;;  %v1576_v12 = vrot.slane %v1554_v54, %v8154_v11  ;;  %v1584_v15 = vcombine.high %v1562_v56, %v1562_v56 }
 0x11b   :  { %v2666_v42 = vcombine.low %v1538_v47, %v1562_v56  ;;  %v1588_v53 = vcombine.high %v638_v41, %v638_v41  ;;  %v1595_v16 = vrot.slane %v638_v41, %v8154_v11  ;;  %v270_v39 = vpop.permute.xlu1 %269  ;;  %7712 = vmatprep.mubr.msk.f32.mxu0 %vm2973_vm8, %v2663_v58 }
 0x11c   :  { %v1583_v3 = vrot.slane %v1555_v4, %v8154_v11  ;;  %v1585_v17 = vcombine.high %v1569_v9, %v1569_v9  ;;  %v1586_v50 = vcombine.high %v1576_v12, %v1576_v12  ;;  %v2667_v21 = vcombine.low %v1576_v12, %v1584_v15  ;;  %v268_v26 = vpop.permute.xlu0 %267 }
 0x11d   :  { %v2688_v13 = vrot.slane %v2666_v42, %v8154_v11  ;;  %v1602_v30 = vrot.slane %v1588_v53, %v8154_v11  ;;  %v1603_v5 = vcombine.high %v1595_v16, %v1595_v16  ;;  %v1611_v57 = vrot.slane %v1595_v16, %v8154_v11 }
 0x11e   :  { %v2695_v55 = vrot.slane %v2667_v21, %v8154_v11  ;;  %v2713_v19 = vcombine.low %v1586_v50, %v1569_v9  ;;  %v2714_v23 = vcombine.low %v1583_v3, %v1585_v17  ;;  %v1587_v0 = vcombine.high %v1583_v3, %v1583_v3 }
 0x11f   :  { %v1604_v44 = vcombine.high %v1602_v30, %v1602_v30  ;;  %v1618_v27 = vrot.slane %v1602_v30, %v8154_v11  ;;  %v1625_v8 = vrot.slane %v1603_v5, %v8154_v11  ;;  %v1633_v59 = vcombine.high %v1611_v57, %v1611_v57  ;;  %v389_v18 = vpop.permute.xlu1 %388 }
 0x120   :  { %v2697_v25 = vcombine.low %v2688_v13, %v2695_v55  ;;  %v2723_v51 = vrot.slane %v2713_v19, %v8154_v11  ;;  %v2730_v61 = vrot.slane %v2714_v23, %v8154_v11  ;;  %v2715_v7 = vcombine.low %v1587_v0, %v1611_v57  ;;  %v387_v20 = vpop.permute.xlu0 %386 }
 0x121   :  { %v1632_v40 = vrot.slane %v1604_v44, %v8154_v11  ;;  %v1634_v6 = vcombine.high %v1618_v27, %v1618_v27  ;;  %v1635_v28 = vcombine.high %v1625_v8, %v1625_v8  ;;  %v2716_v29 = vcombine.low %v1625_v8, %v1633_v59 }
 0x122   :  { %v2737_v31 = vrot.slane %v2715_v7, %v8154_v11  ;;  %v2711_v38 = vrot.slane %v2697_v25, %v8154_v11  ;;  %v590_v32 = vsel %vm568_vm5, %v565_v60, %v270_v39  ;;  %v589_v36 = vsel %vm568_vm5, %v564_v45, %v268_v26 }
 0x123   :  { %v2744_v35 = vrot.slane %v2716_v29, %v8154_v11  ;;  %v2762_v2 = vcombine.low %v1635_v28, %v1618_v27  ;;  %v2763_v48 = vcombine.low %v1632_v40, %v1634_v6  ;;  %v615_v10 = vsel %vm593_vm6, %v590_v32, %v389_v18  ;;  %v514_v14 = vpop.permute.xlu1 %513 }
 0x124   :  { %v2712_v34 = vcombine.low %v2704_v24, %v2711_v38  ;;  %v2745_v37 = vcombine.low %v2723_v51, %v2730_v61  ;;  %v614_v49 = vsel %vm593_vm6, %v589_v36, %v387_v20  ;;  %v640_v43 = vsel %vm618_vm7, %v615_v10, %v514_v14  ;;  %v512_v56 = vpop.permute.xlu0 %511 }
 0x125   :  { %v2746_v1 = vcombine.low %v2737_v31, %v2744_v35  ;;  %v1636_v54 = vcombine.high %v1632_v40, %v1632_v40  ;;  %v2772_v46 = vrot.slane %v2762_v2, %v8154_v11  ;;  %v1686_v47 = vcombine.high %v640_v43, %v640_v43  ;;  %v7800_v35 = vld [vmem:[%s9851_s0 + $0xb8] sm:$0xff] }
 0x126   :  { %v1693_v41 = vrot.slane %v640_v43, %v8154_v11  ;;  %v639_v45 = vsel %vm618_vm7, %v614_v49, %v512_v56  ;;  %7713 = vmatmul.mubr.msk.f32.gmra.mrb[16].mxu0 %vm2973_vm8, %v2712_v34  ;;  %v2753_v4 = vrot.slane %v2745_v37, %v8154_v11  ;;  %v2779_v12 = vrot.slane %v2763_v48, %v8154_v11  ;;  %v7801_v49 = vld [vmem:[%s9851_s0 + $0xc0] sm:$0xff] }
 0x127   :  { %v1637_v22 = vcombine.high %v639_v45, %v639_v45  ;;  %v1644_v63 = vrot.slane %v639_v45, %v8154_v11  ;;  %v2760_v9 = vrot.slane %v2746_v1, %v8154_v11  ;;  %v1700_v15 = vrot.slane %v1686_v47, %v8154_v11  ;;  %v272_v16 = vpop.permute.xlu1 %271 }
 0x128   :  { %v1701_v42 = vcombine.high %v1693_v41, %v1693_v41  ;;  %v1709_v53 = vrot.slane %v1693_v41, %v8154_v11  ;;  %v153_v17 = vpop.permute.xlu0 %152  ;;  %v2794_v8 = vcombine.low %v2772_v46, %v2779_v12 }
 0x129   :  { %v1651_v58 = vrot.slane %v1637_v22, %v8154_v11  ;;  %v1652_v39 = vcombine.high %v1644_v63, %v1644_v63  ;;  %v1660_v3 = vrot.slane %v1644_v63, %v8154_v11  ;;  %v2761_v50 = vcombine.low %v2753_v4, %v2760_v9 }
 0x12a   :  { %v1702_v21 = vcombine.high %v1700_v15, %v1700_v15  ;;  %v1716_v26 = vrot.slane %v1700_v15, %v8154_v11  ;;  %v1723_v13 = vrot.slane %v1701_v42, %v8154_v11  ;;  %v1731_v30 = vcombine.high %v1709_v53, %v1709_v53 }
 0x12b   :  { %v1653_v5 = vcombine.high %v1651_v58, %v1651_v58  ;;  %v1667_v57 = vrot.slane %v1651_v58, %v8154_v11  ;;  %v1674_v55 = vrot.slane %v1652_v39, %v8154_v11  ;;  %v1682_v19 = vcombine.high %v1660_v3, %v1660_v3  ;;  %7715 = vmatprep.mubr.msk.f32.mxu0 %vm2973_vm8, %v2761_v50  ;;  %v516_v27 = vpop.permute.xlu1 %515 }
 0x12c   :  { %v1730_v23 = vrot.slane %v1702_v21, %v8154_v11  ;;  %v1732_v0 = vcombine.high %v1716_v26, %v1716_v26  ;;  %v1733_v44 = vcombine.high %v1723_v13, %v1723_v13  ;;  %v2764_v61 = vcombine.low %v1636_v54, %v1660_v3  ;;  %v391_v7 = vpop.permute.xlu0 %390 }
 0x12d   :  { %v1681_v59 = vrot.slane %v1653_v5, %v8154_v11  ;;  %v1683_v25 = vcombine.high %v1667_v57, %v1667_v57  ;;  %v1684_v51 = vcombine.high %v1674_v55, %v1674_v55  ;;  %v2814_v18 = vcombine.low %v1723_v13, %v1731_v30 }
 0x12e   :  { %v2860_v40 = vcombine.low %v1733_v44, %v1716_v26  ;;  %v2861_v6 = vcombine.low %v1730_v23, %v1732_v0  ;;  %v2765_v28 = vcombine.low %v1674_v55, %v1682_v19  ;;  %v2786_v20 = vrot.slane %v2764_v61, %v8154_v11 }
 0x12f   :  { %v1685_v29 = vcombine.high %v1681_v59, %v1681_v59  ;;  %v2811_v33 = vcombine.low %v1684_v51, %v1667_v57  ;;  %v2812_v60 = vcombine.low %v1681_v59, %v1683_v25  ;;  %v566_v2 = vsel %vm543_vm4, %v7800_v35, %v153_v17  ;;  %v274_v34 = vpop.permute.xlu1 %273 }
 0x130   :  { %v2870_v31 = vrot.slane %v2860_v40, %v8154_v11  ;;  %v2877_v24 = vrot.slane %v2861_v6, %v8154_v11  ;;  %v2793_v38 = vrot.slane %v2765_v28, %v8154_v11  ;;  %v591_v10 = vsel %vm568_vm5, %v566_v2, %v272_v16  ;;  %v155_v14 = vpop.permute.xlu0 %154 }
 0x131   :  { %v2813_v32 = vcombine.low %v1685_v29, %v1709_v53  ;;  %v2821_v36 = vrot.slane %v2811_v33, %v8154_v11  ;;  %v2828_v48 = vrot.slane %v2812_v60, %v8154_v11  ;;  %v616_v1 = vsel %vm593_vm6, %v591_v10, %v391_v7 }
 0x132   :  { %v2795_v37 = vcombine.low %v2786_v20, %v2793_v38  ;;  %v567_v43 = vsel %vm543_vm4, %v7801_v49, %v155_v14  ;;  %v2842_v54 = vrot.slane %v2814_v18, %v8154_v11  ;;  %v641_v56 = vsel %vm618_vm7, %v616_v1, %v516_v27 }
 0x133   :  { %v592_v46 = vsel %vm568_vm5, %v567_v43, %v274_v34  ;;  %v2835_v47 = vrot.slane %v2813_v32, %v8154_v11  ;;  %v1735_v41 = vcombine.high %v641_v56, %v641_v56  ;;  %v1742_v45 = vrot.slane %v641_v56, %v8154_v11  ;;  %v518_v12 = vpop.permute.xlu1 %517 }
 0x134   :  { %v2809_v22 = vrot.slane %v2795_v37, %v8154_v11  ;;  %v2843_v63 = vcombine.low %v2821_v36, %v2828_v48  ;;  %v1734_v4 = vcombine.high %v1730_v23, %v1730_v23  ;;  %v393_v9 = vpop.permute.xlu0 %392  ;;  %v2802_v15 = vrot.slane %v2794_v8, %v8154_v11 }
 0x135   :  { %v2844_v42 = vcombine.low %v2835_v47, %v2842_v54  ;;  %v2892_v53 = vcombine.low %v2870_v31, %v2877_v24  ;;  %v1749_v16 = vrot.slane %v1735_v41, %v8154_v11  ;;  %v1750_v58 = vcombine.high %v1742_v45, %v1742_v45  ;;  %v8793_v47 = vld [vmem:[%s9852_s1 + $0x18] ss:$0 sm:$0xff] }
 0x136   :  { %v1758_v39 = vrot.slane %v1742_v45, %v8154_v11  ;;  %v617_v3 = vsel %vm593_vm6, %v592_v46, %v393_v9  ;;  %v2810_v50 = vcombine.low %v2802_v15, %v2809_v22  ;;  %v2851_v21 = vrot.slane %v2843_v63, %v8154_v11 }
 0x137   :  { %v642_v17 = vsel %vm618_vm7, %v617_v3, %v518_v12  ;;  %v2858_v26 = vrot.slane %v2844_v42, %v8154_v11  ;;  %v1751_v13 = vcombine.high %v1749_v16, %v1749_v16  ;;  %v1765_v30 = vrot.slane %v1749_v16, %v8154_v11 }
 0x138   :  { %v1772_v5 = vrot.slane %v1750_v58, %v8154_v11  ;;  %v1780_v57 = vcombine.high %v1758_v39, %v1758_v39  ;;  %v2862_v55 = vcombine.low %v1734_v4, %v1758_v39  ;;  %v1784_v19 = vcombine.high %v642_v17, %v642_v17  ;;  %7716 = vmatmul.mubr.msk.f32.gmra.mrb[18].mxu0 %vm2973_vm8, %v2810_v50 }
 0x139   :  { %v1791_v23 = vrot.slane %v642_v17, %v8154_v11  ;;  %v2859_v0 = vcombine.low %v2851_v21, %v2858_v26  ;;  %v1779_v44 = vrot.slane %v1751_v13, %v8154_v11  ;;  %v1781_v27 = vcombine.high %v1765_v30, %v1765_v30 }
 0x13a   :  { %v1782_v8 = vcombine.high %v1772_v5, %v1772_v5  ;;  %v2863_v59 = vcombine.low %v1772_v5, %v1780_v57  ;;  %v2884_v25 = vrot.slane %v2862_v55, %v8154_v11  ;;  %v1798_v51 = vrot.slane %v1784_v19, %v8154_v11 }
 0x13b   :  { %v1799_v61 = vcombine.high %v1791_v23, %v1791_v23  ;;  %v1806_v7 = vrot.slane %v1791_v23, %v8154_v11  ;;  %7718 = vmatprep.mubr.msk.f32.mxu0 %vm2973_vm8, %v2859_v0  ;;  %v2910_v6 = vcombine.low %v1779_v44, %v1781_v27  ;;  %v1783_v28 = vcombine.high %v1779_v44, %v1779_v44 }
 0x13c   :  { %v2891_v18 = vrot.slane %v2863_v59, %v8154_v11  ;;  %v2909_v40 = vcombine.low %v1782_v8, %v1765_v30  ;;  %v1813_v38 = vrot.slane %v1798_v51, %v8154_v11  ;;  %v2900_v32 = vrot.slane %v2892_v53, %v8154_v11 }
 0x13d   :  { %v1820_v29 = vrot.slane %v1799_v61, %v8154_v11  ;;  %v1821_v20 = vcombine.high %v1806_v7, %v1806_v7  ;;  %v2926_v31 = vrot.slane %v2910_v6, %v8154_v11  ;;  %v2911_v24 = vcombine.low %v1783_v28, %v1806_v7 }
 0x13e   :  { %v2893_v33 = vcombine.low %v2884_v25, %v2891_v18  ;;  %v2919_v60 = vrot.slane %v2909_v40, %v8154_v11 }
 0x13f   :  { %v1822_v35 = vcombine.high %v1820_v29, %v1820_v29  ;;  %v2912_v2 = vcombine.low %v1820_v29, %v1821_v20  ;;  %v2933_v48 = vrot.slane %v2911_v24, %v8154_v11 }
 0x140   :  { %v2907_v36 = vrot.slane %v2893_v33, %v8154_v11  ;;  %v2941_v34 = vcombine.low %v2919_v60, %v2926_v31 }
 0x141   :  { %v2940_v10 = vrot.slane %v2912_v2, %v8154_v11  ;;  %v2958_v14 = vcombine.low %v1822_v35, %v1813_v38 }
 0x142   :  { %v2908_v37 = vcombine.low %v2900_v32, %v2907_v36  ;;  %v2949_v43 = vrot.slane %v2941_v34, %v8154_v11 }
 0x143   :  { %v2942_v1 = vcombine.low %v2933_v48, %v2940_v10  ;;  %v2965_v49 = vrot.slane %v2958_v14, %v8154_v11 }
 0x144   :  { %7719 = vmatmul.mubr.msk.f32.gmra.mrb[20].mxu0 %vm2973_vm8, %v2908_v37 }
 0x145   :  { %v2956_v54 = vrot.slane %v2942_v1, %v8154_v11  ;;  %v2972_v46 = vrot.slane %v2965_v49, %v8154_v11 }
 0x147   :  { %v2957_v56 = vcombine.low %v2949_v43, %v2956_v54 }
 0x149   :  { %7721 = vmatprep.mubr.msk.f32.mxu0 %vm2973_vm8, %v2957_v56 }
 0x14a   :  { %7722 = vmatmul.mubr.msk.f32.gmra.mrb[22].mxu0 %vm2973_vm8, %v2972_v46 }
 0x16f   :  { %v7690_v41 = vpop.f32.mrb[0].mxu0 }
 0x170   :  { %v3097_v45 = vadd.f32 %v7690_v41, %v8793_v47  ;;  %v3091_v22 = vpop.f32.mrb[1].mxu0 }
 0x171   :  { %v3092_v63 = vadd.f32 %v8793_v47, %v3091_v22 }
 0x172   :  { %v3283_v4 = vcombine.high %v3097_v45, %v3097_v45  ;;  %v3290_v9 = vrot.slane %v3097_v45, %v8154_v11 }
 0x173   :  { %v3234_v12 = vcombine.high %v3092_v63, %v3092_v63  ;;  %v3241_v15 = vrot.slane %v3092_v63, %v8154_v11 }
 0x174   :  { %v3297_v42 = vrot.slane %v3283_v4, %v8154_v11  ;;  %v3298_v53 = vcombine.high %v3290_v9, %v3290_v9  ;;  %v3306_v16 = vrot.slane %v3290_v9, %v8154_v11 }
 0x175   :  { %v3248_v58 = vrot.slane %v3234_v12, %v8154_v11  ;;  %v3249_v39 = vcombine.high %v3241_v15, %v3241_v15  ;;  %v3257_v3 = vrot.slane %v3241_v15, %v8154_v11 }
 0x176   :  { %v3299_v17 = vcombine.high %v3297_v42, %v3297_v42  ;;  %v3313_v50 = vrot.slane %v3297_v42, %v8154_v11  ;;  %v3320_v21 = vrot.slane %v3298_v53, %v8154_v11  ;;  %v3328_v26 = vcombine.high %v3306_v16, %v3306_v16 }
 0x177   :  { %v3250_v13 = vcombine.high %v3248_v58, %v3248_v58  ;;  %v3264_v30 = vrot.slane %v3248_v58, %v8154_v11  ;;  %v3271_v5 = vrot.slane %v3249_v39, %v8154_v11  ;;  %v3279_v0 = vcombine.high %v3257_v3, %v3257_v3 }
 0x178   :  { %v3327_v57 = vrot.slane %v3299_v17, %v8154_v11  ;;  %v3330_v55 = vcombine.high %v3320_v21, %v3320_v21  ;;  %v4572_v19 = vmax.f32 %v3320_v21, %v3328_v26  ;;  %v3329_v8 = vcombine.high %v3313_v50, %v3313_v50 }
 0x179   :  { %v3278_v23 = vrot.slane %v3250_v13, %v8154_v11  ;;  %v3281_v44 = vcombine.high %v3271_v5, %v3271_v5  ;;  %v4569_v27 = vmax.f32 %v3257_v3, %v3271_v5  ;;  %v3280_v25 = vcombine.high %v3264_v30, %v3264_v30 }
 0x17a   :  { %v4573_v59 = vmax.f32 %v3313_v50, %v3327_v57  ;;  %v4634_v51 = vmax.f32 %v4572_v19, %v3330_v55  ;;  %v3331_v1 = vcombine.high %v3327_v57, %v3327_v57 }
 0x17b   :  { %v3282_v61 = vcombine.high %v3278_v23, %v3278_v23  ;;  %v4570_v7 = vmax.f32 %v3281_v44, %v3264_v30  ;;  %v4631_v18 = vmax.f32 %v4569_v27, %v3279_v0 }
 0x17c   :  { %v8809_v40 = vmax.f32 %v4573_v59, %v3329_v8  ;;  %v4696_v20 = vmax.f32 %v4634_v51, 0.0 }
 0x17d   :  { %v4571_v6 = vmax.f32 %v3280_v25, %v3282_v61  ;;  %v4632_v28 = vmax.f32 %v4570_v7, %v3278_v23  ;;  %v4693_v60 = vmax.f32 %v4631_v18, 0.0 }
 0x17e   :  { %v4697_v29 = vmax.f32 %v8809_v40, 0.0 }
 0x17f   :  { %v4633_v33 = vmax.f32 %v4571_v6, %v3306_v16  ;;  %v4694_v31 = vmax.f32 %v4632_v28, 0.0  ;;  %v7693_v24 = vpop.f32.mrb[2].mxu0 }
 0x180   :  { %v3107_v2 = vadd.f32 %v7693_v24, %v8793_v47  ;;  %v3101_v32 = vpop.f32.mrb[3].mxu0  ;;  %v5160_v36 = vcombine.low %v4696_v20, %v4697_v29 }
 0x181   :  { %v4695_v38 = vmax.f32 %v4633_v33, 0.0  ;;  %v4809_v35 = vcombine.low %v4693_v60, %v4694_v31  ;;  %v3102_v48 = vadd.f32 %v8793_v47, %v3101_v32 }
 0x182   :  { %v3381_v10 = vcombine.high %v3107_v2, %v3107_v2  ;;  %v3388_v14 = vrot.slane %v3107_v2, %v8154_v11  ;;  %v8819_v41 = vrot.slane %v5160_v36, %v8154_v11 }
 0x183   :  { %v5159_v34 = vcombine.low %v4694_v31, %v4695_v38  ;;  %v4810_v37 = vcombine.low %v4695_v38, %v4696_v20  ;;  %v3332_v49 = vcombine.high %v3102_v48, %v3102_v48  ;;  %v3339_v43 = vrot.slane %v3102_v48, %v8154_v11 }
 0x184   :  { %v3395_v54 = vrot.slane %v3381_v10, %v8154_v11  ;;  %v3396_v56 = vcombine.high %v3388_v14, %v3388_v14  ;;  %v3404_v46 = vrot.slane %v3388_v14, %v8154_v11  ;;  %v4819_v23 = vrot.slane %v4809_v35, %v8154_v11 }
 0x185   :  { %v3346_v45 = vrot.slane %v3332_v49, %v8154_v11  ;;  %v3347_v22 = vcombine.high %v3339_v43, %v3339_v43  ;;  %v3355_v63 = vrot.slane %v3339_v43, %v8154_v11  ;;  %v5169_v4 = vrot.slane %v5159_v34, %v8154_v11 }
 0x186   :  { %v3397_v9 = vcombine.high %v3395_v54, %v3395_v54  ;;  %v3411_v12 = vrot.slane %v3395_v54, %v8154_v11  ;;  %v3418_v15 = vrot.slane %v3396_v56, %v8154_v11  ;;  %v8827_v42 = vrot.slane %v4810_v37, %v8154_v11 }
 0x187   :  { %v3426_v53 = vcombine.high %v3404_v46, %v3404_v46  ;;  %v3348_v16 = vcombine.high %v3346_v45, %v3346_v45  ;;  %v3362_v58 = vrot.slane %v3346_v45, %v8154_v11  ;;  %v3369_v39 = vrot.slane %v3347_v22, %v8154_v11 }
 0x188   :  { %v3425_v3 = vrot.slane %v3397_v9, %v8154_v11  ;;  %v3428_v17 = vcombine.high %v3418_v15, %v3418_v15  ;;  %v4577_v50 = vmax.f32 %v3404_v46, %v3418_v15  ;;  %v3377_v21 = vcombine.high %v3355_v63, %v3355_v63 }
 0x189   :  { %v3376_v26 = vrot.slane %v3348_v16, %v8154_v11  ;;  %v3378_v13 = vcombine.high %v3362_v58, %v3362_v58  ;;  %v3379_v30 = vcombine.high %v3369_v39, %v3369_v39  ;;  %v4574_v5 = vmax.f32 %v3331_v1, %v3355_v63 }
 0x18a   :  { %v4578_v57 = vmax.f32 %v3428_v17, %v3411_v12  ;;  %v4639_v55 = vmax.f32 %v4577_v50, %v3426_v53  ;;  %v5191_v19 = vcombine.low %v5169_v4, %v8819_v41  ;;  %v3429_v25 = vcombine.high %v3425_v3, %v3425_v3 }
 0x18b   :  { %v3380_v0 = vcombine.high %v3376_v26, %v3376_v26  ;;  %v4575_v44 = vmax.f32 %v3377_v21, %v3379_v30  ;;  %v4576_v27 = vmax.f32 %v3376_v26, %v3378_v13  ;;  %v4636_v8 = vmax.f32 %v4574_v5, %v3369_v39 }
 0x18c   :  { %v4640_v59 = vmax.f32 %v4578_v57, %v3425_v3  ;;  %v8836_v18 = vcombine.low %v4819_v23, %v8827_v42  ;;  %v3427_v40 = vcombine.high %v3411_v12, %v3411_v12  ;;  %v4701_v6 = vmax.f32 %v4639_v55, 0.0 }
 0x18d   :  { %v4637_v51 = vmax.f32 %v4575_v44, %v3362_v58  ;;  %v4638_v61 = vmax.f32 %v4576_v27, %v3380_v0  ;;  %v4698_v7 = vmax.f32 %v4636_v8, 0.0  ;;  %v5199_v14 = vrot.slane %v5191_v19, %v8154_v11 }
 0x18e   :  { %v8838_v28 = vmax.f32 %v4640_v59, 0.0  ;;  %v4579_v38 = vmax.f32 %v3427_v40, %v3429_v25 }
 0x18f   :  { %v4699_v20 = vmax.f32 %v4637_v51, 0.0  ;;  %v4700_v33 = vmax.f32 %v4638_v61, 0.0  ;;  %v4811_v60 = vcombine.low %v4697_v29, %v4698_v7  ;;  %v7696_v24 = vpop.f32.mrb[4].mxu0 }
 0x190   :  { %v4858_v31 = vcombine.low %v4701_v6, %v8838_v28  ;;  %v3117_v32 = vadd.f32 %v7696_v24, %v8793_v47  ;;  %v3111_v36 = vpop.f32.mrb[5].mxu0 }
 0x191   :  { %v4812_v35 = vcombine.low %v4699_v20, %v4700_v33  ;;  %v5161_v2 = vcombine.low %v4698_v7, %v4699_v20  ;;  %v5162_v48 = vcombine.low %v4700_v33, %v4701_v6  ;;  %v3112_v10 = vadd.f32 %v8793_v47, %v3111_v36 }
 0x192   :  { %v8845_v34 = vrot.slane %v4811_v60, %v8154_v11  ;;  %v8848_v37 = vrot.slane %v4858_v31, %v8154_v11  ;;  %v3479_v29 = vcombine.high %v3117_v32, %v3117_v32  ;;  %v3486_v1 = vrot.slane %v3117_v32, %v8154_v11 }
 0x193   :  { %v8852_v49 = vrot.slane %v5161_v2, %v8154_v11  ;;  %v8855_v43 = vrot.slane %v5162_v48, %v8154_v11  ;;  %v3430_v54 = vcombine.high %v3112_v10, %v3112_v10  ;;  %v3437_v56 = vrot.slane %v3112_v10, %v8154_v11 }
 0x194   :  { %v8859_v46 = vrot.slane %v4812_v35, %v8154_v11  ;;  %v5525_v45 = vcombine.low %v8827_v42, %v8845_v34  ;;  %v3493_v22 = vrot.slane %v3479_v29, %v8154_v11  ;;  %v3494_v63 = vcombine.high %v3486_v1, %v3486_v1 }
 0x195   :  { %v3502_v4 = vrot.slane %v3486_v1, %v8154_v11  ;;  %v5192_v9 = vcombine.low %v8852_v49, %v8855_v43  ;;  %v3444_v12 = vrot.slane %v3430_v54, %v8154_v11  ;;  %v3445_v15 = vcombine.high %v3437_v56, %v3437_v56 }
 0x196   :  { %v3453_v53 = vrot.slane %v3437_v56, %v8154_v11  ;;  %v5526_v16 = vcombine.low %v8859_v46, %v8848_v37  ;;  %v3495_v58 = vcombine.high %v3493_v22, %v3493_v22  ;;  %v3509_v39 = vrot.slane %v3493_v22, %v8154_v11 }
 0x197   :  { %v3516_v42 = vrot.slane %v3494_v63, %v8154_v11  ;;  %v3524_v3 = vcombine.high %v3502_v4, %v3502_v4  ;;  %v3446_v17 = vcombine.high %v3444_v12, %v3444_v12  ;;  %v3460_v50 = vrot.slane %v3444_v12, %v8154_v11 }
 0x198   :  { %v3467_v21 = vrot.slane %v3445_v15, %v8154_v11  ;;  %v3475_v26 = vcombine.high %v3453_v53, %v3453_v53  ;;  %v3523_v13 = vrot.slane %v3495_v58, %v8154_v11  ;;  %v3525_v30 = vcombine.high %v3509_v39, %v3509_v39 }
 0x199   :  { %v3526_v5 = vcombine.high %v3516_v42, %v3516_v42  ;;  %v4641_v57 = vmax.f32 %v4579_v38, %v3453_v53  ;;  %v3474_v55 = vrot.slane %v3446_v17, %v8154_v11  ;;  %v3476_v19 = vcombine.high %v3460_v50, %v3460_v50 }
 0x19a   :  { %v3477_v23 = vcombine.high %v3467_v21, %v3467_v21  ;;  %v4580_v0 = vmax.f32 %v3467_v21, %v3475_v26  ;;  %v3527_v44 = vcombine.high %v3523_v13, %v3523_v13  ;;  %v4584_v8 = vmax.f32 %v3523_v13, %v3525_v30 }
 0x19b   :  { %v4583_v27 = vmax.f32 %v3524_v3, %v3526_v5  ;;  %v4703_v59 = vmax.f32 %v4641_v57, 0.0  ;;  %v3478_v25 = vcombine.high %v3474_v55, %v3474_v55  ;;  %v4581_v51 = vmax.f32 %v3460_v50, %v3474_v55 }
 0x19c   :  { %v4642_v61 = vmax.f32 %v4580_v0, %v3477_v23  ;;  %v5206_v7 = vrot.slane %v5192_v9, %v8154_v11  ;;  %v8878_v6 = vmax.f32 %v4584_v8, %v3527_v44  ;;  %v5533_v33 = vrot.slane %v5525_v45, %v8154_v11 }
 0x19d   :  { %v4645_v40 = vmax.f32 %v4583_v27, %v3509_v39  ;;  %v5208_v20 = vcombine.low %v8838_v28, %v4703_v59  ;;  %v4582_v60 = vmax.f32 %v3478_v25, %v3502_v4  ;;  %v4643_v31 = vmax.f32 %v4581_v51, %v3476_v19 }
 0x19e   :  { %v4704_v24 = vmax.f32 %v4642_v61, 0.0  ;;  %v5207_v38 = vcombine.low %v5199_v14, %v5206_v7  ;;  %v4708_v32 = vmax.f32 %v8878_v6, 0.0  ;;  %v5540_v48 = vrot.slane %v5526_v16, %v8154_v11 }
 0x19f   :  { %v7699_v35 = vpop.f32.mrb[6].mxu0  ;;  %v8882_v2 = vmax.f32 %v4645_v40, 0.0  ;;  %v8886_v36 = vrot.slane %v5208_v20, %v8154_v11  ;;  %v4644_v29 = vmax.f32 %v4582_v60, %v3516_v42  ;;  %v4705_v1 = vmax.f32 %v4643_v31, 0.0 }
 0x1a0   :  { %v3121_v10 = vpop.f32.mrb[7].mxu0  ;;  %v4859_v28 = vcombine.low %v4703_v59, %v4704_v24  ;;  %5499 = vrot.lane.b32.xlu0 %v5207_v38, %s7808_s20  ;;  %v3127_v54 = vadd.f32 %v7699_v35, %v8793_v47  ;;  %v5541_v14 = vcombine.low %v5533_v33, %v5540_v48  ;;  %v5699_v45 = vcombine.low %v8819_v41, %v8852_v49 }
 0x1a1   :  { %v3122_v56 = vadd.f32 %v8793_v47, %v3121_v10  ;;  %v4861_v22 = vcombine.low %v8882_v2, %v4708_v32  ;;  %v8897_v63 = vmax.f32 %v4644_v29, 0.0  ;;  %v5209_v12 = vcombine.low %v4704_v24, %v4705_v1 }
 0x1a2   :  { %v8900_v4 = vrot.slane %v4859_v28, %v8154_v11  ;;  %v3577_v9 = vcombine.high %v3127_v54, %v3127_v54  ;;  %5673 = vrot.lane.b32.xlu1 %v5541_v14, %s7809_s15  ;;  %v3584_v15 = vrot.slane %v3127_v54, %v8154_v11  ;;  %v5700_v58 = vcombine.low %v8855_v43, %v8886_v36 }
 0x1a3   :  { %v3528_v53 = vcombine.high %v3122_v56, %v3122_v56  ;;  %v3535_v16 = vrot.slane %v3122_v56, %v8154_v11  ;;  %v8906_v41 = vcombine.low %v4705_v1, %v8897_v63  ;;  %v5707_v39 = vrot.slane %v5699_v45, %v8154_v11 }
 0x1a4   :  { %v3591_v49 = vrot.slane %v3577_v9, %v8154_v11  ;;  %v3592_v42 = vcombine.high %v3584_v15, %v3584_v15  ;;  %v3600_v3 = vrot.slane %v3584_v15, %v8154_v11  ;;  %v5714_v30 = vrot.slane %v5700_v58, %v8154_v11 }
 0x1a5   :  { %v3542_v17 = vrot.slane %v3528_v53, %v8154_v11  ;;  %v3543_v50 = vcombine.high %v3535_v16, %v3535_v16  ;;  %v3551_v13 = vrot.slane %v3535_v16, %v8154_v11  ;;  %v4842_v60 = vcombine.low %v8845_v34, %v8859_v46 }
 0x1a6   :  { %v3593_v21 = vcombine.high %v3591_v49, %v3591_v49  ;;  %v3607_v26 = vrot.slane %v3591_v49, %v8154_v11  ;;  %v3614_v5 = vrot.slane %v3592_v42, %v8154_v11  ;;  %v3622_v57 = vcombine.high %v3600_v3, %v3600_v3 }
 0x1a7   :  { %v3544_v55 = vcombine.high %v3542_v17, %v3542_v17  ;;  %v3558_v43 = vrot.slane %v3542_v17, %v8154_v11  ;;  %v3565_v0 = vrot.slane %v3543_v50, %v8154_v11  ;;  %v3573_v44 = vcombine.high %v3551_v13, %v3551_v13 }
 0x1a8   :  { %v8920_v19 = vrot.slane %v3593_v21, %v8154_v11  ;;  %v3623_v23 = vcombine.high %v3607_v26, %v3607_v26  ;;  %v3624_v27 = vcombine.high %v3614_v5, %v3614_v5  ;;  %v4588_v8 = vmax.f32 %v3614_v5, %v3622_v57 }
 0x1a9   :  { %v3572_v59 = vrot.slane %v3544_v55, %v8154_v11  ;;  %v3574_v25 = vcombine.high %v3558_v43, %v3558_v43  ;;  %v3575_v61 = vcombine.high %v3565_v0, %v3565_v0  ;;  %v4585_v7 = vmax.f32 %v3551_v13, %v3565_v0 }
 0x1aa   :  { %v4589_v51 = vmax.f32 %v3607_v26, %v8920_v19  ;;  %v5715_v40 = vcombine.low %v5707_v39, %v5714_v30  ;;  %v4650_v20 = vmax.f32 %v4588_v8, %v3624_v27  ;;  %v4890_v31 = vcombine.low %v8848_v37, %v8900_v4 }
 0x1ab   :  { %v3576_v33 = vcombine.high %v3572_v59, %v3572_v59  ;;  %v8930_v24 = vrot.slane %v4861_v22, %v8154_v11  ;;  %v4586_v35 = vmax.f32 %v3575_v61, %v3558_v43  ;;  %v4647_v48 = vmax.f32 %v4585_v7, %v3573_v44 }
 0x1ac   :  { %v8932_v38 = vmax.f32 %v4589_v51, %v3623_v23  ;;  %5847 = vrot.lane.b32.xlu0 %v5715_v40, %s7810_s16  ;;  %v8936_v29 = vrot.slane %v4842_v60, %v8154_v11  ;;  %v8939_v1 = vrot.slane %v4890_v31, %v8154_v11  ;;  %v3625_v34 = vcombine.high %v8920_v19, %v8920_v19 }
 0x1ad   :  { %v4587_v10 = vmax.f32 %v3574_v25, %v3576_v33  ;;  %v4648_v46 = vmax.f32 %v4586_v35, %v3572_v59  ;;  %v4709_v28 = vmax.f32 %v4647_v48, 0.0  ;;  %v5210_v14 = vcombine.low %v8897_v63, %v8882_v2 }
 0x1ae   :  { %v4713_v37 = vmax.f32 %v8932_v38, 0.0  ;;  %v4712_v56 = vmax.f32 %v4650_v20, 0.0  ;;  %v5873_v22 = vcombine.low %v8936_v29, %v8939_v1  ;;  %v8953_v58 = vrot.slane %v5209_v12, %v8154_v11 }
 0x1af   :  { %v7702_v54 = vpop.f32.mrb[8].mxu0  ;;  %v4649_v45 = vmax.f32 %v4587_v10, %v3600_v3  ;;  %v4710_v53 = vmax.f32 %v4648_v46, 0.0  ;;  %v5211_v16 = vcombine.low %v4708_v32, %v4709_v28  ;;  %v8963_v32 = vrot.slane %v5210_v14, %v8154_v11 }
 0x1b0   :  { %v3137_v9 = vadd.f32 %v7702_v54, %v8793_v47  ;;  %v3131_v15 = vpop.f32.mrb[9].mxu0  ;;  %v8957_v2 = vcombine.low %v4712_v56, %v4713_v37  ;;  %5941 = vrot.lane.b32.xlu1 %v5873_v22, %s7811_s21  ;;  %v5240_v48 = vcombine.low %v8886_v36, %v8953_v58 }
 0x1b1   :  { %v3132_v49 = vadd.f32 %v8793_v47, %v3131_v15  ;;  %v4711_v63 = vmax.f32 %v4649_v45, 0.0  ;;  %v4907_v3 = vcombine.low %v4709_v28, %v4710_v53  ;;  %v5239_v13 = vrot.slane %v5211_v16, %v8154_v11 }
 0x1b2   :  { %v3675_v39 = vcombine.high %v3137_v9, %v3137_v9  ;;  %v3682_v42 = vrot.slane %v3137_v9, %v8154_v11  ;;  %v5248_v22 = vrot.slane %v5240_v48, %v8154_v11  ;;  %v6349_v48 = vld [vmem:[%s9852_s1 + $0x28] sm:$0xff] }
 0x1b3   :  { %v3626_v17 = vcombine.high %v3132_v49, %v3132_v49  ;;  %v3633_v6 = vrot.slane %v3132_v49, %v8154_v11  ;;  %v8965_v12 = vcombine.low %v4711_v63, %v4712_v56  ;;  %v5257_v50 = vcombine.low %v4710_v53, %v4711_v63 }
 0x1b4   :  { %v3689_v21 = vrot.slane %v3675_v39, %v8154_v11  ;;  %v3690_v26 = vcombine.high %v3682_v42, %v3682_v42  ;;  %v3698_v30 = vrot.slane %v3682_v42, %v8154_v11  ;;  %v8972_v55 = vrot.slane %v4907_v3, %v8154_v11 }
 0x1b5   :  { %v3640_v5 = vrot.slane %v3626_v17, %v8154_v11  ;;  %v3641_v57 = vcombine.high %v3633_v6, %v3633_v6  ;;  %v3649_v23 = vrot.slane %v3633_v6, %v8154_v11  ;;  %v5241_v54 = vcombine.low %v8963_v32, %v5239_v13 }
 0x1b6   :  { %v3691_v43 = vcombine.high %v3689_v21, %v3689_v21  ;;  %v3712_v19 = vrot.slane %v3690_v26, %v8154_v11  ;;  %v8977_v0 = vrot.slane %v3689_v21, %v8154_v11  ;;  %v3720_v25 = vcombine.high %v3698_v30, %v3698_v30 }
 0x1b7   :  { %v3642_v44 = vcombine.high %v3640_v5, %v3640_v5  ;;  %v3656_v27 = vrot.slane %v3640_v5, %v8154_v11  ;;  %v3663_v8 = vrot.slane %v3641_v57, %v8154_v11  ;;  %v3671_v40 = vcombine.high %v3649_v23, %v3649_v23 }
 0x1b8   :  { %v8982_v59 = vrot.slane %v3691_v43, %v8154_v11  ;;  %v3722_v51 = vcombine.high %v3712_v19, %v3712_v19  ;;  %v4593_v61 = vmax.f32 %v3698_v30, %v3712_v19  ;;  %v4590_v35 = vmax.f32 %v3625_v34, %v3649_v23 }
 0x1b9   :  { %v3670_v7 = vrot.slane %v3642_v44, %v8154_v11  ;;  %v3672_v20 = vcombine.high %v3656_v27, %v3656_v27  ;;  %v3673_v33 = vcombine.high %v3663_v8, %v3663_v8  ;;  %v5255_v53 = vrot.slane %v5241_v54, %v8154_v11 }
 0x1ba   :  { %v4594_v60 = vmax.f32 %v3722_v51, %v8977_v0  ;;  %v4655_v31 = vmax.f32 %v4593_v61, %v3720_v25  ;;  %v4652_v45 = vmax.f32 %v4590_v35, %v3663_v8  ;;  %v4882_v34 = vrot.slane %v8906_v41, %v8154_v11  ;;  %v6348_v35 = vld [vmem:[%s9852_s1 + $0x20] sm:$0xff] }
 0x1bb   :  { %v3674_v10 = vcombine.high %v3670_v7, %v3670_v7  ;;  %v4591_v46 = vmax.f32 %v3671_v40, %v3673_v33  ;;  %v4592_v28 = vmax.f32 %v3670_v7, %v3672_v20  ;;  %v5543_v49 = vcombine.low %v8930_v24, %v8972_v55 }
 0x1bc   :  { %v4656_v14 = vmax.f32 %v4594_v60, %v8982_v59  ;;  %v4717_v56 = vmax.f32 %v4655_v31, 0.0  ;;  %v4714_v36 = vmax.f32 %v4652_v45, 0.0  ;;  %v5267_v63 = vrot.slane %v5257_v50, %v8154_v11 }
 0x1bd   :  { %v4653_v9 = vmax.f32 %v4591_v46, %v3656_v27  ;;  %v4654_v15 = vmax.f32 %v4592_v28, %v3674_v10  ;;  %v5256_v3 = vcombine.low %v5248_v22, %v5255_v53  ;;  %v5542_v17 = vcombine.low %v8900_v4, %v4882_v34 }
 0x1be   :  { %v8994_v16 = vmax.f32 %v4656_v14, 0.0  ;;  %v4909_v21 = vcombine.low %v4713_v37, %v4714_v36  ;;  %v5557_v41 = vrot.slane %v5543_v49, %v8154_v11  ;;  %v5716_v26 = vcombine.low %v8953_v58, %v8963_v32  ;;  %v6350_v14 = vld [vmem:[%s9852_s1 + $0x30] sm:$0xff] }
 0x1bf   :  { %v4715_v39 = vmax.f32 %v4653_v9, 0.0  ;;  %v4716_v42 = vmax.f32 %v4654_v15, 0.0  ;;  %5501 = vrot.lane.b32.xlu0 %v5256_v3, %s7808_s20  ;;  %v5550_v50 = vrot.slane %v5542_v17, %v8154_v11  ;;  %v5717_v19 = vcombine.low %v5239_v13, %v5267_v63 }
 0x1c0   :  { %v4956_v6 = vcombine.low %v4717_v56, %v8994_v16  ;;  %v4931_v4 = vrot.slane %v4909_v21, %v8154_v11  ;;  %v4891_v58 = vcombine.low %v4882_v34, %v8930_v24  ;;  %v5724_v32 = vrot.slane %v5716_v26, %v8154_v11 }
 0x1c1   :  { %v4910_v30 = vcombine.low %v4715_v39, %v4716_v42  ;;  %v5259_v5 = vcombine.low %v4714_v36, %v4715_v39  ;;  %v5260_v57 = vcombine.low %v4716_v42, %v4717_v56  ;;  %v5558_v23 = vcombine.low %v5550_v50, %v5557_v41  ;;  %v6351_v56 = vld [vmem:[%s9852_s1 + $0x38] sm:$0xff] }
 0x1c2   :  { %v9009_v43 = vrot.slane %v4956_v6, %v8154_v11  ;;  %v5731_v44 = vrot.slane %v5717_v19, %v8154_v11  ;;  %v4924_v27 = vrot.slane %v8965_v12, %v8154_v11  ;;  %v9025_v25 = vrot.slane %v8957_v2, %v8154_v11  ;;  %v6353_v6 = vld [vmem:[%s9852_s1 + $0x48] sm:$0xff] }
 0x1c3   :  { %v4938_v38 = vrot.slane %v4910_v30, %v8154_v11  ;;  %v9014_v37 = vrot.slane %v5259_v5, %v8154_v11  ;;  %5675 = vrot.lane.b32.xlu1 %v5558_v23, %s7809_s15  ;;  %v9028_v51 = vrot.slane %v5260_v57, %v8154_v11  ;;  %v4849_v40 = vrot.slane %v8836_v18, %v8154_v11 }
 0x1c4   :  { %v5732_v24 = vcombine.low %v5724_v32, %v5731_v44  ;;  %v4939_v61 = vcombine.low %v8972_v55, %v4924_v27  ;;  %v5559_v7 = vcombine.low %v4924_v27, %v4931_v4  ;;  %v9034_v12 = vrot.slane %v4891_v58, %v8154_v11 }
 0x1c5   :  { %v5560_v8 = vcombine.low %v4938_v38, %v9009_v43  ;;  %v4940_v13 = vcombine.low %v4931_v4, %v4938_v38  ;;  %v5289_v33 = vcombine.low %v5267_v63, %v9025_v25  ;;  %v5290_v2 = vcombine.low %v9014_v37, %v9028_v51 }
 0x1c6   :  { %5849 = vrot.lane.b32.xlu0 %v5732_v24, %s7810_s16  ;;  %v9042_v60 = vrot.slane %v4939_v61, %v8154_v11  ;;  %v5567_v55 = vrot.slane %v5559_v7, %v8154_v11  ;;  %v5733_v18 = vcombine.low %v9025_v25, %v9014_v37  ;;  %v9048_v31 = vcombine.low %v4849_v40, %v8936_v29 }
 0x1c7   :  { %v5574_v20 = vrot.slane %v5560_v8, %v8154_v11  ;;  %v9057_v10 = vrot.slane %v5289_v33, %v8154_v11  ;;  %v9060_v46 = vrot.slane %v5290_v2, %v8154_v11  ;;  %v9065_v29 = vrot.slane %v4940_v13, %v8154_v11 }
 0x1c8   :  { %v5874_v28 = vcombine.low %v9034_v12, %v9042_v60  ;;  %v7764_v9 = vpack.c.bf16 %v6349_v48, %v6348_v35  ;;  %v3723_v34 = vcombine.high %v8982_v59, %v8982_v59  ;;  %v7812_v36 = vmov 0.0|0.0   ;;  %v6352_v59 = vld [vmem:[%s9852_s1 + $0x40] sm:$0xff] }
 0x1c9   :  { %v5575_v54 = vcombine.low %v5567_v55, %v5574_v20  ;;  %v7705_v45 = vpop.f32.mrb[10].mxu0  ;;  %v5305_v22 = vcombine.low %v9057_v10, %v9060_v46  ;;  %7763 = vmatprep.subr.bf16.mxu1 %v7812_v36  ;;  %v4906_v49 = vcombine.low %v8939_v1, %v9034_v12  ;;  %v3721_v63 = vcombine.high %v8977_v0, %v8977_v0 }
 0x1ca   :  { %5943 = vrot.lane.b32.xlu1 %v5874_v28, %s7811_s21  ;;  %v3147_v15 = vadd.f32 %v7705_v45, %v8793_v47  ;;  %v3141_v53 = vpop.f32.mrb[11].mxu0  ;;  %7765 = vmatpush3.bf16.msra.mxu1 %v7764_v9  ;;  %v7767_v42 = vpack.c.bf16 %v6351_v56, %v6350_v14  ;;  %v7814_v21 = vmov 0.0   ;;  %v4955_v0 = vcombine.low %v9042_v60, %v9065_v29  ;;  %v6354_v56 = vld [vmem:[%s9852_s1 + $0x50] sm:$0x3] }
 0x1cb   :  { %v3142_v39 = vadd.f32 %v8793_v47, %v3141_v53  ;;  %7766 = vmatprep.subr.bf16.mxu1 %v7812_v36  ;;  %7738 = vmatprep.mubr.msk.f32.mxu1 %vm7813_vm9, %v7814_v21  ;;  %v4595_v50 = vmax.f32 %v3721_v63, %v3723_v34  ;;  %v7770_v23 = vpack.c.bf16 %v6353_v6, %v6352_v59 }
 0x1cc   :  { %v3773_v3 = vcombine.high %v3147_v15, %v3147_v15  ;;  %v3780_v17 = vrot.slane %v3147_v15, %v8154_v11 }
 0x1cd   :  { %v3724_v41 = vcombine.high %v3142_v39, %v3142_v39  ;;  %v3731_v26 = vrot.slane %v3142_v39, %v8154_v11 }
 0x1ce   :  { %v3787_v30 = vrot.slane %v3773_v3, %v8154_v11  ;;  %v3788_v5 = vcombine.high %v3780_v17, %v3780_v17  ;;  %v3796_v57 = vrot.slane %v3780_v17, %v8154_v11  ;;  %5677 = vrot.lane.b32.xlu1 %v5575_v54, %s7809_s15  ;;  %7768 = vmatpush3.bf16.msra.mxu1 %v7767_v42 }
 0x1cf   :  { %v3738_v4 = vrot.slane %v3724_v41, %v8154_v11  ;;  %v3739_v19 = vcombine.high %v3731_v26, %v3731_v26  ;;  %v3747_v38 = vrot.slane %v3731_v26, %v8154_v11  ;;  %7769 = vmatprep.subr.bf16.mxu1 %v7812_v36  ;;  %v9127_v26 = vrot.slane %v5733_v18, %v8154_v11 }
 0x1d0   :  { %v3789_v58 = vcombine.high %v3787_v30, %v3787_v30  ;;  %v3803_v32 = vrot.slane %v3787_v30, %v8154_v11  ;;  %v3810_v44 = vrot.slane %v3788_v5, %v8154_v11  ;;  %v3818_v27 = vcombine.high %v3796_v57, %v3796_v57 }
 0x1d1   :  { %v3740_v8 = vcombine.high %v3738_v4, %v3738_v4  ;;  %v3754_v13 = vrot.slane %v3738_v4, %v8154_v11  ;;  %v3761_v24 = vrot.slane %v3739_v19, %v8154_v11  ;;  %v3769_v61 = vcombine.high %v3747_v38, %v3747_v38 }
 0x1d2   :  { %v3817_v7 = vrot.slane %v3789_v58, %v8154_v11  ;;  %v3819_v40 = vcombine.high %v3803_v32, %v3803_v32  ;;  %v3820_v20 = vcombine.high %v3810_v44, %v3810_v44  ;;  %v4657_v33 = vmax.f32 %v4595_v50, %v3747_v38  ;;  %7771 = vmatpush3.bf16.msra.mxu1 %v7770_v23 }
 0x1d3   :  { %v3768_v2 = vrot.slane %v3740_v8, %v8154_v11  ;;  %v3771_v55 = vcombine.high %v3761_v24, %v3761_v24  ;;  %v4596_v35 = vmax.f32 %v3761_v24, %v3769_v61  ;;  %7736 = vmatprep.subr.mxu1 %v7814_v21  ;;  %v3770_v45 = vcombine.high %v3754_v13, %v3754_v13 }
 0x1d4   :  { %v3821_v48 = vcombine.high %v3817_v7, %v3817_v7  ;;  %v4599_v28 = vmax.f32 %v3818_v27, %v3820_v20  ;;  %v4600_v54 = vmax.f32 %v3817_v7, %v3819_v40  ;;  %v4719_v14 = vmax.f32 %v4657_v33, 0.0 }
 0x1d5   :  { %v3772_v9 = vcombine.high %v3768_v2, %v3768_v2  ;;  %v4597_v15 = vmax.f32 %v3754_v13, %v3768_v2  ;;  %v4658_v53 = vmax.f32 %v4596_v35, %v3771_v55 }
 0x1d6   :  { %v4661_v34 = vmax.f32 %v4599_v28, %v3803_v32  ;;  %v9111_v36 = vmax.f32 %v4600_v54, %v3821_v48  ;;  %v5306_v63 = vcombine.low %v8994_v16, %v4719_v14  ;;  %v4970_v39 = vrot.slane %v4719_v14, %v8154_v11  ;;  %7737 = vmatpush3.msk.msra.mxu1 %vm6709_vm10, %v6354_v56 }
 0x1d7   :  { %v4598_v42 = vmax.f32 %v3772_v9, %v3796_v57  ;;  %v4659_v3 = vmax.f32 %v4597_v15, %v3770_v45  ;;  %v9115_v17 = vmax.f32 %v4658_v53, 0.0 }
 0x1d8   :  { %v9118_v59 = vmax.f32 %v4661_v34, 0.0  ;;  %v9121_v41 = vrot.slane %v5306_v63, %v8154_v11  ;;  %v9130_v16 = vcombine.low %v9009_v43, %v4970_v39  ;;  %v4724_v38 = vmax.f32 %v9111_v36, 0.0 }
 0x1d9   :  { %v7708_v6 = vpop.f32.mrb[12].mxu0  ;;  %v9132_v30 = vmax.f32 %v4659_v3, 0.0  ;;  %v5576_v5 = vcombine.low %v4719_v14, %v9115_v17  ;;  %v5320_v4 = vrot.slane %v9115_v17, %v8154_v11  ;;  %v4660_v37 = vmax.f32 %v4598_v42, %v3810_v44 }
 0x1da   :  { %v3157_v57 = vadd.f32 %v7708_v6, %v8793_v47  ;;  %v3151_v50 = vpop.f32.mrb[13].mxu0  ;;  %v5734_v25 = vcombine.low %v9028_v51, %v9121_v41 }
 0x1db   :  { %v3152_v19 = vadd.f32 %v8793_v47, %v3151_v50  ;;  %v5321_v58 = vcombine.low %v9121_v41, %v5320_v4  ;;  %v5583_v32 = vrot.slane %v5576_v5, %v8154_v11  ;;  %v5590_v13 = vrot.slane %v9132_v30, %v8154_v11 }
 0x1dc   :  { %v3871_v18 = vcombine.high %v3157_v57, %v3157_v57  ;;  %v3878_v23 = vrot.slane %v3157_v57, %v8154_v11  ;;  %v9148_v24 = vmax.f32 %v4660_v37, 0.0  ;;  %v5750_v4 = vcombine.low %v9115_v17, %v9132_v30 }
 0x1dd   :  { %v3822_v27 = vcombine.high %v3152_v19, %v3152_v19  ;;  %v3829_v8 = vrot.slane %v3152_v19, %v8154_v11  ;;  %v5328_v7 = vrot.slane %v5321_v58, %v8154_v11  ;;  %v5875_v2 = vcombine.low %v9009_v43, %v5583_v32 }
 0x1de   :  { %v3885_v44 = vrot.slane %v3871_v18, %v8154_v11  ;;  %v3886_v61 = vcombine.high %v3878_v23, %v3878_v23  ;;  %v3894_v51 = vrot.slane %v3878_v23, %v8154_v11  ;;  %v5591_v41 = vcombine.low %v5583_v32, %v5590_v13 }
 0x1df   :  { %v3836_v40 = vrot.slane %v3822_v27, %v8154_v11  ;;  %v3837_v20 = vcombine.high %v3829_v8, %v3829_v8  ;;  %v3845_v33 = vrot.slane %v3829_v8, %v8154_v11  ;;  %5505 = vrot.lane.b32.xlu0 %v5328_v7, %s7808_s20  ;;  %v5882_v6 = vrot.slane %v5875_v2, %v8154_v11 }
 0x1e0   :  { %v3887_v55 = vcombine.high %v3885_v44, %v3885_v44  ;;  %v3901_v35 = vrot.slane %v3885_v44, %v8154_v11  ;;  %v3908_v48 = vrot.slane %v3886_v61, %v8154_v11  ;;  %v3916_v28 = vcombine.high %v3894_v51, %v3894_v51 }
 0x1e1   :  { %v3838_v54 = vcombine.high %v3836_v40, %v3836_v40  ;;  %v3852_v14 = vrot.slane %v3836_v40, %v8154_v11  ;;  %v3859_v56 = vrot.slane %v3837_v20, %v8154_v11  ;;  %v3867_v45 = vcombine.high %v3845_v33, %v3845_v33 }
 0x1e2   :  { %v9162_v9 = vrot.slane %v3887_v55, %v8154_v11  ;;  %v3917_v15 = vcombine.high %v3901_v35, %v3901_v35  ;;  %v3918_v53 = vcombine.high %v3908_v48, %v3908_v48  ;;  %v4604_v43 = vmax.f32 %v3908_v48, %v3916_v28 }
 0x1e3   :  { %v3866_v34 = vrot.slane %v3838_v54, %v8154_v11  ;;  %v3868_v36 = vcombine.high %v3852_v14, %v3852_v14  ;;  %v3869_v63 = vcombine.high %v3859_v56, %v3859_v56  ;;  %v4601_v39 = vmax.f32 %v3845_v33, %v3859_v56  ;;  %5503 = vrot.lane.b32.xlu0 %v5305_v22, %s7808_s20 }
 0x1e4   :  { %v4605_v42 = vmax.f32 %v3901_v35, %v9162_v9  ;;  %v4666_v3 = vmax.f32 %v4604_v43, %v3918_v53  ;;  %v5898_v19 = vrot.slane %v9118_v59, %v8154_v11  ;;  %v5883_v18 = vcombine.low %v9065_v29, %v5882_v6 }
 0x1e5   :  { %v3870_v5 = vcombine.high %v3866_v34, %v3866_v34  ;;  %v4602_v57 = vmax.f32 %v3869_v63, %v3852_v14  ;;  %v4663_v50 = vmax.f32 %v4601_v39, %v3867_v45  ;;  %v5598_v23 = vrot.slane %v5591_v41, %v8154_v11 }
 0x1e6   :  { %v9175_v37 = vmax.f32 %v4605_v42, %v3917_v15  ;;  %v5757_v46 = vrot.slane %v5750_v4, %v8154_v11  ;;  %v4728_v22 = vmax.f32 %v4666_v3, 0.0  ;;  %5945 = vrot.lane.b32.xlu1 %v5883_v18, %s7811_s21  ;;  %v5764_v17 = vrot.slane %v9148_v24, %v8154_v11 }
 0x1e7   :  { %v4603_v58 = vmax.f32 %v3868_v36, %v3870_v5  ;;  %v4664_v27 = vmax.f32 %v4602_v57, %v3866_v34  ;;  %v4725_v10 = vmax.f32 %v4663_v50, 0.0  ;;  %5679 = vrot.lane.b32.xlu0 %v5598_v23, %s7809_s15  ;;  %v5748_v8 = vrot.slane %v5734_v25, %v8154_v11 }
 0x1e8   :  { %v4729_v32 = vmax.f32 %v9175_v37, 0.0  ;;  %v5765_v20 = vcombine.low %v5757_v46, %v5764_v17  ;;  %v3919_v2 = vcombine.high %v9162_v9, %v9162_v9 }
 0x1e9   :  { %v7711_v59 = vpop.f32.mrb[14].mxu0  ;;  %v4665_v13 = vmax.f32 %v4603_v58, %v3894_v51  ;;  %v4726_v44 = vmax.f32 %v4664_v27, 0.0  ;;  %v9186_v61 = vcombine.low %v4724_v38, %v4725_v10  ;;  %v5749_v55 = vcombine.low %v9127_v26, %v5748_v8 }
 0x1ea   :  { %v3167_v7 = vadd.f32 %v7711_v59, %v8793_v47  ;;  %v3161_v40 = vpop.f32.mrb[15].mxu0  ;;  %v4981_v35 = vcombine.low %v4728_v22, %v4729_v32  ;;  %v5772_v38 = vrot.slane %v5765_v20, %v8154_v11 }
 0x1eb   :  { %v3162_v33 = vadd.f32 %v8793_v47, %v3161_v40  ;;  %v4727_v48 = vmax.f32 %v4665_v13, 0.0  ;;  %5851 = vrot.lane.b32.xlu0 %v5749_v55, %s7810_s16  ;;  %v5884_v47 = vcombine.low %v9132_v30, %v9148_v24  ;;  %v5329_v56 = vcombine.low %v4725_v10, %v4726_v44 }
 0x1ec   :  { %v3969_v25 = vcombine.high %v3167_v7, %v3167_v7  ;;  %v3976_v51 = vrot.slane %v3167_v7, %v8154_v11  ;;  %5853 = vrot.lane.b32.xlu1 %v5772_v38, %s7810_s16 }
 0x1ed   :  { %v3920_v28 = vcombine.high %v3162_v33, %v3162_v33  ;;  %v3927_v54 = vrot.slane %v3162_v33, %v8154_v11  ;;  %v4980_v14 = vcombine.low %v4726_v44, %v4727_v48  ;;  %v5330_v26 = vcombine.low %v4727_v48, %v4728_v22 }
 0x1ee   :  { %v3983_v45 = vrot.slane %v3969_v25, %v8154_v11  ;;  %v3984_v9 = vcombine.high %v3976_v51, %v3976_v51  ;;  %v3992_v15 = vrot.slane %v3976_v51, %v8154_v11  ;;  %v5891_v30 = vrot.slane %v5884_v47, %v8154_v11 }
 0x1ef   :  { %v3934_v53 = vrot.slane %v3920_v28, %v8154_v11  ;;  %v3935_v43 = vcombine.high %v3927_v54, %v3927_v54  ;;  %v3943_v63 = vrot.slane %v3927_v54, %v8154_v11  ;;  %v5339_v13 = vrot.slane %v5329_v56, %v8154_v11 }
 0x1f0   :  { %v3985_v34 = vcombine.high %v3983_v45, %v3983_v45  ;;  %v3999_v36 = vrot.slane %v3983_v45, %v8154_v11  ;;  %v4006_v24 = vrot.slane %v3984_v9, %v8154_v11  ;;  %v4014_v39 = vcombine.high %v3992_v15, %v3992_v15  ;;  %v9233_v9 = vld [vmem:[%s9852_s1 + $0x18] ss:$0 sm:$0xff] }
 0x1f1   :  { %v3936_v42 = vcombine.high %v3934_v53, %v3934_v53  ;;  %v3950_v3 = vrot.slane %v3934_v53, %v8154_v11  ;;  %v3957_v5 = vrot.slane %v3935_v43, %v8154_v11  ;;  %v3965_v57 = vcombine.high %v3943_v63, %v3943_v63 }
 0x1f2   :  { %v4013_v6 = vrot.slane %v3985_v34, %v8154_v11  ;;  %v4015_v41 = vcombine.high %v3999_v36, %v3999_v36  ;;  %v4016_v50 = vcombine.high %v4006_v24, %v4006_v24  ;;  %v4609_v4 = vmax.f32 %v3992_v15, %v4006_v24 }
 0x1f3   :  { %v3964_v18 = vrot.slane %v3936_v42, %v8154_v11  ;;  %v3966_v23 = vcombine.high %v3950_v3, %v3950_v3  ;;  %v3967_v58 = vcombine.high %v3957_v5, %v3957_v5  ;;  %v4606_v27 = vmax.f32 %v3919_v2, %v3943_v63 }
 0x1f4   :  { %v5899_v10 = vcombine.low %v5891_v30, %v5898_v19  ;;  %v4017_v46 = vcombine.high %v4013_v6, %v4013_v6  ;;  %v4610_v22 = vmax.f32 %v4016_v50, %v3999_v36  ;;  %v4671_v17 = vmax.f32 %v4609_v4, %v4014_v39 }
 0x1f5   :  { %v3968_v59 = vcombine.high %v3964_v18, %v3964_v18  ;;  %v4608_v8 = vmax.f32 %v3964_v18, %v3966_v23  ;;  %v4607_v44 = vmax.f32 %v3965_v57, %v3967_v58  ;;  %v4668_v7 = vmax.f32 %v4606_v27, %v3957_v5 }
 0x1f6   :  { %v5906_v40 = vrot.slane %v5899_v10, %v8154_v11  ;;  %v4672_v20 = vmax.f32 %v4610_v22, %v4013_v6  ;;  %v4611_v55 = vmax.f32 %v4015_v41, %v4017_v46  ;;  %v9216_v48 = vrot.slane %v5330_v26, %v8154_v11 }
 0x1f7   :  { %v4670_v33 = vmax.f32 %v4608_v8, %v3968_v59  ;;  %v4669_v25 = vmax.f32 %v4607_v44, %v3950_v3  ;;  %v4730_v2 = vmax.f32 %v4668_v7, 0.0  ;;  %v9220_v19 = vrot.slane %v4980_v14, %v8154_v11 }
 0x1f8   :  { %5947 = vrot.lane.b32.xlu1 %v5906_v40, %s7811_s21  ;;  %v9223_v51 = vrot.slane %v4981_v35, %v8154_v11  ;;  %v4733_v38 = vmax.f32 %v4671_v17, 0.0  ;;  %v9225_v28 = vmax.f32 %v4672_v20, 0.0  ;;  %v5361_v56 = vcombine.low %v5339_v13, %v9216_v48 }
 0x1f9   :  { %v4732_v54 = vmax.f32 %v4670_v33, 0.0  ;;  %v7714_v47 = vpop.f32.mrb[16].mxu0  ;;  %v4731_v45 = vmax.f32 %v4669_v25, 0.0  ;;  %v5331_v26 = vcombine.low %v4729_v32, %v4730_v2 }
 0x1fa   :  { %v3177_v14 = vadd.f32 %v9233_v9, %v7714_v47  ;;  %v3171_v35 = vpop.f32.mrb[17].mxu0  ;;  %v5599_v15 = vcombine.low %v9220_v19, %v9223_v51  ;;  %v5378_v53 = vcombine.low %v4733_v38, %v9225_v28  ;;  %v5369_v36 = vrot.slane %v5361_v56, %v8154_v11 }
 0x1fb   :  { %v5028_v43 = vcombine.low %v4732_v54, %v4733_v38  ;;  %v3172_v34 = vadd.f32 %v9233_v9, %v3171_v35  ;;  %v4982_v37 = vcombine.low %v4730_v2, %v4731_v45  ;;  %v5332_v32 = vcombine.low %v4731_v45, %v4732_v54 }
 0x1fc   :  { %v9242_v63 = vrot.slane %v5331_v26, %v8154_v11  ;;  %v4067_v30 = vcombine.high %v3177_v14, %v3177_v14  ;;  %v9245_v24 = vrot.slane %v5378_v53, %v8154_v11  ;;  %v4074_v39 = vrot.slane %v3177_v14, %v8154_v11 }
 0x1fd   :  { %v4018_v42 = vcombine.high %v3172_v34, %v3172_v34  ;;  %v4025_v3 = vrot.slane %v3172_v34, %v8154_v11  ;;  %v9250_v6 = vrot.slane %v4982_v37, %v8154_v11  ;;  %v5360_v41 = vrot.slane %v5332_v32, %v8154_v11 }
 0x1fe   :  { %v4081_v5 = vrot.slane %v4067_v30, %v8154_v11  ;;  %v9255_v57 = vrot.slane %v5028_v43, %v8154_v11  ;;  %v4082_v50 = vcombine.high %v4074_v39, %v4074_v39  ;;  %v4090_v4 = vrot.slane %v4074_v39, %v8154_v11 }
 0x1ff   :  { %v4032_v18 = vrot.slane %v4018_v42, %v8154_v11  ;;  %v4033_v23 = vcombine.high %v4025_v3, %v4025_v3  ;;  %v4041_v10 = vrot.slane %v4025_v3, %v8154_v11  ;;  %v5362_v46 = vcombine.low %v9242_v63, %v5360_v41 }
 0x200   :  { %v4083_v58 = vcombine.high %v4081_v5, %v4081_v5  ;;  %v4097_v27 = vrot.slane %v4081_v5, %v8154_v11  ;;  %v4104_v22 = vrot.slane %v4082_v50, %v8154_v11  ;;  %v4112_v17 = vcombine.high %v4090_v4, %v4090_v4 }
 0x201   :  { %v4034_v59 = vcombine.high %v4032_v18, %v4032_v18  ;;  %v4048_v8 = vrot.slane %v4032_v18, %v8154_v11  ;;  %v4055_v7 = vrot.slane %v4033_v23, %v8154_v11  ;;  %v4063_v40 = vcombine.high %v4041_v10, %v4041_v10 }
 0x202   :  { %v4111_v13 = vrot.slane %v4083_v58, %v8154_v11  ;;  %v4113_v44 = vcombine.high %v4097_v27, %v4097_v27  ;;  %v4114_v20 = vcombine.high %v4104_v22, %v4104_v22  ;;  %v4673_v2 = vmax.f32 %v4611_v55, %v4041_v10 }
 0x203   :  { %v4062_v33 = vrot.slane %v4034_v59, %v8154_v11  ;;  %v4064_v25 = vcombine.high %v4048_v8, %v4048_v8  ;;  %v4065_v47 = vcombine.high %v4055_v7, %v4055_v7  ;;  %v4612_v56 = vmax.f32 %v4055_v7, %v4063_v40 }
 0x204   :  { %v4115_v38 = vcombine.high %v4111_v13, %v4111_v13  ;;  %v4616_v54 = vmax.f32 %v4111_v13, %v4113_v44  ;;  %v4615_v45 = vmax.f32 %v4112_v17, %v4114_v20  ;;  %v4735_v35 = vmax.f32 %v4673_v2, 0.0 }
 0x205   :  { %v4066_v26 = vcombine.high %v4062_v33, %v4062_v33  ;;  %v4613_v14 = vmax.f32 %v4048_v8, %v4062_v33  ;;  %v4674_v43 = vmax.f32 %v4612_v56, %v4065_v47  ;;  %v5376_v34 = vrot.slane %v5362_v46, %v8154_v11 }
 0x206   :  { %v9267_v53 = vmax.f32 %v4616_v54, %v4115_v38  ;;  %v5600_v37 = vcombine.low %v9250_v6, %v9255_v57  ;;  %v4677_v32 = vmax.f32 %v4615_v45, %v4097_v27  ;;  %v5029_v55 = vcombine.low %v9225_v28, %v4735_v35 }
 0x207   :  { %v4614_v30 = vmax.f32 %v4066_v26, %v4090_v4  ;;  %v4675_v39 = vmax.f32 %v4613_v14, %v4064_v25  ;;  %v4736_v3 = vmax.f32 %v4674_v43, 0.0  ;;  %v5377_v5 = vcombine.low %v5369_v36, %v5376_v34 }
 0x208   :  { %v4740_v42 = vmax.f32 %v9267_v53, 0.0  ;;  %v5607_v50 = vrot.slane %v5599_v15, %v8154_v11  ;;  %v9275_v18 = vmax.f32 %v4677_v32, 0.0  ;;  %v9278_v10 = vrot.slane %v5029_v55, %v8154_v11 }
 0x209   :  { %v4676_v23 = vmax.f32 %v4614_v30, %v4104_v22  ;;  %v4737_v58 = vmax.f32 %v4675_v39, 0.0  ;;  %v5379_v46 = vcombine.low %v4735_v35, %v4736_v3  ;;  %5507 = vrot.lane.b32.xlu0 %v5377_v5, %s7808_s20  ;;  %v5614_v4 = vrot.slane %v5600_v37, %v8154_v11 }
 0x20a   :  { %v5773_v28 = vcombine.low %v9216_v48, %v9242_v63  ;;  %v5774_v27 = vcombine.low %v5360_v41, %v9245_v24  ;;  %v5381_v15 = vcombine.low %v9275_v18, %v4740_v42  ;;  %v5012_v22 = vcombine.low %v9223_v51, %v9250_v6 }
 0x20b   :  { %v9288_v36 = vmax.f32 %v4676_v23, 0.0  ;;  %v9293_v17 = vrot.slane %v5379_v46, %v8154_v11  ;;  %v5615_v59 = vcombine.low %v5607_v50, %v5614_v4  ;;  %v7717_v48 = vpop.f32.mrb[18].mxu0  ;;  %v9300_v41 = vcombine.low %v4736_v3, %v4737_v58 }
 0x20c   :  { %v5781_v8 = vrot.slane %v5773_v28, %v8154_v11  ;;  %v5788_v13 = vrot.slane %v5774_v27, %v8154_v11  ;;  %v9298_v63 = vrot.slane %v5381_v15, %v8154_v11  ;;  %v3187_v7 = vadd.f32 %v9233_v9, %v7717_v48  ;;  %v3181_v51 = vpop.f32.mrb[19].mxu0 }
 0x20d   :  { %v5380_v44 = vcombine.low %v4737_v58, %v9288_v36  ;;  %5681 = vrot.lane.b32.xlu1 %v5615_v59, %s7809_s15  ;;  %v3182_v40 = vadd.f32 %v9233_v9, %v3181_v51  ;;  %v5060_v20 = vcombine.low %v9255_v57, %v9278_v10  ;;  %v5410_v33 = vcombine.low %v9245_v24, %v9293_v17 }
 0x20e   :  { %v5789_v6 = vcombine.low %v5781_v8, %v5788_v13  ;;  %v4165_v25 = vcombine.high %v3187_v7, %v3187_v7  ;;  %v4172_v2 = vrot.slane %v3187_v7, %v8154_v11  ;;  %v5031_v54 = vcombine.low %v9288_v36, %v9275_v18 }
 0x20f   :  { %v9312_v38 = vrot.slane %v5380_v44, %v8154_v11  ;;  %v4116_v47 = vcombine.high %v3182_v40, %v3182_v40  ;;  %v4123_v56 = vrot.slane %v3182_v40, %v8154_v11  ;;  %v9318_v45 = vrot.slane %v5012_v22, %v8154_v11 }
 0x210   :  { %v9321_v57 = vrot.slane %v5060_v20, %v8154_v11  ;;  %v4179_v24 = vrot.slane %v4165_v25, %v8154_v11  ;;  %v4180_v26 = vcombine.high %v4172_v2, %v4172_v2  ;;  %v4188_v14 = vrot.slane %v4172_v2, %v8154_v11 }
 0x211   :  { %v5411_v35 = vcombine.low %v9312_v38, %v9298_v63  ;;  %5855 = vrot.lane.b32.xlu1 %v5789_v6, %s7810_s16  ;;  %v4130_v43 = vrot.slane %v4116_v47, %v8154_v11  ;;  %v4131_v34 = vcombine.high %v4123_v56, %v4123_v56  ;;  %v4139_v37 = vrot.slane %v4123_v56, %v8154_v11 }
 0x212   :  { %v5907_v32 = vcombine.low %v9318_v45, %v9321_v57  ;;  %v4181_v30 = vcombine.high %v4179_v24, %v4179_v24  ;;  %v4195_v39 = vrot.slane %v4179_v24, %v8154_v11  ;;  %v4202_v55 = vrot.slane %v4180_v26, %v8154_v11  ;;  %v5500_v58 = vpop.permute.xlu0 %5499 }
 0x213   :  { %v4210_v3 = vcombine.high %v4188_v14, %v4188_v14  ;;  %v4132_v5 = vcombine.high %v4130_v43, %v4130_v43  ;;  %v4146_v50 = vrot.slane %v4130_v43, %v8154_v11  ;;  %v4153_v23 = vrot.slane %v4131_v34, %v8154_v11 }
 0x214   :  { %v9337_v46 = vrot.slane %v5410_v33, %v8154_v11  ;;  %v9340_v4 = vrot.slane %v4181_v30, %v8154_v11  ;;  %v4212_v28 = vcombine.high %v4202_v55, %v4202_v55  ;;  %v4161_v15 = vcombine.high %v4139_v37, %v4139_v37 }
 0x215   :  { %v4620_v27 = vmax.f32 %v4202_v55, %v4210_v3  ;;  %v4211_v22 = vcombine.high %v4195_v39, %v4195_v39  ;;  %v4160_v59 = vrot.slane %v4132_v5, %v8154_v11  ;;  %v4163_v8 = vcombine.high %v4153_v23, %v4153_v23  ;;  %5949 = vrot.lane.b32.xlu1 %v5907_v32, %s7811_s21 }
 0x216   :  { %v4617_v13 = vmax.f32 %v4139_v37, %v4153_v23  ;;  %v4621_v48 = vmax.f32 %v4195_v39, %v9340_v4  ;;  %v4162_v7 = vcombine.high %v4146_v50, %v4146_v50  ;;  %v5966_v51 = vsel %vm5965_vm11, %v9048_v31, %v5500_v58 }
 0x217   :  { %v4682_v44 = vmax.f32 %v4620_v27, %v4212_v28  ;;  %v7720_v6 = vpop.f32.mrb[20].mxu0  ;;  %v4164_v40 = vcombine.high %v4160_v59, %v4160_v59  ;;  %v4618_v20 = vmax.f32 %v4163_v8, %v4146_v50  ;;  %v4213_v26 = vcombine.high %v9340_v4, %v9340_v4 }
 0x218   :  { %v4679_v33 = vmax.f32 %v4617_v13, %v4161_v15  ;;  %v3197_v25 = vadd.f32 %v9233_v9, %v7720_v6  ;;  %v3191_v2 = vpop.f32.mrb[21].mxu0  ;;  %v9348_v47 = vmax.f32 %v4621_v48, %v4211_v22  ;;  %v5425_v27 = vrot.slane %v5411_v35, %v8154_v11 }
 0x219   :  { %v4744_v56 = vmax.f32 %v4682_v44, 0.0  ;;  %v3192_v24 = vadd.f32 %v9233_v9, %v3191_v2  ;;  %v4619_v43 = vmax.f32 %v4162_v7, %v4164_v40  ;;  %v4680_v34 = vmax.f32 %v4618_v20, %v4160_v59  ;;  %v5674_v40 = vpop.permute.xlu1 %5673 }
 0x21a   :  { %v4741_v37 = vmax.f32 %v4679_v33, 0.0  ;;  %v4263_v32 = vcombine.high %v3197_v25, %v3197_v25  ;;  %v4745_v31 = vmax.f32 %v9348_v47, 0.0  ;;  %v4270_v30 = vrot.slane %v3197_v25, %v8154_v11 }
 0x21b   :  { %v4214_v39 = vcombine.high %v3192_v24, %v3192_v24  ;;  %v4221_v55 = vrot.slane %v3192_v24, %v8154_v11  ;;  %v4681_v3 = vmax.f32 %v4619_v43, %v4188_v14  ;;  %v9356_v5 = vmax.f32 %v4680_v34, 0.0 }
 0x21c   :  { %v5077_v50 = vcombine.low %v4740_v42, %v4741_v37  ;;  %v4277_v23 = vrot.slane %v4263_v32, %v8154_v11  ;;  %v4278_v58 = vcombine.high %v4270_v30, %v4270_v30  ;;  %v4286_v4 = vrot.slane %v4270_v30, %v8154_v11 }
 0x21d   :  { %v4228_v28 = vrot.slane %v4214_v39, %v8154_v11  ;;  %v7723_v15 = vpop.f32.mrb[22].mxu0  ;;  %v9366_v22 = vcombine.low %v4744_v56, %v4745_v31  ;;  %v9368_v14 = vmax.f32 %v4681_v3, 0.0  ;;  %v5427_v59 = vcombine.low %v4741_v37, %v9356_v5 }
 0x21e   :  { %v4279_v53 = vcombine.high %v4277_v23, %v4277_v23  ;;  %v3201_v42 = vpop.f32.mrb[23].mxu0  ;;  %v9372_v8 = vrot.slane %v5077_v50, %v8154_v11  ;;  %v9375_v13 = vrot.slane %v4277_v23, %v8154_v11  ;;  %v4300_v48 = vrot.slane %v4278_v58, %v8154_v11  ;;  %v5848_v32 = vpop.permute.xlu0 %5847 }
 0x21f   :  { %v4229_v35 = vcombine.high %v4221_v55, %v4221_v55  ;;  %v5078_v44 = vcombine.low %v9356_v5, %v9368_v14  ;;  %v9381_v7 = vcombine.low %v9368_v14, %v4744_v56  ;;  %v9384_v6 = vrot.slane %v5427_v59, %v8154_v11 }
 0x220   :  { %v4308_v20 = vcombine.high %v4286_v4, %v4286_v4  ;;  %v9387_v33 = vrot.slane %v4279_v53, %v8154_v11  ;;  %v4310_v25 = vcombine.high %v4300_v48, %v4300_v48  ;;  %v4625_v2 = vmax.f32 %v4286_v4, %v4300_v48 }
 0x221   :  { %v4230_v24 = vcombine.high %v4228_v28, %v4228_v28  ;;  %v4237_v43 = vrot.slane %v4221_v55, %v8154_v11  ;;  %v4244_v34 = vrot.slane %v4228_v28, %v8154_v11  ;;  %v4251_v37 = vrot.slane %v4229_v35, %v8154_v11 }
 0x222   :  { %v5426_v56 = vcombine.low %v9337_v46, %v5425_v27  ;;  %v4626_v30 = vmax.f32 %v4310_v25, %v9375_v13  ;;  %v4687_v39 = vmax.f32 %v4625_v2, %v4308_v20  ;;  %v5974_v50 = vsel %vm2973_vm8, %v5966_v51, %v5674_v40  ;;  %v5942_v55 = vpop.permute.xlu1 %5941 }
 0x223   :  { %v4258_v3 = vrot.slane %v4230_v24, %v8154_v11  ;;  %v4259_v23 = vcombine.high %v4237_v43, %v4237_v43  ;;  %v4260_v58 = vcombine.high %v4244_v34, %v4244_v34  ;;  %v4261_v4 = vcombine.high %v4251_v37, %v4251_v37 }
 0x224   :  { %v4622_v59 = vmax.f32 %v4213_v26, %v4237_v43  ;;  %5509 = vrot.lane.b32.xlu0 %v5426_v56, %s7808_s20  ;;  %v4688_v28 = vmax.f32 %v4626_v30, %v9387_v33  ;;  %v4749_v53 = vmax.f32 %v4687_v39, 0.0  ;;  %v5983_v46 = vsel %vm5982_vm12, %v5974_v50, %v5848_v32 }
 0x225   :  { %v4262_v48 = vcombine.high %v4258_v3, %v4258_v3  ;;  %v4623_v27 = vmax.f32 %v4259_v23, %v4261_v4  ;;  %v4624_v35 = vmax.f32 %v4258_v3, %v4260_v58  ;;  %v5992_v25 = vsel %vm5991_vm13, %v5983_v46, %v5942_v55 }
 0x226   :  { %v4684_v20 = vmax.f32 %v4622_v59, %v4251_v37  ;;  %v9400_v2 = vmax.f32 %v4688_v28, 0.0  ;;  %v6008_v51 = vcombine.high %v5992_v25, %v5992_v25  ;;  %v6015_v40 = vrot.slane %v5992_v25, %v8154_v11 }
 0x227   :  { %v3207_v26 = vadd.f32 %v9233_v9, %v7723_v15  ;;  %v4309_v24 = vcombine.high %v9375_v13, %v9375_v13  ;;  %v4685_v43 = vmax.f32 %v4623_v27, %v4244_v34  ;;  %v4686_v56 = vmax.f32 %v4624_v35, %v4262_v48 }
 0x228   :  { %v4746_v30 = vmax.f32 %v4684_v20, 0.0  ;;  %v5476_v32 = vcombine.low %v4749_v53, %v9400_v2  ;;  %v6022_v39 = vrot.slane %v6008_v51, %v8154_v11  ;;  %v6023_v37 = vcombine.high %v6015_v40, %v6015_v40 }
 0x229   :  { %v3202_v3 = vadd.f32 %v9233_v9, %v3201_v42  ;;  %v4747_v50 = vmax.f32 %v4685_v43, 0.0  ;;  %v4748_v23 = vmax.f32 %v4686_v56, 0.0  ;;  %v9412_v15 = vrot.slane %v3207_v26, %v8154_v11 }
 0x22a   :  { %v5429_v58 = vcombine.low %v4745_v31, %v4746_v30  ;;  %v9415_v13 = vrot.slane %v5476_v32, %v8154_v11  ;;  %v6024_v34 = vcombine.high %v6022_v39, %v6022_v39  ;;  %v6031_v4 = vrot.slane %v6015_v40, %v8154_v11 }
 0x22b   :  { %v6045_v59 = vrot.slane %v6023_v37, %v8154_v11  ;;  %v5080_v55 = vcombine.low %v4746_v30, %v4747_v50  ;;  %v9419_v28 = vcombine.low %v4748_v23, %v4749_v53  ;;  %v5430_v9 = vcombine.low %v4747_v50, %v4748_v23 }
 0x22c   :  { %v6038_v42 = vrot.slane %v6022_v39, %v8154_v11  ;;  %v9423_v47 = vrot.slane %v5429_v58, %v8154_v11  ;;  %v6052_v31 = vrot.slane %v6024_v34, %v8154_v11  ;;  %v4368_v53 = vcombine.high %v9412_v15, %v9412_v15 }
 0x22d   :  { %v6360_v48 = vcombine.low %v6031_v4, %v6045_v59  ;;  %v7625_v46 = vcombine.high %v6031_v4, %v6045_v59  ;;  %v9427_v27 = vrot.slane %v5080_v55, %v8154_v11  ;;  %v9430_v35 = vrot.slane %v5430_v9, %v8154_v11 }
 0x22e   :  { %v4311_v20 = vcombine.high %v9387_v33, %v9387_v33  ;;  %v6362_v25 = vcombine.low %v6038_v42, %v6052_v31  ;;  %v7626_v51 = vcombine.high %v6038_v42, %v6052_v31  ;;  %v4375_v43 = vrot.slane %v9412_v15, %v8154_v11 }
 0x22f   :  { %v9437_v40 = vrot.slane %v6360_v48, %v8154_v11  ;;  %v9440_v26 = vrot.slane %v7625_v46, %v8154_v11  ;;  %v4312_v56 = vcombine.high %v3202_v3, %v3202_v3  ;;  %v4319_v30 = vrot.slane %v3202_v3, %v8154_v11 }
 0x230   :  { %v4627_v32 = vmax.f32 %v4309_v24, %v4311_v20  ;;  %v9446_v39 = vrot.slane %v6362_v25, %v8154_v11  ;;  %v9449_v33 = vrot.slane %v7626_v51, %v8154_v11  ;;  %v5052_v50 = vrot.slane %v9300_v41, %v8154_v11 }
 0x231   :  { %v6392_v37 = vcombine.low %v9437_v40, %v9440_v26  ;;  %v4326_v23 = vrot.slane %v4312_v56, %v8154_v11  ;;  %v4327_v58 = vcombine.high %v4319_v30, %v4319_v30  ;;  %v4335_v15 = vrot.slane %v4319_v30, %v8154_v11 }
 0x232   :  { %v5059_v24 = vrot.slane %v5031_v54, %v8154_v11  ;;  %v5616_v3 = vcombine.low %v9278_v10, %v5052_v50  ;;  %v5790_v34 = vcombine.low %v9293_v17, %v9312_v38  ;;  %v5791_v4 = vcombine.low %v9298_v63, %v9384_v6  ;;  %v5502_v38 = vpop.permute.xlu0 %5501 }
 0x233   :  { %v5094_v41 = vrot.slane %v5078_v44, %v8154_v11  ;;  %v4328_v59 = vcombine.high %v4326_v23, %v4326_v23  ;;  %v4342_v55 = vrot.slane %v4326_v23, %v8154_v11  ;;  %v4349_v9 = vrot.slane %v4327_v58, %v8154_v11 }
 0x234   :  { %v4357_v18 = vcombine.high %v4335_v15, %v4335_v15  ;;  %v4689_v36 = vmax.f32 %v4627_v32, %v4335_v15  ;;  %v5617_v10 = vcombine.low %v5059_v24, %v9372_v8  ;;  %v5624_v54 = vrot.slane %v5616_v3, %v8154_v11 }
 0x235   :  { %v5798_v17 = vrot.slane %v5790_v34, %v8154_v11  ;;  %v4356_v63 = vrot.slane %v4328_v59, %v8154_v11  ;;  %v4358_v42 = vcombine.high %v4342_v55, %v4342_v55  ;;  %v4359_v31 = vcombine.high %v4349_v9, %v4349_v9  ;;  %v5676_v26 = vpop.permute.xlu1 %5675 }
 0x236   :  { %v4628_v5 = vmax.f32 %v4349_v9, %v4357_v18  ;;  %v9476_v14 = vmax.f32 %v4689_v36, 0.0  ;;  %v5631_v44 = vrot.slane %v5617_v10, %v8154_v11  ;;  %v5805_v48 = vrot.slane %v5791_v4, %v8154_v11 }
 0x237   :  { %v5061_v46 = vcombine.low %v5052_v50, %v5059_v24  ;;  %v4360_v20 = vcombine.high %v4356_v63, %v4356_v63  ;;  %v4629_v25 = vmax.f32 %v4342_v55, %v4356_v63  ;;  %v5109_v40 = vcombine.low %v9372_v8, %v5094_v41 }
 0x238   :  { %v4690_v51 = vmax.f32 %v4628_v5, %v4359_v31  ;;  %v5650_v56 = vcombine.low %v9400_v2, %v9476_v14  ;;  %v5632_v30 = vcombine.low %v5624_v54, %v5631_v44  ;;  %v5806_v32 = vcombine.low %v5798_v17, %v5805_v48  ;;  %v5850_v4 = vpop.permute.xlu0 %5849 }
 0x239   :  { %v9484_v23 = vrot.slane %v5061_v46, %v8154_v11  ;;  %v9486_v58 = vmax.f32 %v4360_v20, %v4375_v43  ;;  %v9488_v15 = vmax.f32 %v4629_v25, %v4358_v42  ;;  %v9491_v24 = vrot.slane %v5109_v40, %v8154_v11 }
 0x23a   :  { %v4752_v50 = vmax.f32 %v4690_v51, 0.0  ;;  %5683 = vrot.lane.b32.xlu0 %v5632_v30, %s7809_s15  ;;  %v5967_v8 = vsel %vm5965_vm11, %v4906_v49, %v5502_v38  ;;  %v5444_v3 = vrot.slane %v9381_v7, %v8154_v11  ;;  %v5460_v43 = vcombine.low %v9423_v47, %v9430_v35 }
 0x23b   :  { %v9504_v34 = vrot.slane %v9366_v22, %v8154_v11  ;;  %v9507_v59 = vrot.slane %v4368_v53, %v8154_v11  ;;  %v5908_v1 = vcombine.low %v9484_v23, %v9491_v24  ;;  %v5975_v12 = vsel %vm2973_vm8, %v5967_v8, %v5676_v26 }
 0x23c   :  { %v5824_v55 = vcombine.low %v9476_v14, %v4752_v50  ;;  %v5459_v49 = vcombine.low %v9384_v6, %v5444_v3  ;;  %v5474_v7 = vrot.slane %v5460_v43, %v8154_v11  ;;  %v9517_v9 = vrot.slane %v9419_v28, %v8154_v11  ;;  %v5944_v6 = vpop.permute.xlu1 %5943 }
 0x23d   :  { %v5633_v22 = vcombine.low %v5094_v41, %v9504_v34  ;;  %v4753_v53 = vmax.f32 %v9488_v15, 0.0  ;;  %5951 = vrot.lane.b32.xlu1 %v5908_v1, %s7811_s21  ;;  %v6393_v18 = vcombine.low %v9446_v39, %v9449_v33  ;;  %v6400_v36 = vrot.slane %v6392_v37, %v8154_v11 }
 0x23e   :  { %v5984_v10 = vsel %vm5982_vm12, %v5975_v12, %v5850_v4  ;;  %5857 = vrot.lane.b32.xlu0 %v5806_v32, %s7810_s16  ;;  %v5467_v54 = vrot.slane %v5459_v49, %v8154_v11  ;;  %v5634_v28 = vcombine.low %v9427_v27, %v9517_v9  ;;  %v5807_v33 = vcombine.low %v5444_v3, %v9423_v47 }
 0x23f   :  { %v5641_v41 = vrot.slane %v5633_v22, %v8154_v11  ;;  %v5993_v17 = vsel %vm5991_vm13, %v5984_v10, %v5944_v6  ;;  %v6407_v38 = vrot.slane %v6393_v18, %v8154_v11  ;;  %v5808_v31 = vcombine.low %v9430_v35, %v9415_v13 }
 0x240   :  { %v6057_v63 = vcombine.high %v5993_v17, %v5993_v17  ;;  %v6064_v39 = vrot.slane %v5993_v17, %v8154_v11  ;;  %v5475_v37 = vcombine.low %v5467_v54, %v5474_v7  ;;  %v5648_v42 = vrot.slane %v5634_v28, %v8154_v11 }
 0x241   :  { %v5110_v5 = vcombine.low %v9504_v34, %v9427_v27  ;;  %v5918_v44 = vcombine.low %v4752_v50, %v4753_v53  ;;  %v6408_v48 = vcombine.low %v6400_v36, %v6407_v38  ;;  %v5815_v47 = vrot.slane %v5807_v33, %v8154_v11 }
 0x242   :  { %v6071_v46 = vrot.slane %v6057_v63, %v8154_v11  ;;  %v6072_v20 = vcombine.high %v6064_v39, %v6064_v39  ;;  %5511 = vrot.lane.b32.xlu0 %v5475_v37, %s7808_s20  ;;  %v5649_v25 = vcombine.low %v5641_v41, %v5648_v42  ;;  %v6080_v51 = vrot.slane %v6064_v39, %v8154_v11 }
 0x243   :  { %v5822_v40 = vrot.slane %v5808_v31, %v8154_v11  ;;  %7739 = vmatmul.mubr.msk.f32.vlgmr.msra.gmra.mrb[0].mxu1 %vm6694_vm14, %v6408_v48  ;;  %v5657_v30 = vrot.slane %v5650_v56, %v8154_v11  ;;  %v5490_v15 = vrot.slane %v9476_v14, %v8154_v11  ;;  %v5664_v8 = vrot.slane %v4752_v50, %v8154_v11 }
 0x244   :  { %v6073_v35 = vcombine.high %v6071_v46, %v6071_v46  ;;  %v6087_v26 = vrot.slane %v6071_v46, %v8154_v11  ;;  %v6094_v27 = vrot.slane %v6072_v20, %v8154_v11  ;;  %5685 = vrot.lane.b32.xlu1 %v5649_v25, %s7809_s15  ;;  %v5831_v3 = vrot.slane %v5824_v55, %v8154_v11 }
 0x245   :  { %v5823_v32 = vcombine.low %v5815_v47, %v5822_v40  ;;  %v5909_v1 = vcombine.low %v9517_v9, %v5657_v30  ;;  %7741 = vmatprep.mubr.msk.f32.mxu1 %vm7813_vm9, %v7814_v21  ;;  %v5491_v56 = vcombine.low %v9415_v13, %v5490_v15  ;;  %v5665_v12 = vcombine.low %v5657_v30, %v5664_v8  ;;  %v5678_v40 = vpop.permute.xlu1 %5677 }
 0x246   :  { %v6101_v43 = vrot.slane %v6073_v35, %v8154_v11  ;;  %v6409_v34 = vcombine.low %v6080_v51, %v6094_v27  ;;  %v7627_v4 = vcombine.high %v6080_v51, %v6094_v27  ;;  %v5838_v14 = vrot.slane %v4753_v53, %v8154_v11 }
 0x247   :  { %5859 = vrot.lane.b32.xlu0 %v5823_v32, %s7810_s16  ;;  %v4692_v50 = vmax.f32 %v9486_v58, %v9507_v59  ;;  %v9566_v18 = vrot.slane %v5110_v5, %v8154_v11  ;;  %v5916_v36 = vrot.slane %v5909_v1, %v8154_v11  ;;  %v5498_v10 = vrot.slane %v5491_v56, %v8154_v11 }
 0x248   :  { %v6411_v55 = vcombine.low %v6087_v26, %v6101_v43  ;;  %v7628_v49 = vcombine.high %v6087_v26, %v6101_v43  ;;  %v6419_v7 = vrot.slane %v6409_v34, %v8154_v11  ;;  %v6426_v22 = vrot.slane %v7627_v4, %v8154_v11 }
 0x249   :  { %v5839_v13 = vcombine.low %v5831_v3, %v5838_v14  ;;  %v4754_v58 = vmax.f32 %v4692_v50, 0.0  ;;  %v5917_v59 = vcombine.low %v9566_v18, %v5916_v36  ;;  %v5925_v28 = vrot.slane %v5918_v44, %v8154_v11 }
 0x24a   :  { %v6433_v6 = vrot.slane %v6411_v55, %v8154_v11  ;;  %v6440_v53 = vrot.slane %v7628_v49, %v8154_v11  ;;  %v6441_v54 = vcombine.low %v6419_v7, %v6426_v22  ;;  %v4989_v41 = vrot.slane %v9186_v61, %v8154_v11 }
 0x24b   :  { %5513 = vrot.lane.b32.xlu0 %v5498_v10, %s7808_s20  ;;  %v5932_v17 = vrot.slane %v4754_v58, %v8154_v11  ;;  %v5076_v63 = vcombine.low %v9321_v57, %v9484_v23  ;;  %5953 = vrot.lane.b32.xlu1 %v5917_v59, %s7811_s21  ;;  %v5846_v39 = vrot.slane %v5839_v13, %v8154_v11 }
 0x24c   :  { %v6442_v38 = vcombine.low %v6433_v6, %v6440_v53  ;;  %v5011_v33 = vcombine.low %v4989_v41, %v9220_v19  ;;  %v5125_v37 = vcombine.low %v9491_v24, %v9566_v18  ;;  %v5140_v42 = vrot.slane %v9400_v2, %v8154_v11 }
 0x24d   :  { %v5933_v31 = vcombine.low %v5925_v28, %v5932_v17  ;;  %v6449_v61 = vrot.slane %v6441_v54, %v8154_v11  ;;  %v5672_v44 = vrot.slane %v5665_v12, %v8154_v11  ;;  %v4978_v53 = vrot.slane %v9130_v16, %v8154_v11 }
 0x24e   :  { %v6456_v5 = vrot.slane %v6442_v38, %v8154_v11  ;;  %v5019_v48 = vrot.slane %v5011_v33, %v8154_v11  ;;  %v9593_v46 = vcombine.low %v9517_v9, %v5140_v42 }
 0x24f   :  { %5861 = vrot.lane.b32.xlu0 %v5846_v39, %s7810_s16  ;;  %5687 = vrot.lane.b32.xlu1 %v5672_v44, %s7809_s15  ;;  %v5940_v2 = vrot.slane %v5933_v31, %v8154_v11 }
 0x250   :  { %v6457_v19 = vcombine.low %v6449_v61, %v6456_v5  ;;  %v5027_v20 = vcombine.low %v5019_v48, %v9318_v45 }
 0x251   :  { %v5506_v25 = vpop.permute.xlu0 %5505 }
 0x252   :  { %7742 = vmatmul.mubr.msk.f32.gmra.mrb[2].mxu1 %vm6694_vm14, %v6457_v19  ;;  %v5969_v54 = vsel %vm5965_vm11, %v4978_v53, %v5506_v25 }
 0x253   :  { %7744 = vmatprep.mubr.msk.f32.mxu1 %vm7813_vm9, %v7814_v21  ;;  %5955 = vrot.lane.b32.xlu1 %v5940_v2, %s7811_s21 }
 0x255   :  { %v5504_v51 = vpop.permute.xlu0 %5503 }
 0x256   :  { %v5968_v9 = vsel %vm5965_vm11, %v4955_v0, %v5504_v51 }
 0x257   :  { %v5976_v45 = vsel %vm2973_vm8, %v5968_v9, %v5678_v40 }
 0x258   :  { %v5946_v26 = vpop.permute.xlu1 %5945 }
 0x259   :  { %v5680_v47 = vpop.permute.xlu0 %5679 }
 0x25a   :  { %v5977_v58 = vsel %vm2973_vm8, %v5969_v54, %v5680_v47 }
 0x25d   :  { %v5852_v35 = vpop.permute.xlu0 %5851 }
 0x25e   :  { %v5985_v27 = vsel %vm5982_vm12, %v5976_v45, %v5852_v35  ;;  %v5854_v6 = vpop.permute.xlu1 %5853 }
 0x25f   :  { %v5994_v30 = vsel %vm5991_vm13, %v5985_v27, %v5946_v26  ;;  %v5986_v28 = vsel %vm5982_vm12, %v5977_v58, %v5854_v6 }
 0x260   :  { %v6106_v32 = vcombine.high %v5994_v30, %v5994_v30  ;;  %v6113_v15 = vrot.slane %v5994_v30, %v8154_v11 }
 0x262   :  { %v6120_v8 = vrot.slane %v6106_v32, %v8154_v11  ;;  %v6121_v3 = vcombine.high %v6113_v15, %v6113_v15  ;;  %v6129_v34 = vrot.slane %v6113_v15, %v8154_v11 }
 0x264   :  { %v6122_v43 = vcombine.high %v6120_v8, %v6120_v8  ;;  %v6143_v60 = vrot.slane %v6121_v3, %v8154_v11  ;;  %v6136_v29 = vrot.slane %v6120_v8, %v8154_v11 }
 0x266   :  { %v6150_v0 = vrot.slane %v6122_v43, %v8154_v11  ;;  %v6458_v4 = vcombine.low %v6129_v34, %v6143_v60  ;;  %v7629_v1 = vcombine.high %v6129_v34, %v6143_v60 }
 0x268   :  { %v6460_v56 = vcombine.low %v6136_v29, %v6150_v0  ;;  %v7630_v12 = vcombine.high %v6136_v29, %v6150_v0  ;;  %v6468_v14 = vrot.slane %v6458_v4, %v8154_v11  ;;  %v6475_v50 = vrot.slane %v7629_v1, %v8154_v11 }
 0x26a   :  { %v6482_v55 = vrot.slane %v6460_v56, %v8154_v11  ;;  %v6489_v49 = vrot.slane %v7630_v12, %v8154_v11  ;;  %v6490_v7 = vcombine.low %v6468_v14, %v6475_v50  ;;  %v5948_v59 = vpop.permute.xlu1 %5947 }
 0x26b   :  { %v5995_v41 = vsel %vm5991_vm13, %v5986_v28, %v5948_v59 }
 0x26c   :  { %v6491_v22 = vcombine.low %v6482_v55, %v6489_v49  ;;  %v6498_v36 = vrot.slane %v6490_v7, %v8154_v11  ;;  %v6161_v38 = vrot.slane %v5995_v41, %v8154_v11 }
 0x26e   :  { %v6505_v10 = vrot.slane %v6491_v22, %v8154_v11  ;;  %v6162_v31 = vcombine.high %v6161_v38, %v6161_v38  ;;  %v6169_v44 = vrot.slane %v6161_v38, %v8154_v11 }
 0x270   :  { %v6506_v13 = vcombine.low %v6498_v36, %v6505_v10  ;;  %v6176_v48 = vrot.slane %v6162_v31, %v8154_v11  ;;  %v6177_v40 = vcombine.high %v6169_v44, %v6169_v44 }
 0x272   :  { %7745 = vmatmul.mubr.msk.f32.gmra.mrb[4].mxu1 %vm6694_vm14, %v6506_v13  ;;  %v6507_v9 = vcombine.low %v6169_v44, %v6176_v48 }
 0x273   :  { %7747 = vmatprep.mubr.msk.f32.mxu1 %vm7813_vm9, %v7814_v21 }
 0x274   :  { %v6517_v15 = vrot.slane %v6507_v9, %v8154_v11 }
 0x27b   :  { %v5508_v39 = vpop.permute.xlu0 %5507 }
 0x27c   :  { %v5970_v33 = vsel %vm5965_vm11, %v5027_v20, %v5508_v39 }
 0x27f   :  { %v5682_v17 = vpop.permute.xlu1 %5681 }
 0x280   :  { %v5978_v61 = vsel %vm2973_vm8, %v5970_v33, %v5682_v17 }
 0x283   :  { %v5856_v42 = vpop.permute.xlu1 %5855 }
 0x284   :  { %v5987_v16 = vsel %vm5982_vm12, %v5978_v61, %v5856_v42 }
 0x287   :  { %v5950_v5 = vpop.permute.xlu1 %5949 }
 0x288   :  { %v5996_v19 = vsel %vm5991_vm13, %v5987_v16, %v5950_v5 }
 0x289   :  { %v6178_v2 = vcombine.high %v5996_v19, %v5996_v19  ;;  %v6185_v25 = vrot.slane %v5996_v19, %v8154_v11 }
 0x28b   :  { %v6192_v51 = vrot.slane %v6178_v2, %v8154_v11  ;;  %v6193_v47 = vcombine.high %v6185_v25, %v6185_v25  ;;  %v6201_v20 = vrot.slane %v6185_v25, %v8154_v11 }
 0x28d   :  { %v6215_v45 = vrot.slane %v6193_v47, %v8154_v11  ;;  %v6223_v35 = vcombine.high %v6201_v20, %v6201_v20  ;;  %v6508_v26 = vcombine.low %v6177_v40, %v6201_v20  ;;  %v6208_v27 = vrot.slane %v6192_v51, %v8154_v11 }
 0x28e   :  { %v6194_v14 = vcombine.high %v6192_v51, %v6192_v51  ;;  %v5148_v40 = vrot.slane %v9593_v46, %v8154_v11 }
 0x28f   :  { %v6225_v30 = vcombine.high %v6215_v45, %v6215_v45  ;;  %v6509_v32 = vcombine.low %v6215_v45, %v6223_v35  ;;  %v6524_v8 = vrot.slane %v6508_v26, %v8154_v11  ;;  %v6224_v10 = vcombine.high %v6208_v27, %v6208_v27 }
 0x290   :  { %v6222_v36 = vrot.slane %v6194_v14, %v8154_v11 }
 0x291   :  { %v6510_v3 = vcombine.low %v6225_v30, %v6208_v27  ;;  %v6539_v43 = vcombine.low %v6517_v15, %v6524_v8  ;;  %v6531_v34 = vrot.slane %v6509_v32, %v8154_v11 }
 0x292   :  { %v6556_v59 = vcombine.low %v6222_v36, %v6224_v10 }
 0x293   :  { %v6538_v60 = vrot.slane %v6510_v3, %v8154_v11  ;;  %v6547_v0 = vrot.slane %v6539_v43, %v8154_v11 }
 0x294   :  { %v6566_v16 = vrot.slane %v6556_v59, %v8154_v11 }
 0x295   :  { %v6540_v29 = vcombine.low %v6531_v34, %v6538_v60 }
 0x296   :  { %v5510_v56 = vpop.permute.xlu0 %5509 }
 0x297   :  { %v6554_v4 = vrot.slane %v6540_v29, %v8154_v11  ;;  %v5971_v50 = vsel %vm5965_vm11, %v5076_v63, %v5510_v56  ;;  %v6226_v63 = vcombine.high %v6222_v36, %v6222_v36 }
 0x299   :  { %v6555_v1 = vcombine.low %v6547_v0, %v6554_v4 }
 0x29b   :  { %7748 = vmatmul.mubr.msk.f32.gmra.mrb[6].mxu1 %vm6694_vm14, %v6555_v1 }
 0x29c   :  { %7750 = vmatprep.mubr.msk.f32.mxu1 %vm7813_vm9, %v7814_v21 }
 0x2ac   :  { %v5684_v12 = vpop.permute.xlu0 %5683 }
 0x2ad   :  { %v5979_v49 = vsel %vm2973_vm8, %v5971_v50, %v5684_v12 }
 0x2af   :  { %v5952_v55 = vpop.permute.xlu1 %5951 }
 0x2b0   :  { %v5858_v7 = vpop.permute.xlu0 %5857 }
 0x2b1   :  { %v5988_v22 = vsel %vm5982_vm12, %v5979_v49, %v5858_v7 }
 0x2b2   :  { %v5997_v13 = vsel %vm5991_vm13, %v5988_v22, %v5952_v55 }
 0x2b3   :  { %v6227_v6 = vcombine.high %v5997_v13, %v5997_v13  ;;  %v6234_v53 = vrot.slane %v5997_v13, %v8154_v11 }
 0x2b4   :  { %v5512_v54 = vpop.permute.xlu0 %5511 }
 0x2b5   :  { %v6241_v58 = vrot.slane %v6227_v6, %v8154_v11  ;;  %v6242_v57 = vcombine.high %v6234_v53, %v6234_v53  ;;  %v6250_v23 = vrot.slane %v6234_v53, %v8154_v11  ;;  %v5972_v39 = vsel %vm5965_vm11, %v5125_v37, %v5512_v54 }
 0x2b6   :  { %v5686_v38 = vpop.permute.xlu1 %5685 }
 0x2b7   :  { %v6264_v28 = vrot.slane %v6242_v57, %v8154_v11  ;;  %v6272_v41 = vcombine.high %v6250_v23, %v6250_v23  ;;  %v6557_v17 = vcombine.low %v6226_v63, %v6250_v23  ;;  %v6257_v42 = vrot.slane %v6241_v58, %v8154_v11 }
 0x2b8   :  { %v6243_v5 = vcombine.high %v6241_v58, %v6241_v58  ;;  %v5980_v19 = vsel %vm2973_vm8, %v5972_v39, %v5686_v38 }
 0x2b9   :  { %v5860_v33 = vpop.permute.xlu0 %5859  ;;  %v6274_v31 = vcombine.high %v6264_v28, %v6264_v28  ;;  %v6558_v61 = vcombine.low %v6264_v28, %v6272_v41  ;;  %v6573_v44 = vrot.slane %v6557_v17, %v8154_v11  ;;  %v6273_v47 = vcombine.high %v6257_v42, %v6257_v42 }
 0x2ba   :  { %v5989_v2 = vsel %vm5982_vm12, %v5980_v19, %v5860_v33  ;;  %v6271_v37 = vrot.slane %v6243_v5, %v8154_v11 }
 0x2bb   :  { %v6559_v48 = vcombine.low %v6274_v31, %v6257_v42  ;;  %v6588_v51 = vcombine.low %v6566_v16, %v6573_v44  ;;  %v6580_v24 = vrot.slane %v6558_v61, %v8154_v11 }
 0x2bc   :  { %v6605_v15 = vcombine.low %v6271_v37, %v6273_v47  ;;  %v6275_v60 = vcombine.high %v6271_v37, %v6271_v37 }
 0x2bd   :  { %v5514_v25 = vpop.permute.xlu0 %5513  ;;  %v6587_v18 = vrot.slane %v6559_v48, %v8154_v11  ;;  %v5954_v20 = vpop.permute.xlu1 %5953  ;;  %v6596_v30 = vrot.slane %v6588_v51, %v8154_v11 }
 0x2be   :  { %v5998_v9 = vsel %vm5991_vm13, %v5989_v2, %v5954_v20  ;;  %v5973_v27 = vsel %vm5965_vm11, %v5148_v40, %v5514_v25  ;;  %v6615_v22 = vrot.slane %v6605_v15, %v8154_v11 }
 0x2bf   :  { %v6589_v45 = vcombine.low %v6580_v24, %v6587_v18  ;;  %v6276_v35 = vcombine.high %v5998_v9, %v5998_v9  ;;  %v6283_v26 = vrot.slane %v5998_v9, %v8154_v11  ;;  %v9714_v24 = vld [vmem:[%s9852_s1 + $0x58] ss:$0 sm:$0xff] }
 0x2c1   :  { %v6603_v32 = vrot.slane %v6589_v45, %v8154_v11  ;;  %v6290_v8 = vrot.slane %v6276_v35, %v8154_v11  ;;  %v6291_v3 = vcombine.high %v6283_v26, %v6283_v26  ;;  %v6299_v43 = vrot.slane %v6283_v26, %v8154_v11  ;;  %v5688_v34 = vpop.permute.xlu1 %5687  ;;  %v5862_v46 = vpop.permute.xlu0 %5861 }
 0x2c2   :  { %v5981_v29 = vsel %vm2973_vm8, %v5973_v27, %v5688_v34  ;;  %v7269_v27 = vld [vmem:[%s9852_s1 + $0x60] sm:$0xff] }
 0x2c3   :  { %v6604_v0 = vcombine.low %v6596_v30, %v6603_v32  ;;  %v6292_v4 = vcombine.high %v6290_v8, %v6290_v8  ;;  %v6306_v1 = vrot.slane %v6290_v8, %v8154_v11  ;;  %v6313_v56 = vrot.slane %v6291_v3, %v8154_v11 }
 0x2c4   :  { %v6321_v12 = vcombine.high %v6299_v43, %v6299_v43  ;;  %v6606_v14 = vcombine.low %v6275_v60, %v6299_v43  ;;  %v5990_v50 = vsel %vm5982_vm12, %v5981_v29, %v5862_v46  ;;  %v7281_v3 = vrot.slane %v7269_v27, %v8154_v11 }
 0x2c5   :  { %7751 = vmatmul.mubr.msk.f32.gmra.mrb[8].mxu1 %vm6694_vm14, %v6604_v0  ;;  %v6323_v55 = vcombine.high %v6313_v56, %v6313_v56  ;;  %v5956_v7 = vpop.permute.xlu1 %5955  ;;  %v6320_v36 = vrot.slane %v6292_v4, %v8154_v11  ;;  %v6322_v10 = vcombine.high %v6306_v1, %v6306_v1 }
 0x2c6   :  { %v6607_v49 = vcombine.low %v6313_v56, %v6321_v12  ;;  %7753 = vmatprep.mubr.msk.f32.mxu1 %vm7813_vm9, %v7814_v21  ;;  %v6622_v13 = vrot.slane %v6606_v14, %v8154_v11  ;;  %v5999_v6 = vsel %vm5991_vm13, %v5990_v50, %v5956_v7 }
 0x2c7   :  { %v6608_v53 = vcombine.low %v6323_v55, %v6306_v1  ;;  %v6331_v54 = vrot.slane %v5999_v6, %v8154_v11  ;;  %v6654_v63 = vcombine.low %v6320_v36, %v6322_v10  ;;  %v6324_v59 = vcombine.high %v6320_v36, %v6320_v36 }
 0x2c8   :  { %v6637_v58 = vcombine.low %v6615_v22, %v6622_v13  ;;  %v6629_v57 = vrot.slane %v6607_v49, %v8154_v11  ;;  %v7289_v1 = vcombine.high %v7281_v3, %v7281_v3  ;;  %v9735_v13 = vrot.slane %v7281_v3, %v8154_v11 }
 0x2c9   :  { %v6636_v23 = vrot.slane %v6608_v53, %v8154_v11  ;;  %v6332_v28 = vcombine.high %v6331_v54, %v6331_v54  ;;  %v6339_v41 = vrot.slane %v6331_v54, %v8154_v11  ;;  %v6663_v5 = vrot.slane %v6654_v63, %v8154_v11 }
 0x2ca   :  { %v6645_v42 = vrot.slane %v6637_v58, %v8154_v11  ;;  %v9731_v22 = vrot.slane %v7289_v1, %v8154_v11 }
 0x2cb   :  { %v6638_v17 = vcombine.low %v6629_v57, %v6636_v23  ;;  %v6346_v38 = vrot.slane %v6332_v28, %v8154_v11  ;;  %v6347_v39 = vcombine.high %v6339_v41, %v6339_v41  ;;  %v6655_v33 = vcombine.low %v6324_v59, %v6339_v41 }
 0x2cc   :  { %v9739_v57 = vcombine.high %v9735_v13, %v9735_v13  ;;  %v9744_v28 = vcombine.high %v9731_v22, %v9731_v22 }
 0x2cd   :  { %v6652_v31 = vrot.slane %v6638_v17, %v8154_v11  ;;  %v6656_v61 = vcombine.low %v6346_v38, %v6347_v39  ;;  %v6670_v16 = vrot.slane %v6655_v33, %v8154_v11 }
 0x2cf   :  { %v6653_v44 = vcombine.low %v6645_v42, %v6652_v31  ;;  %v6677_v48 = vrot.slane %v6656_v61, %v8154_v11  ;;  %v6678_v19 = vcombine.low %v6663_v5, %v6670_v16 }
 0x2d1   :  { %7754 = vmatmul.mubr.msk.f32.gmra.mrb[10].mxu1 %vm6694_vm14, %v6653_v44  ;;  %v6685_v2 = vrot.slane %v6678_v19, %v8154_v11  ;;  %v6692_v25 = vrot.slane %v6677_v48, %v8154_v11 }
 0x2d2   :  { %7756 = vmatprep.mubr.msk.f32.mxu1 %vm7813_vm9, %v7814_v21 }
 0x2d3   :  { %v6693_v51 = vcombine.low %v6685_v2, %v6692_v25  ;;  %v7274_v2 = vcombine.high %v7269_v27, %v7269_v27 }
 0x2d5   :  { %7757 = vmatmul.mubr.msk.f32.gmra.mrb[12].mxu1 %vm6694_vm14, %v6693_v51 }
 0x316   :  { %v6779_v18 = vpop.f32.mrb[0].mxu1 }
 0x317   :  { %v6780_v37 = vadd.f32 %v9714_v24, %v6779_v18  ;;  %v7740_v47 = vpop.f32.mrb[1].mxu1 }
 0x319   :  { %v6820_v20 = vcombine.high %v6780_v37, %v6780_v37  ;;  %v6827_v40 = vrot.slane %v6780_v37, %v8154_v11 }
 0x31b   :  { %v6834_v21 = vrot.slane %v6820_v20, %v8154_v11  ;;  %v6835_v9 = vcombine.high %v6827_v40, %v6827_v40  ;;  %v6843_v15 = vrot.slane %v6827_v40, %v8154_v11 }
 0x31d   :  { %v6857_v45 = vrot.slane %v6835_v9, %v8154_v11  ;;  %v6836_v35 = vcombine.high %v6834_v21, %v6834_v21  ;;  %v6850_v30 = vrot.slane %v6834_v21, %v8154_v11  ;;  %v6865_v0 = vcombine.high %v6843_v15, %v6843_v15 }
 0x31e   :  { %v7288_v9 = vrot.slane %v7274_v2, %v8154_v11 }
 0x31f   :  { %v6867_v26 = vcombine.high %v6857_v45, %v6857_v45  ;;  %v6864_v32 = vrot.slane %v6836_v35, %v8154_v11  ;;  %v7215_v34 = vmax.f32 %v6843_v15, %v6857_v45  ;;  %v6866_v12 = vcombine.high %v6850_v30, %v6850_v30 }
 0x321   :  { %v7216_v8 = vmax.f32 %v6867_v26, %v6850_v30  ;;  %v6868_v29 = vcombine.high %v6864_v32, %v6864_v32  ;;  %v7233_v14 = vmax.f32 %v7215_v34, %v6865_v0 }
 0x323   :  { %v7234_v4 = vmax.f32 %v7216_v8, %v6864_v32  ;;  %v7217_v49 = vmax.f32 %v6866_v12, %v6868_v29  ;;  %v7251_v53 = vmax.f32 %v7233_v14, 0.0  ;;  %v7290_v32 = vcombine.high %v7288_v9, %v7288_v9 }
 0x325   :  { %v6784_v43 = vpop.f32.mrb[2].mxu1  ;;  %v7252_v7 = vmax.f32 %v7234_v4, 0.0  ;;  %v7346_v41 = vmul.f32 %v9735_v13, %v7251_v53  ;;  %v9763_v4 = vrot.slane %v7288_v9, %v8154_v11 }
 0x326   :  { %v6785_v46 = vadd.f32 %v9714_v24, %v6784_v43  ;;  %v7743_v60 = vpop.f32.mrb[3].mxu1 }
 0x327   :  { %v7347_v23 = vmul.f32 %v9731_v22, %v7252_v7 }
 0x328   :  { %v6876_v56 = vrot.slane %v6785_v46, %v8154_v11  ;;  %v6869_v16 = vcombine.high %v6785_v46, %v6785_v46 }
 0x329   :  { %v7382_v33 = vcombine.low %v7346_v41, %v7347_v23 }
 0x32a   :  { %v6884_v50 = vcombine.high %v6876_v56, %v6876_v56  ;;  %v6892_v55 = vrot.slane %v6876_v56, %v8154_v11  ;;  %v6883_v44 = vrot.slane %v6869_v16, %v8154_v11  ;;  %v9766_v56 = vrot.slane %v7290_v32, %v8154_v11 }
 0x32b   :  { %v7392_v31 = vrot.slane %v7382_v33, %v8154_v11 }
 0x32c   :  { %v6906_v36 = vrot.slane %v6884_v50, %v8154_v11  ;;  %v6914_v10 = vcombine.high %v6892_v55, %v6892_v55  ;;  %v7235_v6 = vmax.f32 %v7217_v49, %v6892_v55  ;;  %v6885_v48 = vcombine.high %v6883_v44, %v6883_v44 }
 0x32d   :  { %v6899_v25 = vrot.slane %v6883_v44, %v8154_v11 }
 0x32e   :  { %v6916_v54 = vcombine.high %v6906_v36, %v6906_v36  ;;  %v7218_v58 = vmax.f32 %v6906_v36, %v6914_v10  ;;  %v7253_v59 = vmax.f32 %v7235_v6, 0.0  ;;  %v6913_v19 = vrot.slane %v6885_v48, %v8154_v11 }
 0x32f   :  { %v6915_v21 = vcombine.high %v6899_v25, %v6899_v25  ;;  %v9770_v36 = vcombine.high %v9763_v4, %v9763_v4  ;;  %v9774_v10 = vcombine.high %v9766_v56, %v9766_v56 }
 0x330   :  { %v7236_v63 = vmax.f32 %v7218_v58, %v6916_v54  ;;  %v7348_v38 = vmul.f32 %v9739_v57, %v7253_v59  ;;  %v7219_v47 = vmax.f32 %v6899_v25, %v6913_v19  ;;  %v6917_v27 = vcombine.high %v6913_v19, %v6913_v19 }
 0x332   :  { %v7254_v17 = vmax.f32 %v7236_v63, 0.0  ;;  %v7237_v30 = vmax.f32 %v7219_v47, %v6915_v21 }
 0x334   :  { %v7349_v39 = vmul.f32 %v9744_v28, %v7254_v17  ;;  %v7255_v0 = vmax.f32 %v7237_v30, 0.0 }
 0x336   :  { %v7383_v42 = vcombine.low %v7348_v38, %v7349_v39  ;;  %v7350_v6 = vmul.f32 %v9763_v4, %v7255_v0 }
 0x338   :  { %v7399_v61 = vrot.slane %v7383_v42, %v8154_v11 }
 0x33a   :  { %v7414_v5 = vcombine.low %v7392_v31, %v7399_v61 }
 0x33c   :  { %v7422_v33 = vrot.slane %v7414_v5, %v8154_v11  ;;  %v7639_v5 = vld.sshfl [vmem:[%s9852_s1 + $0x68] sm:$0x1 pattern:$0x75316420] }
 0x345   :  { %v6789_v51 = vpop.f32.mrb[4].mxu1 }
 0x346   :  { %v6790_v18 = vadd.f32 %v9714_v24, %v6789_v51  ;;  %v7746_v37 = vpop.f32.mrb[5].mxu1 }
 0x348   :  { %v6918_v20 = vcombine.high %v6790_v18, %v6790_v18  ;;  %v6925_v40 = vrot.slane %v6790_v18, %v8154_v11 }
 0x34a   :  { %v6932_v45 = vrot.slane %v6918_v20, %v8154_v11  ;;  %v6933_v35 = vcombine.high %v6925_v40, %v6925_v40  ;;  %v6941_v26 = vrot.slane %v6925_v40, %v8154_v11  ;;  %v9793_v20 = vrot.slane %v7639_v5, %v8154_v11 }
 0x34c   :  { %v6934_v15 = vcombine.high %v6932_v45, %v6932_v45  ;;  %v6948_v8 = vrot.slane %v6932_v45, %v8154_v11  ;;  %v6955_v3 = vrot.slane %v6933_v35, %v8154_v11  ;;  %v7220_v43 = vmax.f32 %v6917_v27, %v6941_v26 }
 0x34d   :  { %v6963_v46 = vcombine.high %v6941_v26, %v6941_v26 }
 0x34e   :  { %v6962_v34 = vrot.slane %v6934_v15, %v8154_v11  ;;  %v6964_v60 = vcombine.high %v6948_v8, %v6948_v8  ;;  %v6965_v29 = vcombine.high %v6955_v3, %v6955_v3  ;;  %v7238_v1 = vmax.f32 %v7220_v43, %v6955_v3 }
 0x350   :  { %v6966_v12 = vcombine.high %v6962_v34, %v6962_v34  ;;  %v7221_v14 = vmax.f32 %v6963_v46, %v6965_v29  ;;  %v7222_v50 = vmax.f32 %v6962_v34, %v6964_v60  ;;  %v7256_v55 = vmax.f32 %v7238_v1, 0.0 }
 0x352   :  { %v7239_v49 = vmax.f32 %v7221_v14, %v6948_v8  ;;  %v7240_v7 = vmax.f32 %v7222_v50, %v6966_v12  ;;  %v7351_v53 = vmul.f32 %v9766_v56, %v7256_v55 }
 0x354   :  { %v7257_v54 = vmax.f32 %v7239_v49, 0.0  ;;  %v7258_v58 = vmax.f32 %v7240_v7, 0.0  ;;  %v7384_v23 = vcombine.low %v7350_v6, %v7351_v53 }
 0x356   :  { %v7352_v63 = vmul.f32 %v9770_v36, %v7257_v54  ;;  %v7353_v59 = vmul.f32 %v9774_v10, %v7258_v58  ;;  %v7406_v17 = vrot.slane %v7384_v23, %v8154_v11 }
 0x358   :  { %v7385_v41 = vcombine.low %v7352_v63, %v7353_v59 }
 0x35a   :  { %v7413_v38 = vrot.slane %v7385_v41, %v8154_v11 }
 0x35c   :  { %v7415_v39 = vcombine.low %v7406_v17, %v7413_v38 }
 0x35e   :  { %v7429_v42 = vrot.slane %v7415_v39, %v8154_v11 }
 0x360   :  { %v7430_v31 = vcombine.low %v7422_v33, %v7429_v42 }
 0x362   :  { %v7512_v61 = vsel %vm5965_vm11, %v7430_v31, 0.0 }
 0x363   :  { %7513 = vadd.xlane.f32.xlu0 %v7512_v61 }
 0x36e   :  { %v6794_v16 = vpop.f32.mrb[6].mxu1 }
 0x36f   :  { %v6795_v44 = vadd.f32 %v9714_v24, %v6794_v16  ;;  %v7749_v48 = vpop.f32.mrb[7].mxu1 }
 0x371   :  { %v6974_v19 = vrot.slane %v6795_v44, %v8154_v11  ;;  %v6967_v26 = vcombine.high %v6795_v44, %v6795_v44 }
 0x373   :  { %v6982_v2 = vcombine.high %v6974_v19, %v6974_v19  ;;  %v6990_v25 = vrot.slane %v6974_v19, %v8154_v11  ;;  %v6981_v30 = vrot.slane %v6967_v26, %v8154_v11 }
 0x375   :  { %v7004_v51 = vrot.slane %v6982_v2, %v8154_v11  ;;  %v7012_v18 = vcombine.high %v6990_v25, %v6990_v25  ;;  %v6983_v27 = vcombine.high %v6981_v30, %v6981_v30  ;;  %v6997_v15 = vrot.slane %v6981_v30, %v8154_v11 }
 0x377   :  { %v7223_v37 = vmax.f32 %v6990_v25, %v7004_v51  ;;  %v7014_v32 = vcombine.high %v7004_v51, %v7004_v51  ;;  %v7011_v8 = vrot.slane %v6983_v27, %v8154_v11  ;;  %v7013_v1 = vcombine.high %v6997_v15, %v6997_v15 }
 0x379   :  { %v7241_v47 = vmax.f32 %v7223_v37, %v7012_v18  ;;  %v7224_v3 = vmax.f32 %v7014_v32, %v6997_v15  ;;  %v7015_v60 = vcombine.high %v7011_v8, %v7011_v8 }
 0x37b   :  { %v7259_v40 = vmax.f32 %v7241_v47, 0.0  ;;  %v7242_v12 = vmax.f32 %v7224_v3, %v7011_v8  ;;  %v7225_v49 = vmax.f32 %v7013_v1, %v7015_v60 }
 0x37d   :  { %v7354_v21 = vmul.f32 %v9793_v20, %v7259_v40  ;;  %v7260_v58 = vmax.f32 %v7242_v12, 0.0 }
 0x37f   :  { %v7437_v9 = vrot.slane %v7354_v21, %v8154_v11  ;;  %v7355_v42 = vmul.f32 %v9735_v13, %v7260_v58 }
 0x381   :  { %v7444_v45 = vrot.slane %v7437_v9, %v8154_v11 }
 0x383   :  { %v7516_v35 = vsel %vm7515_vm15, %v7444_v45, 0.0 }
 0x384   :  { %7517 = vadd.xlane.f32.xlu1 %v7516_v35 }
 0x398   :  { %v6799_v43 = vpop.f32.mrb[8].mxu1 }
 0x399   :  { %v6800_v34 = vadd.f32 %v9714_v24, %v6799_v43  ;;  %v7752_v46 = vpop.f32.mrb[9].mxu1 }
 0x39b   :  { %v7016_v29 = vcombine.high %v6800_v34, %v6800_v34  ;;  %v7023_v0 = vrot.slane %v6800_v34, %v8154_v11 }
 0x39d   :  { %v7030_v14 = vrot.slane %v7016_v29, %v8154_v11  ;;  %v7031_v50 = vcombine.high %v7023_v0, %v7023_v0  ;;  %v7039_v55 = vrot.slane %v7023_v0, %v8154_v11 }
 0x39f   :  { %v7032_v7 = vcombine.high %v7030_v14, %v7030_v14  ;;  %v7046_v6 = vrot.slane %v7030_v14, %v8154_v11  ;;  %v7053_v53 = vrot.slane %v7031_v50, %v8154_v11  ;;  %v7061_v54 = vcombine.high %v7039_v55, %v7039_v55 }
 0x3a0   :  { %v7243_v23 = vmax.f32 %v7225_v49, %v7039_v55 }
 0x3a1   :  { %v7060_v63 = vrot.slane %v7032_v7, %v8154_v11  ;;  %v7063_v59 = vcombine.high %v7053_v53, %v7053_v53  ;;  %v7226_v41 = vmax.f32 %v7053_v53, %v7061_v54  ;;  %v7062_v38 = vcombine.high %v7046_v6, %v7046_v6 }
 0x3a2   :  { %v7261_v17 = vmax.f32 %v7243_v23, 0.0 }
 0x3a3   :  { %v7227_v39 = vmax.f32 %v7046_v6, %v7060_v63  ;;  %v7244_v33 = vmax.f32 %v7226_v41, %v7063_v59  ;;  %v7064_v21 = vcombine.high %v7060_v63, %v7060_v63 }
 0x3a4   :  { %v7356_v31 = vmul.f32 %v9731_v22, %v7261_v17  ;;  %v6804_v44 = vpop.f32.mrb[10].mxu1 }
 0x3a5   :  { %v7245_v61 = vmax.f32 %v7227_v39, %v7062_v38  ;;  %v7262_v16 = vmax.f32 %v7244_v33, 0.0  ;;  %v6805_v19 = vadd.f32 %v9714_v24, %v6804_v44  ;;  %v7755_v2 = vpop.f32.mrb[11].mxu1 }
 0x3a6   :  { %v7445_v48 = vcombine.low %v7355_v42, %v7356_v31 }
 0x3a7   :  { %v7263_v25 = vmax.f32 %v7245_v61, 0.0  ;;  %v7065_v51 = vcombine.high %v6805_v19, %v6805_v19  ;;  %v7072_v5 = vrot.slane %v6805_v19, %v8154_v11  ;;  %v7357_v18 = vmul.f32 %v9739_v57, %v7262_v16 }
 0x3a8   :  { %v6809_v40 = vpop.f32.mrb[12].mxu1  ;;  %v7455_v57 = vrot.slane %v7445_v48, %v8154_v11 }
 0x3a9   :  { %v7358_v37 = vmul.f32 %v9744_v28, %v7263_v25  ;;  %v7079_v47 = vrot.slane %v7065_v51, %v8154_v11  ;;  %v7080_v13 = vcombine.high %v7072_v5, %v7072_v5  ;;  %v7088_v22 = vrot.slane %v7072_v5, %v8154_v11  ;;  %v7758_v45 = vpop.f32.mrb[13].mxu1 }
 0x3aa   :  { %v6810_v9 = vadd.f32 %v9714_v24, %v6809_v40 }
 0x3ab   :  { %v7446_v35 = vcombine.low %v7357_v18, %v7358_v37  ;;  %v7081_v26 = vcombine.high %v7079_v47, %v7079_v47  ;;  %v7095_v30 = vrot.slane %v7079_v47, %v8154_v11  ;;  %v7102_v27 = vrot.slane %v7080_v13, %v8154_v11 }
 0x3ac   :  { %v7228_v32 = vmax.f32 %v7064_v21, %v7088_v22  ;;  %v7114_v28 = vcombine.high %v6810_v9, %v6810_v9  ;;  %v7121_v15 = vrot.slane %v6810_v9, %v8154_v11  ;;  %v7110_v43 = vcombine.high %v7088_v22, %v7088_v22 }
 0x3ad   :  { %v7462_v8 = vrot.slane %v7446_v35, %v8154_v11  ;;  %v7109_v3 = vrot.slane %v7081_v26, %v8154_v11  ;;  %v7111_v34 = vcombine.high %v7095_v30, %v7095_v30  ;;  %v7112_v24 = vcombine.high %v7102_v27, %v7102_v27 }
 0x3ae   :  { %v7246_v46 = vmax.f32 %v7228_v32, %v7102_v27  ;;  %v7128_v60 = vrot.slane %v7114_v28, %v8154_v11  ;;  %v7129_v29 = vcombine.high %v7121_v15, %v7121_v15  ;;  %v7137_v0 = vrot.slane %v7121_v15, %v8154_v11 }
 0x3af   :  { %v7113_v1 = vcombine.high %v7109_v3, %v7109_v3  ;;  %v7229_v12 = vmax.f32 %v7110_v43, %v7112_v24  ;;  %v7230_v14 = vmax.f32 %v7109_v3, %v7111_v34  ;;  %v7477_v50 = vcombine.low %v7455_v57, %v7462_v8  ;;  %v7640_v8 = vld [vmem:[%s9852_s1 + $0x70] ss:$0 sm:$0xff] }
 0x3b0   :  { %v7130_v55 = vcombine.high %v7128_v60, %v7128_v60  ;;  %v7151_v49 = vrot.slane %v7129_v29, %v8154_v11  ;;  %v7264_v53 = vmax.f32 %v7246_v46, 0.0  ;;  %v7144_v54 = vrot.slane %v7128_v60, %v8154_v11 }
 0x3b1   :  { %v7247_v7 = vmax.f32 %v7229_v12, %v7095_v30  ;;  %v7248_v6 = vmax.f32 %v7230_v14, %v7113_v1  ;;  %v7159_v58 = vcombine.high %v7137_v0, %v7137_v0  ;;  %v7485_v37 = vrot.slane %v7477_v50, %v8154_v11 }
 0x3b2   :  { %v7160_v23 = vcombine.high %v7151_v49, %v7151_v49  ;;  %v7231_v63 = vmax.f32 %v7137_v0, %v7151_v49  ;;  %v7158_v17 = vrot.slane %v7130_v55, %v8154_v11  ;;  %v7359_v33 = vmul.f32 %v9763_v4, %v7264_v53 }
 0x3b3   :  { %v7265_v59 = vmax.f32 %v7247_v7, 0.0  ;;  %v7266_v41 = vmax.f32 %v7248_v6, 0.0 }
 0x3b4   :  { %v7232_v38 = vmax.f32 %v7160_v23, %v7144_v54  ;;  %v7249_v39 = vmax.f32 %v7231_v63, %v7159_v58 }
 0x3b5   :  { %v7360_v42 = vmul.f32 %v9766_v56, %v7265_v59  ;;  %v7361_v48 = vmul.f32 %v9770_v36, %v7266_v41 }
 0x3b6   :  { %v7267_v31 = vmax.f32 %v7249_v39, 0.0  ;;  %v7250_v61 = vmax.f32 %v7232_v38, %v7158_v17 }
 0x3b7   :  { %v7447_v16 = vcombine.low %v7359_v33, %v7360_v42 }
 0x3b8   :  { %v7362_v44 = vmul.f32 %v9774_v10, %v7267_v31  ;;  %v7268_v19 = vmax.f32 %v7250_v61, 0.0 }
 0x3b9   :  { %v7469_v51 = vrot.slane %v7447_v16, %v8154_v11 }
 0x3ba   :  { %v7448_v2 = vcombine.low %v7361_v48, %v7362_v44  ;;  %v7363_v25 = vmul.f32 %v9793_v20, %v7268_v19  ;;  %v7530_v20 = vand.u32 127, %v671_v52 }
 0x3bc   :  { %v7476_v5 = vrot.slane %v7448_v2, %v8154_v11  ;;  %v7500_v18 = vrot.slane %v7363_v25, %v8154_v11  ;;  %v7535_v22 = vadd.s32 4294967288, %v7530_v20  ;;  %v7533_v35 = vsub.s32 %v7530_v20, %v8138_v62 }
 0x3be   :  { %v7478_v4 = vcombine.low %v7469_v51, %v7476_v5  ;;  %v7507_v56 = vrot.slane %v7500_v18, %v8154_v11  ;;  %v7538_v21 = vsub.s32 %v7535_v22, %v8138_v62 }
 0x3c0   :  { %v7492_v47 = vrot.slane %v7478_v4, %v8154_v11  ;;  %v7522_v10 = vsel %vm7515_vm15, %v7507_v56, 0.0 }
 0x3c2   :  { %v7493_v36 = vcombine.low %v7485_v37, %v7492_v47 }
 0x3c4   :  { %v7519_v13 = vsel %vm5965_vm11, %v7493_v36, 0.0 }
 0x3c5   :  { %7520 = vadd.xlane.f32.xlu0 %v7519_v13 }
 0x3c9   :  { %7523 = vadd.xlane.f32.xlu0 %v7522_v10 }
 0x3f0   :  { %v7514_v40 = vpop.xlane.xlu0 %7513 }
 0x3f1   :  { %v7534_v11 = vrot.slane %v7514_v40, %v7533_v35 }
 0x411   :  { %v7518_v9 = vpop.xlane.xlu1 %7517 }
 0x412   :  { %v7539_v26 = vrot.slane %v7518_v9, %v7538_v21 }
 0x414   :  { %v7541_v32 = vsel %vm7540_vm0, %v7539_v26, %v7534_v11 }
 0x452   :  { %v7521_v45 = vpop.xlane.xlu0 %7520 }
 0x453   :  { %v7545_v27 = vrot.slane %v7521_v45, %v7533_v35 }
 0x456   :  { %v7524_v30 = vpop.xlane.xlu0 %7523 }
 0x457   :  { %v7549_v57 = vrot.slane %v7524_v30, %v7538_v21 }
 0x459   :  { %v7550_v28 = vsel %vm7540_vm0, %v7549_v57, %v7545_v27 }
 0x45a   :  { %v7552_v15 = vsel %vm7551_vm1, %v7550_v28, %v7541_v32 }
 0x45b   :  { %v7555_v52 = vsel %vm7554_vm2, %v7552_v15, 0.0 }
 0x45c   :  { %7556 = vadd.xlane.f32.xlu1 %v7555_v52 }
 0x4e9   :  { %v7557_v3 = vpop.xlane.xlu1 %7556 }
 0x4ea   :  { %v7562_v43 = vadd.f32 %v7640_v8, %v7557_v3 }
 0x4ec   :  { %v7563_v62 = vsub.f32 0.0, %v7562_v43 }
 0x4ee   :  { %v7564_v34 = vmul.f32 1.442695, %v7563_v62 }
 0x4f0   :  { %7785 = vpow2.f32 %v7564_v34 }
 0x4fa   :  { %v7786_v24 = vpop.eup %7785 }
 0x4fb   :  { %v7566_v46 = vadd.f32 1.0, %v7786_v24 }
 0x4fd   :  { %7787 = vrcp.f32 %v7566_v46 }
 0x507   :  { %v7788_v60 = vpop.eup %7787 }
 0x508   :  { %7570 = vst.msk [vmem:[%s9853_s2] sm:$0x3] %vm7569_vm3, %v7788_v60 }

</bundles_post_ra>
